<compile_context>
chip_gen: v7x
topology: tpu7x:2x2x1
jax: 0.10.0
libtpu: 0.0.40
codegen_flags: <defaults>
</compile_context>

<pallas_src>
import functools

import jax
import jax.numpy as jnp
from jax.experimental import pallas as pl
from jax.experimental.pallas import tpu as pltpu


# --------------------------------------------------------------------- kernel
def _fused_kernel(zq_ref, w1_ref, b1_ref, w2_ref, b2_ref, o_ref, *, n_par, n_oc):
    """Fused conv3x3(pad=1) + bias + ReLU + maxpool2 + flatten + linear + hswish.

    zq_ref : [HI, WI, 4*C, TB]  parity space-to-depth of padded input,
                                row = (rh*2+rw)*C + c, lanes = batch tile
    w1_ref : [4*OC, K]          conv weight, rows = (dh*2+dw)*OC + oc,
                                K = (si*2+sj)*4C + (rh*2+rw)*C + c (zeros on
                                the 7 unused shift-slabs per row)
    b1_ref : [OC, 1]            conv bias
    w2_ref : [OUT, Hp*Wp*OC]    linear weight, col = (hp*Wp+wp)*OC + oc
    b2_ref : [OUT, 1]           linear bias
    o_ref  : [OUT, TB]          output (transposed; batch on lanes)
    """
    tb = o_ref.shape[-1]
    z = zq_ref[...]                               # [HI, WI, 4C, TB]
    hi, wi, pc = z.shape[0], z.shape[1], z.shape[2]
    hp, wp = hi - 1, wi - 1
    e = hp * wp                                    # 64 pooled pixels

    # im2col: stack the 4 shift-slabs along the contraction axis.
    # Each slab is a leading-dim slice (no lane/sublane shifts) and the
    # (hp, wp) merge is a free leading-dim reshape.
    slabs = []
    for si in range(2):
        for sj in range(2):
            slab = z[si:si + hp, sj:sj + wp]       # [hp, wp, 4C, TB]
            slabs.append(slab.reshape(e, pc, tb))
    rhs = jnp.concatenate(slabs, axis=1)           # [e, K, TB]

    # Conv: one K-deep contraction (all 9 taps merged), batched over the 64
    # pooled pixels.  Output rows = (pool parity)*OC + oc.
    w1b = jnp.broadcast_to(w1_ref[...], (e,) + w1_ref.shape)   # [e, 4*OC, K]
    conv = jax.lax.dot_general(
        w1b, rhs,
        dimension_numbers=(((2,), (1,)), ((0,), (0,))),
        preferred_element_type=jnp.float32)        # [e, 4*OC, TB]

    # 2x2 max-pool == elementwise max over the 4 parity row-groups.
    pooled = jnp.max(conv.reshape(e, n_par, n_oc, tb), axis=1)  # [e, OC, TB]
    # conv bias + ReLU (both commute with the max), done once.
    pooled = jnp.maximum(pooled + b1_ref[...][None], 0.0)

    # flatten (free outer*sublane merge) + linear: [OUT, 512] @ [512, TB].
    pooled2 = pooled.reshape(e * n_oc, tb).astype(w2_ref.dtype)
    y = jnp.dot(w2_ref[...], pooled2,
                preferred_element_type=jnp.float32) + b2_ref[...]   # [OUT, TB]

    # hswish: x * relu6(x + 3) * (1/6)   (constant multiply, no divide)
    o_ref[...] = y * jnp.clip(y + 3.0, 0.0, 6.0) * (1.0 / 6.0)


# -------------------------------------------------------------------- wrapper
def easy_sequential_forward(x, conv_w, conv_b, lin_w, lin_b,
                            *, block_n=128, compute_dtype=jnp.float32):
    """x: [N, C, H, W] float32 (NCHW).  Returns [N, OUT]."""
    N, C, H, W = x.shape
    OC, _, KH, KW = conv_w.shape
    OUT = lin_w.shape[0]
    assert H % 2 == 0 and W % 2 == 0 and KH == 3 and KW == 3
    Hp, Wp = H // 2, W // 2           # pooled spatial (8, 8)
    HI, WI = Hp + 1, Wp + 1           # parity-plane spatial (9, 9)
    K = 4 * 4 * C                     # shift-slab(4) x parity(4) x C = 64

    # --- batch tile: lane dimension of every matmul.  TB>=128 keeps stores
    #     lane-dense; for tiny N use one full-extent block (still legal).
    if N >= block_n:
        TB = block_n
        Np = pl.cdiv(N, TB) * TB
    else:
        TB = max(8, pl.cdiv(N, 8) * 8)
        Np = TB

    # --- input prep: pad + parity space-to-depth + batch -> lanes.
    #     (One small XLA op per call; fuse into the upstream producer in a
    #     real model.)
    xp = jnp.pad(x, ((0, Np - N), (0, 0), (1, 1), (1, 1)))      # [Np, C, H+2, W+2]
    zq = (xp.reshape(Np, C, HI, 2, WI, 2)                        # (n,c,i,rh,j,rw)
            .transpose(2, 4, 3, 5, 1, 0)                         # (i,j,rh,rw,c,n)
            .reshape(HI, WI, 4 * C, Np)
            .astype(compute_dtype))

    # --- weight re-layouts (tiny; fold offline in a real model).
    # w1[(dh*2+dw)*OC + oc, (si*2+sj)*4C + (rh*2+rw)*C + c] = conv_w[oc,c,kh,kw]
    # with ah = dh+kh = 2*si+rh, aw = dw+kw = 2*sj+rw; unused rows stay zero.
    w1 = jnp.zeros((2, 2, OC, 2, 2, 2, 2, C), conv_w.dtype)
    for dh in range(2):
        for dw in range(2):
            for kh in range(KH):
                for kw in range(KW):
                    ah, aw = dh + kh, dw + kw
                    w1 = w1.at[dh, dw, :, ah >> 1, aw >> 1, ah & 1, aw & 1, :].set(
                        conv_w[:, :, kh, kw])
    w1 = w1.reshape(4 * OC, K).astype(compute_dtype)
    b1 = conv_b.reshape(OC, 1).astype(jnp.float32)

    # Linear weight permuted to the kernel's (hp, wp, oc) flatten order.
    w2 = (lin_w.reshape(OUT, OC, Hp, Wp)
              .transpose(0, 2, 3, 1)                             # [OUT, hp, wp, oc]
              .reshape(OUT, Hp * Wp * OC)
              .astype(compute_dtype))
    b2 = lin_b.reshape(OUT, 1).astype(jnp.float32)

    kernel = functools.partial(_fused_kernel, n_par=4, n_oc=OC)

    out = pl.pallas_call(
        kernel,
        out_shape=jax.ShapeDtypeStruct((OUT, Np), jnp.float32),
        grid=(Np // TB,),
        in_specs=[
            pl.BlockSpec((HI, WI, 4 * C, TB), lambda g: (0, 0, 0, g)),
            pl.BlockSpec((4 * OC, K), lambda g: (0, 0)),
            pl.BlockSpec((OC, 1), lambda g: (0, 0)),
            pl.BlockSpec((OUT, Hp * Wp * OC), lambda g: (0, 0)),
            pl.BlockSpec((OUT, 1), lambda g: (0, 0)),
        ],
        out_specs=pl.BlockSpec((OUT, TB), lambda g: (0, g)),
        compiler_params=pltpu.CompilerParams(
            dimension_semantics=("parallel",)),
    )(zq, w1, b1, w2, b2)

    # Output was computed transposed ([OUT, N]) for lane-dense stores.
    return out[:, :N].T


# ------------------------------------------------------------------ reference
def ref_forward(x, conv_w, conv_b, lin_w, lin_b):
    N, C, H, W = x.shape
    OC = conv_w.shape[0]
    y = jax.lax.conv_general_dilated(
        x, conv_w, window_strides=(1, 1), padding=((1, 1), (1, 1)),
        dimension_numbers=("NCHW", "OIHW", "NCHW"))
    y = y + conv_b[None, :, None, None]
    y = jnp.maximum(y, 0.0)
    y = y.reshape(N, OC, H // 2, 2, W // 2, 2).max(axis=(3, 5))
    y = y.reshape(N, -1)
    y = y @ lin_w.T + lin_b
    return y * jnp.clip(y + 3.0, 0.0, 6.0) / 6.0


if __name__ == "__main__":
    key = jax.random.PRNGKey(0)
    k1, k2, k3, k4, k5 = jax.random.split(key, 5)

    N, C, H, W = 2, 4, 16, 16
    OC, KSZ = 8, 3
    FLAT = OC * (H // 2) * (W // 2)   # 512
    OUT = 32

    x = jax.random.normal(k1, (N, C, H, W), jnp.float32)
    conv_w = jax.random.normal(k2, (OC, C, KSZ, KSZ), jnp.float32) * 0.1
    conv_b = jax.random.normal(k3, (OC,), jnp.float32) * 0.1
    lin_w = jax.random.normal(k4, (OUT, FLAT), jnp.float32) * 0.05
    lin_b = jax.random.normal(k5, (OUT,), jnp.float32) * 0.05

    fwd = jax.jit(easy_sequential_forward)
    out = jax.block_until_ready(fwd(x, conv_w, conv_b, lin_w, lin_b))

    ref = jax.block_until_ready(ref_forward(x, conv_w, conv_b, lin_w, lin_b))
    assert out.shape == (N, OUT)
    assert jnp.allclose(out, ref, rtol=1e-4, atol=1e-4), "mismatch vs reference"

    print("KERNEL_OK")
</pallas_src>

<mosaic_0001>
module attributes {stable_mosaic.version = 11 : i64} {
  func.func @_fused_kernel(%arg0: i32, %arg1: memref<9x9x16x8xf32, #tpu.memory_space<vmem>>, %arg2: memref<32x64xf32, #tpu.memory_space<vmem>>, %arg3: memref<8x1xf32, #tpu.memory_space<vmem>>, %arg4: memref<32x512xf32, #tpu.memory_space<vmem>>, %arg5: memref<32x1xf32, #tpu.memory_space<vmem>>, %arg6: memref<32x8xf32, #tpu.memory_space<vmem>>) attributes {dimension_semantics = [#tpu.dimension_semantics<parallel>], iteration_bounds = array<i64: 1>, scalar_prefetch = 0 : i64, scratch_operands = 0 : i64, tpu.core_type = #tpu.core_type<tc>, window_params = [{transform_indices = @transform_0, window_bounds = array<i64: 9, 9, 16, 8>}, {pipeline_mode = #tpu.pipeline_mode<synchronous>, transform_indices = @transform_1, window_bounds = array<i64: 32, 64>}, {pipeline_mode = #tpu.pipeline_mode<synchronous>, transform_indices = @transform_2, window_bounds = array<i64: 8, 1>}, {pipeline_mode = #tpu.pipeline_mode<synchronous>, transform_indices = @transform_3, window_bounds = array<i64: 32, 512>}, {pipeline_mode = #tpu.pipeline_mode<synchronous>, transform_indices = @transform_4, window_bounds = array<i64: 32, 1>}, {transform_indices = @transform_5, window_bounds = array<i64: 32, 8>}]} {
    %c0 = arith.constant 0 : index
    %c0_0 = arith.constant 0 : index
    %c0_1 = arith.constant 0 : index
    %c0_2 = arith.constant 0 : index
    %0 = vector.load %arg1[%c0, %c0_0, %c0_1, %c0_2] : memref<9x9x16x8xf32, #tpu.memory_space<vmem>>, vector<9x9x16x8xf32>
    %1 = vector.extract_strided_slice %0 {offsets = [0, 0, 0, 0], sizes = [8, 8, 16, 8], strides = [1, 1, 1, 1]} : vector<9x9x16x8xf32> to vector<8x8x16x8xf32>
    %2 = vector.shape_cast %1 : vector<8x8x16x8xf32> to vector<64x16x8xf32>
    %3 = vector.extract_strided_slice %0 {offsets = [0, 1, 0, 0], sizes = [8, 8, 16, 8], strides = [1, 1, 1, 1]} : vector<9x9x16x8xf32> to vector<8x8x16x8xf32>
    %4 = vector.shape_cast %3 : vector<8x8x16x8xf32> to vector<64x16x8xf32>
    %5 = vector.extract_strided_slice %0 {offsets = [1, 0, 0, 0], sizes = [8, 8, 16, 8], strides = [1, 1, 1, 1]} : vector<9x9x16x8xf32> to vector<8x8x16x8xf32>
    %6 = vector.shape_cast %5 : vector<8x8x16x8xf32> to vector<64x16x8xf32>
    %7 = vector.extract_strided_slice %0 {offsets = [1, 1, 0, 0], sizes = [8, 8, 16, 8], strides = [1, 1, 1, 1]} : vector<9x9x16x8xf32> to vector<8x8x16x8xf32>
    %8 = vector.shape_cast %7 : vector<8x8x16x8xf32> to vector<64x16x8xf32>
    %9 = tpu.concatenate %2, %4, %6, %8 in 1 : vector<64x16x8xf32>, vector<64x16x8xf32>, vector<64x16x8xf32>, vector<64x16x8xf32> -> vector<64x64x8xf32>
    %c0_3 = arith.constant 0 : index
    %c0_4 = arith.constant 0 : index
    %10 = vector.load %arg2[%c0_3, %c0_4] : memref<32x64xf32, #tpu.memory_space<vmem>>, vector<32x64xf32>
    %11 = vector.shape_cast %10 : vector<32x64xf32> to vector<1x32x64xf32>
    %12 = vector.broadcast %11 : vector<1x32x64xf32> to vector<64x32x64xf32>
    %cst = arith.constant dense<0.000000e+00> : vector<64x32x8xf32>
    %13 = tpu.matmul %12, %9, %cst {dimension_numbers = #tpu.dot_dimension_numbers<[2], [1], [1], [2], [0, 0, 0, 1, 1, 2], [0], [0]>} : vector<64x32x64xf32>, vector<64x64x8xf32>, vector<64x32x8xf32> -> vector<64x32x8xf32>
    %14 = vector.shape_cast %13 : vector<64x32x8xf32> to vector<64x4x8x8xf32>
    %cst_5 = arith.constant dense<0xFF800000> : vector<64x8x8xf32>
    %15 = vector.multi_reduction <maximumf>, %14, %cst_5 [1] : vector<64x4x8x8xf32> to vector<64x8x8xf32>
    %c0_6 = arith.constant 0 : index
    %c0_7 = arith.constant 0 : index
    %16 = vector.load %arg3[%c0_6, %c0_7] : memref<8x1xf32, #tpu.memory_space<vmem>>, vector<8x1xf32>
    %17 = vector.shape_cast %16 : vector<8x1xf32> to vector<1x8x1xf32>
    %18 = vector.broadcast %17 : vector<1x8x1xf32> to vector<64x8x8xf32>
    %19 = arith.addf %15, %18 : vector<64x8x8xf32>
    %cst_8 = arith.constant 0.000000e+00 : f32
    %20 = vector.broadcast %cst_8 : f32 to vector<64x8x8xf32>
    %21 = arith.maximumf %19, %20 : vector<64x8x8xf32>
    %22 = vector.shape_cast %21 : vector<64x8x8xf32> to vector<512x8xf32>
    %c0_9 = arith.constant 0 : index
    %c0_10 = arith.constant 0 : index
    %23 = vector.load %arg4[%c0_9, %c0_10] : memref<32x512xf32, #tpu.memory_space<vmem>>, vector<32x512xf32>
    %cst_11 = arith.constant dense<0.000000e+00> : vector<32x8xf32>
    %24 = tpu.matmul %23, %22, %cst_11 {dimension_numbers = #tpu.dot_dimension_numbers<[1], [0], [0], [1], [0, 0, 1, 1], [], []>} : vector<32x512xf32>, vector<512x8xf32>, vector<32x8xf32> -> vector<32x8xf32>
    %c0_12 = arith.constant 0 : index
    %c0_13 = arith.constant 0 : index
    %25 = vector.load %arg5[%c0_12, %c0_13] : memref<32x1xf32, #tpu.memory_space<vmem>>, vector<32x1xf32>
    %26 = vector.broadcast %25 : vector<32x1xf32> to vector<32x8xf32>
    %27 = arith.addf %24, %26 : vector<32x8xf32>
    %cst_14 = arith.constant 3.000000e+00 : f32
    %28 = vector.broadcast %cst_14 : f32 to vector<32x8xf32>
    %29 = arith.addf %27, %28 : vector<32x8xf32>
    %cst_15 = arith.constant 0.000000e+00 : f32
    %cst_16 = arith.constant 6.000000e+00 : f32
    %30 = vector.broadcast %cst_15 : f32 to vector<32x8xf32>
    %31 = arith.maximumf %30, %29 : vector<32x8xf32>
    %32 = vector.broadcast %cst_16 : f32 to vector<32x8xf32>
    %33 = arith.minimumf %32, %31 : vector<32x8xf32>
    %34 = arith.mulf %27, %33 : vector<32x8xf32>
    %cst_17 = arith.constant 0.166666672 : f32
    %35 = vector.broadcast %cst_17 : f32 to vector<32x8xf32>
    %36 = arith.mulf %34, %35 : vector<32x8xf32>
    %c0_18 = arith.constant 0 : index
    %c0_19 = arith.constant 0 : index
    %37 = vector.load %arg6[%c0_18, %c0_19] : memref<32x8xf32, #tpu.memory_space<vmem>>, vector<32x8xf32>
    tpu.vector_store %arg6[%c0_18, %c0_19], %36 {strides = array<i32>} : memref<32x8xf32, #tpu.memory_space<vmem>>, vector<32x8xf32>,
    return
  }
  func.func @transform_0(%arg0: i32) -> (i32, i32, i32, i32) {
    %c0_i32 = arith.constant 0 : i32
    %c0_i32_0 = arith.constant 0 : i32
    %c0_i32_1 = arith.constant 0 : i32
    %c0_i32_2 = arith.constant 0 : i32
    return %c0_i32, %c0_i32_0, %c0_i32_1, %arg0 : i32, i32, i32, i32
  }
  func.func @transform_1(%arg0: i32) -> (i32, i32) {
    %c0_i32 = arith.constant 0 : i32
    %c0_i32_0 = arith.constant 0 : i32
    %c0_i32_1 = arith.constant 0 : i32
    return %c0_i32, %c0_i32_0 : i32, i32
  }
  func.func @transform_2(%arg0: i32) -> (i32, i32) {
    %c0_i32 = arith.constant 0 : i32
    %c0_i32_0 = arith.constant 0 : i32
    %c0_i32_1 = arith.constant 0 : i32
    return %c0_i32, %c0_i32_0 : i32, i32
  }
  func.func @transform_3(%arg0: i32) -> (i32, i32) {
    %c0_i32 = arith.constant 0 : i32
    %c0_i32_0 = arith.constant 0 : i32
    %c0_i32_1 = arith.constant 0 : i32
    return %c0_i32, %c0_i32_0 : i32, i32
  }
  func.func @transform_4(%arg0: i32) -> (i32, i32) {
    %c0_i32 = arith.constant 0 : i32
    %c0_i32_0 = arith.constant 0 : i32
    %c0_i32_1 = arith.constant 0 : i32
    return %c0_i32, %c0_i32_0 : i32, i32
  }
  func.func @transform_5(%arg0: i32) -> (i32, i32) {
    %c0_i32 = arith.constant 0 : i32
    %c0_i32_0 = arith.constant 0 : i32
    return %c0_i32, %arg0 : i32, i32
  }
}

</mosaic_0001>

<bundles_post_ra>
// kernel: easy_sequential_forward.1
= control target key start
LH: loop header
LB: loop body
LE: loop exit
PB: predicated region body
PF: predicated region fallthrough
CT: control target
= control target key end

     0   :  { %v10079_v3 = vmov 0   ;;  %vm186_vm0 = vcmask 523264   ;;  %vm5639_vm1 = vcmask 64512   ;;  %s12233_s0 = inlined_call_operand.vmem [shape: f32[9,9,16,8], index: 0, kind: input, shape index: {}]   ;;  %s12234_s1 = inlined_call_operand.vmem [shape: f32[32,64], index: 1, kind: input, shape index: {}]   ;;  %s12235_s2 = inlined_call_operand.vmem [shape: f32[8,1], index: 2, kind: input, shape index: {}]   ;;  %s12236_s4 = inlined_call_operand.vmem [shape: f32[32,1], index: 4, kind: input, shape index: {}]   ;;  %s12237_s3 = inlined_call_operand.vmem [shape: f32[32,512], index: 3, kind: input, shape index: {}]   ;;  %s12238_s5 = inlined_call_operand.vmem [shape: f32[32,8], index: 5, kind: output, shape index: {}]  }
   0x1   :  { %v20_v0 = vld [vmem:[%s12233_s0] sm:$0xff]  ;;  %v21_v1 = vld [vmem:[%s12233_s0 + $0x8] sm:$0xff]  ;;  %v22_v2 = vld [vmem:[%s12233_s0 + $0x10] sm:$0xff]  ;;  %10069 = vset.pattern.permute.xlu0 %v10079_v3  ;;  %10070 = vset.pattern.permute.xlu1 %v10079_v3 }
   0x2   :  { %v8980_v4 = vpack.c.bf16 %v21_v1, %v20_v0  ;;  %v23_v5 = vld [vmem:[%s12233_s0 + $0x18] sm:$0xff]  ;;  %v24_v6 = vld [vmem:[%s12233_s0 + $0x20] sm:$0xff]  ;;  %v25_v7 = vld [vmem:[%s12233_s0 + $0x28] sm:$0xff] }
   0x3   :  { %v8984_v8 = vpack.c.bf16 %v23_v5, %v22_v2  ;;  %v9000_v9 = vpack.c.bf16 %v25_v7, %v24_v6  ;;  %v38_v10 = vld [vmem:[%s12233_s0 + $0x90] sm:$0xff]  ;;  %v39_v11 = vld [vmem:[%s12233_s0 + $0x98] sm:$0xff]  ;;  %v40_v12 = vld [vmem:[%s12233_s0 + $0xa0] sm:$0xff] }
   0x4   :  { %8981 = vmatprep.subr.bf16.mxu0 %v8980_v4  ;;  %v41_v13 = vld [vmem:[%s12233_s0 + $0xa8] sm:$0xff]  ;;  %v10143_v14 = vld [vmem:[%s12234_s1] sm:$0xff]  ;;  %v10145_v15 = vpack.c.bf16 %v39_v11, %v38_v10  ;;  %v42_v17 = vld [vmem:[%s12233_s0 + $0xb0] sm:$0xff] }
   0x5   :  { %8997 = vmatprep.subr.bf16.mxu1 %v8984_v8  ;;  %8983 = vmatpush3.bf16.msra.mxu0 %v8980_v4  ;;  %v10147_v16 = vpack.c.bf16 %v41_v13, %v40_v12  ;;  %v43_v18 = vld [vmem:[%s12233_s0 + $0xb8] sm:$0xff]  ;;  %v26_v20 = vld [vmem:[%s12233_s0 + $0x30] sm:$0xff]  ;;  %v10177_v23 = vld [vmem:[%s12234_s1 + $0x8] sm:$0xff] }
   0x6   :  { %8999 = vmatpush3.bf16.msra.mxu1 %v8984_v8  ;;  %8985 = vmatprep.subr.bf16.mxu0 %v8984_v8  ;;  %v10161_v19 = vpack.c.bf16 %v43_v18, %v42_v17  ;;  %v27_v21 = vld [vmem:[%s12233_s0 + $0x38] sm:$0xff]  ;;  %v28_v24 = vld [vmem:[%s12233_s0 + $0x40] sm:$0xff]  ;;  %v29_v25 = vld [vmem:[%s12233_s0 + $0x48] sm:$0xff] }
   0x7   :  { %9001 = vmatprep.subr.bf16.mxu1 %v9000_v9  ;;  %7588 = vmatprep.mubr.msk.f32.mxu0 %vm186_vm0, %v10143_v14  ;;  %v9016_v22 = vpack.c.bf16 %v27_v21, %v26_v20  ;;  %v10189_v26 = vld [vmem:[%s12234_s1 + $0x10] sm:$0xff]  ;;  %v6088_v27 = vld [vmem:[%s12235_s2] sm:$0xff]  ;;  %v9032_v28 = vpack.c.bf16 %v29_v25, %v28_v24  ;;  %v45_v30 = vld [vmem:[%s12233_s0 + $0xc8] sm:$0xff] }
   0x8   :  { %7610 = vmatprep.mubr.msk.f32.mxu1 %vm186_vm0, %v10143_v14  ;;  %v44_v29 = vld [vmem:[%s12233_s0 + $0xc0] sm:$0xff]  ;;  %6091 = vperm.xlu0 %10069, %v6088_v27   ;;  %v10207_v31 = vld [vmem:[%s12234_s1 + $0x18] sm:$0xff]  ;;  %v46_v33 = vld [vmem:[%s12233_s0 + $0xd0] sm:$0xff] }
   0x9   :  { %8987 = vmatpush3.bf16.msra.mxu0 %v8984_v8  ;;  %v10213_v32 = vpack.c.bf16 %v45_v30, %v44_v29  ;;  %v47_v34 = vld [vmem:[%s12233_s0 + $0xd8] sm:$0xff]  ;;  %v30_v36 = vld [vmem:[%s12233_s0 + $0x50] sm:$0xff]  ;;  %v32_v39 = vld [vmem:[%s12233_s0 + $0x60] sm:$0xff] }
   0xa   :  { %9003 = vmatpush3.bf16.msra.mxu1 %v9000_v9  ;;  %8989 = vmatprep.subr.bf16.mxu0 %v10145_v15  ;;  %v10227_v35 = vpack.c.bf16 %v47_v34, %v46_v33  ;;  %v31_v37 = vld [vmem:[%s12233_s0 + $0x58] sm:$0xff]  ;;  %v33_v40 = vld [vmem:[%s12233_s0 + $0x68] sm:$0xff]  ;;  %v48_v42 = vld [vmem:[%s12233_s0 + $0xe0] sm:$0xff] }
   0xb   :  { %9005 = vmatprep.subr.bf16.mxu1 %v10147_v16  ;;  %v9048_v38 = vpack.c.bf16 %v31_v37, %v30_v36  ;;  %v9064_v41 = vpack.c.bf16 %v33_v40, %v32_v39  ;;  %v49_v43 = vld [vmem:[%s12233_s0 + $0xe8] sm:$0xff]  ;;  %v50_v45 = vld [vmem:[%s12233_s0 + $0xf0] sm:$0xff]  ;;  %v51_v46 = vld [vmem:[%s12233_s0 + $0xf8] sm:$0xff] }
   0xc   :  { %v10265_v44 = vpack.c.bf16 %v49_v43, %v48_v42  ;;  %v10279_v47 = vpack.c.bf16 %v51_v46, %v50_v45  ;;  %v34_v48 = vld [vmem:[%s12233_s0 + $0x70] sm:$0xff]  ;;  %v35_v49 = vld [vmem:[%s12233_s0 + $0x78] sm:$0xff]  ;;  %v36_v51 = vld [vmem:[%s12233_s0 + $0x80] sm:$0xff] }
   0xd   :  { %8991 = vmatpush3.bf16.msra.mxu0 %v10145_v15  ;;  %v9080_v50 = vpack.c.bf16 %v35_v49, %v34_v48  ;;  %v37_v52 = vld [vmem:[%s12233_s0 + $0x88] sm:$0xff]  ;;  %v52_v54 = vld [vmem:[%s12233_s0 + $0x100] sm:$0xff]  ;;  %v54_v57 = vld [vmem:[%s12233_s0 + $0x110] sm:$0xff] }
   0xe   :  { %9007 = vmatpush3.bf16.msra.mxu1 %v10147_v16  ;;  %8993 = vmatprep.subr.bf16.mxu0 %v10147_v16  ;;  %v9096_v53 = vpack.c.bf16 %v37_v52, %v36_v51  ;;  %v53_v55 = vld [vmem:[%s12233_s0 + $0x108] sm:$0xff]  ;;  %v55_v58 = vld [vmem:[%s12233_s0 + $0x118] sm:$0xff]  ;;  %v56_v60 = vld [vmem:[%s12233_s0 + $0x120] sm:$0xff] }
   0xf   :  { %9009 = vmatprep.subr.bf16.mxu1 %v10161_v19  ;;  %v10317_v56 = vpack.c.bf16 %v53_v55, %v52_v54  ;;  %v10331_v59 = vpack.c.bf16 %v55_v58, %v54_v57  ;;  %v57_v61 = vld [vmem:[%s12233_s0 + $0x128] sm:$0xff]  ;;  %v58_v62 = vld [vmem:[%s12233_s0 + $0x130] sm:$0xff]  ;;  %v59_v63 = vld [vmem:[%s12233_s0 + $0x138] sm:$0xff] }
  0x10   :  { %v10365_v0 = vpack.c.bf16 %v57_v61, %v56_v60  ;;  %v10370_v1 = vpack.c.bf16 %v59_v63, %v58_v62  ;;  %v60_v2 = vld [vmem:[%s12233_s0 + $0x140] sm:$0xff]  ;;  %v61_v3 = vld [vmem:[%s12233_s0 + $0x148] sm:$0xff]  ;;  %v62_v5 = vld [vmem:[%s12233_s0 + $0x150] sm:$0xff] }
  0x11   :  { %8995 = vmatpush3.bf16.msra.mxu0 %v10147_v16  ;;  %v10387_v4 = vpack.c.bf16 %v61_v3, %v60_v2  ;;  %v63_v6 = vld [vmem:[%s12233_s0 + $0x158] sm:$0xff]  ;;  %v64_v8 = vld [vmem:[%s12233_s0 + $0x160] sm:$0xff]  ;;  %v66_v11 = vld [vmem:[%s12233_s0 + $0x170] sm:$0xff] }
  0x12   :  { %9011 = vmatpush3.bf16.msra.mxu1 %v10161_v19  ;;  %9013 = vmatprep.subr.bf16.mxu0 %v9000_v9  ;;  %v10418_v7 = vpack.c.bf16 %v63_v6, %v62_v5  ;;  %v67_v12 = vld [vmem:[%s12233_s0 + $0x178] sm:$0xff]  ;;  %v70_v18 = vld [vmem:[%s12233_s0 + $0x190] sm:$0xff]  ;;  %v72_v21 = vld [vmem:[%s12233_s0 + $0x1a0] sm:$0xff] }
  0x13   :  { %9029 = vmatprep.subr.bf16.mxu1 %v9016_v22  ;;  %v10466_v13 = vpack.c.bf16 %v67_v12, %v66_v11  ;;  %v74_v25 = vld [vmem:[%s12233_s0 + $0x1b0] sm:$0xff]  ;;  %v75_v27 = vld [vmem:[%s12233_s0 + $0x1b8] sm:$0xff]  ;;  %v77_v29 = vld [vmem:[%s12233_s0 + $0x1c8] sm:$0xff] }
  0x14   :  { %7589 = vmatmul.mubr.msk.f32.vlgmr.msra.gmra.mrb[0].mxu0 %vm186_vm0, %v10177_v23  ;;  %v10565_v30 = vpack.c.bf16 %v75_v27, %v74_v25  ;;  %v78_v33 = vld [vmem:[%s12233_s0 + $0x1d0] sm:$0xff]  ;;  %v79_v34 = vld [vmem:[%s12233_s0 + $0x1d8] sm:$0xff]  ;;  %v80_v36 = vld [vmem:[%s12233_s0 + $0x1e0] sm:$0xff] }
  0x15   :  { %7611 = vmatmul.mubr.msk.f32.vlgmr.msra.gmra.mrb[0].mxu1 %vm186_vm0, %v10177_v23  ;;  %9015 = vmatpush3.bf16.msra.mxu0 %v9000_v9  ;;  %v65_v9 = vld [vmem:[%s12233_s0 + $0x168] sm:$0xff]  ;;  %v82_v39 = vld [vmem:[%s12233_s0 + $0x1f0] sm:$0xff]  ;;  %v83_v40 = vld [vmem:[%s12233_s0 + $0x1f8] sm:$0xff] }
  0x16   :  { %9031 = vmatpush3.bf16.msra.mxu1 %v9016_v22  ;;  %7591 = vmatprep.mubr.msk.f32.mxu0 %vm186_vm0, %v10189_v26  ;;  %v10435_v10 = vpack.c.bf16 %v65_v9, %v64_v8  ;;  %v81_v37 = vld [vmem:[%s12233_s0 + $0x1e8] sm:$0xff]  ;;  %v84_v42 = vld [vmem:[%s12233_s0 + $0x200] sm:$0xff]  ;;  %v86_v45 = vld [vmem:[%s12233_s0 + $0x210] sm:$0xff] }
  0x17   :  { %7613 = vmatprep.mubr.msk.f32.mxu1 %vm186_vm0, %v10189_v26  ;;  %9017 = vmatprep.subr.bf16.mxu0 %v9016_v22  ;;  %v85_v43 = vld [vmem:[%s12233_s0 + $0x208] sm:$0xff]  ;;  %v87_v46 = vld [vmem:[%s12233_s0 + $0x218] sm:$0xff]  ;;  %v88_v48 = vld [vmem:[%s12233_s0 + $0x220] sm:$0xff] }
  0x18   :  { %7592 = vmatmul.mubr.msk.f32.gmra.mrb[2].mxu0 %vm186_vm0, %v10207_v31  ;;  %9033 = vmatprep.subr.bf16.mxu1 %v9032_v28  ;;  %v89_v49 = vld [vmem:[%s12233_s0 + $0x228] sm:$0xff]  ;;  %v90_v51 = vld [vmem:[%s12233_s0 + $0x230] sm:$0xff]  ;;  %v91_v52 = vld [vmem:[%s12233_s0 + $0x238] sm:$0xff] }
  0x19   :  { %7614 = vmatmul.mubr.msk.f32.gmra.mrb[2].mxu1 %vm186_vm0, %v10207_v31  ;;  %9019 = vmatpush3.bf16.msra.mxu0 %v9016_v22  ;;  %v73_v22 = vld [vmem:[%s12233_s0 + $0x1a8] sm:$0xff]  ;;  %v92_v54 = vld [vmem:[%s12233_s0 + $0x240] sm:$0xff]  ;;  %v95_v57 = vld [vmem:[%s12233_s0 + $0x258] sm:$0xff] }
  0x1a   :  { %9035 = vmatpush3.bf16.msra.mxu1 %v9032_v28  ;;  %9021 = vmatprep.subr.bf16.mxu0 %v10161_v19  ;;  %v10531_v24 = vpack.c.bf16 %v73_v22, %v72_v21  ;;  %v93_v55 = vld [vmem:[%s12233_s0 + $0x248] sm:$0xff]  ;;  %v96_v60 = vld [vmem:[%s12233_s0 + $0x260] sm:$0xff]  ;;  %v98_v63 = vld [vmem:[%s12233_s0 + $0x270] sm:$0xff] }
  0x1b   :  { %9037 = vmatprep.subr.bf16.mxu1 %v10213_v32  ;;  %7632 = vmatprep.mubr.msk.f32.mxu0 %vm186_vm0, %v10143_v14  ;;  %v10765_v58 = vpack.c.bf16 %v93_v55, %v92_v54  ;;  %v97_v61 = vld [vmem:[%s12233_s0 + $0x268] sm:$0xff]  ;;  %v100_v2 = vld [vmem:[%s12233_s0 + $0x280] sm:$0xff]  ;;  %v102_v5 = vld [vmem:[%s12233_s0 + $0x290] sm:$0xff] }
  0x1c   :  { %7654 = vmatprep.mubr.msk.f32.mxu1 %vm186_vm0, %v10143_v14  ;;  %v10787_v62 = vpack.c.bf16 %v97_v61, %v96_v60  ;;  %v101_v3 = vld [vmem:[%s12233_s0 + $0x288] sm:$0xff]  ;;  %v103_v6 = vld [vmem:[%s12233_s0 + $0x298] sm:$0xff]  ;;  %v104_v12 = vld [vmem:[%s12233_s0 + $0x2a0] sm:$0xff] }
  0x1d   :  { %9023 = vmatpush3.bf16.msra.mxu0 %v10161_v19  ;;  %v10866_v8 = vpack.c.bf16 %v103_v6, %v102_v5  ;;  %v10954_v61 = vld [vmem:[%s12234_s1] sm:$0xff] }
  0x1e   :  { %9039 = vmatpush3.bf16.msra.mxu1 %v10213_v32  ;;  %9025 = vmatprep.subr.bf16.mxu0 %v10213_v32 }
  0x1f   :  { %9041 = vmatprep.subr.bf16.mxu1 %v10227_v35 }
  0x21   :  { %9027 = vmatpush3.bf16.msra.mxu0 %v10213_v32 }
  0x22   :  { %9043 = vmatpush3.bf16.msra.mxu1 %v10227_v35  ;;  %9045 = vmatprep.subr.bf16.mxu0 %v9032_v28 }
  0x23   :  { %9061 = vmatprep.subr.bf16.mxu1 %v9048_v38 }
  0x24   :  { %7633 = vmatmul.mubr.msk.f32.vlgmr.msra.gmra.mrb[4].mxu0 %vm186_vm0, %v10177_v23 }
  0x25   :  { %7655 = vmatmul.mubr.msk.f32.vlgmr.msra.gmra.mrb[4].mxu1 %vm186_vm0, %v10177_v23  ;;  %9047 = vmatpush3.bf16.msra.mxu0 %v9032_v28  ;;  %v76_v28 = vld [vmem:[%s12233_s0 + $0x1c0] sm:$0xff] }
  0x26   :  { %9063 = vmatpush3.bf16.msra.mxu1 %v9048_v38  ;;  %7635 = vmatprep.mubr.msk.f32.mxu0 %vm186_vm0, %v10189_v26 }
  0x27   :  { %7657 = vmatprep.mubr.msk.f32.mxu1 %vm186_vm0, %v10189_v26  ;;  %9049 = vmatprep.subr.bf16.mxu0 %v9048_v38 }
  0x28   :  { %7636 = vmatmul.mubr.msk.f32.gmra.mrb[6].mxu0 %vm186_vm0, %v10207_v31  ;;  %9065 = vmatprep.subr.bf16.mxu1 %v9064_v41 }
  0x29   :  { %7658 = vmatmul.mubr.msk.f32.gmra.mrb[6].mxu1 %vm186_vm0, %v10207_v31  ;;  %9051 = vmatpush3.bf16.msra.mxu0 %v9048_v38  ;;  %v10618_v38 = vpack.c.bf16 %v81_v37, %v80_v36 }
  0x2a   :  { %9067 = vmatpush3.bf16.msra.mxu1 %v9064_v41  ;;  %9053 = vmatprep.subr.bf16.mxu0 %v10227_v35 }
  0x2b   :  { %9069 = vmatprep.subr.bf16.mxu1 %v10265_v44  ;;  %7676 = vmatprep.mubr.msk.f32.mxu0 %vm186_vm0, %v10143_v14 }
  0x2c   :  { %7698 = vmatprep.mubr.msk.f32.mxu1 %vm186_vm0, %v10143_v14 }
  0x2d   :  { %9055 = vmatpush3.bf16.msra.mxu0 %v10227_v35 }
  0x2e   :  { %9071 = vmatpush3.bf16.msra.mxu1 %v10265_v44  ;;  %9057 = vmatprep.subr.bf16.mxu0 %v10265_v44 }
  0x2f   :  { %9073 = vmatprep.subr.bf16.mxu1 %v10279_v47 }
  0x31   :  { %9059 = vmatpush3.bf16.msra.mxu0 %v10265_v44 }
  0x32   :  { %9075 = vmatpush3.bf16.msra.mxu1 %v10279_v47  ;;  %9077 = vmatprep.subr.bf16.mxu0 %v9064_v41 }
  0x33   :  { %9093 = vmatprep.subr.bf16.mxu1 %v9080_v50 }
  0x34   :  { %7677 = vmatmul.mubr.msk.f32.vlgmr.msra.gmra.mrb[8].mxu0 %vm186_vm0, %v10177_v23 }
  0x35   :  { %7699 = vmatmul.mubr.msk.f32.vlgmr.msra.gmra.mrb[8].mxu1 %vm186_vm0, %v10177_v23  ;;  %9079 = vmatpush3.bf16.msra.mxu0 %v9064_v41  ;;  %v10635_v41 = vpack.c.bf16 %v83_v40, %v82_v39  ;;  %v106_v39 = vld [vmem:[%s12233_s0 + $0x2b0] sm:$0xff]  ;;  %v107_v40 = vld [vmem:[%s12233_s0 + $0x2b8] sm:$0xff] }
  0x36   :  { %9095 = vmatpush3.bf16.msra.mxu1 %v9080_v50  ;;  %7679 = vmatprep.mubr.msk.f32.mxu0 %vm186_vm0, %v10189_v26 }
  0x37   :  { %7701 = vmatprep.mubr.msk.f32.mxu1 %vm186_vm0, %v10189_v26  ;;  %9081 = vmatprep.subr.bf16.mxu0 %v9080_v50 }
  0x38   :  { %7680 = vmatmul.mubr.msk.f32.gmra.mrb[10].mxu0 %vm186_vm0, %v10207_v31  ;;  %9097 = vmatprep.subr.bf16.mxu1 %v9096_v53 }
  0x39   :  { %7702 = vmatmul.mubr.msk.f32.gmra.mrb[10].mxu1 %vm186_vm0, %v10207_v31  ;;  %9083 = vmatpush3.bf16.msra.mxu0 %v9080_v50  ;;  %v10714_v50 = vpack.c.bf16 %v89_v49, %v88_v48  ;;  %v108_v48 = vld [vmem:[%s12233_s0 + $0x2c0] sm:$0xff] }
  0x3a   :  { %9099 = vmatpush3.bf16.msra.mxu1 %v9096_v53  ;;  %9085 = vmatprep.subr.bf16.mxu0 %v10279_v47  ;;  %v10731_v53 = vpack.c.bf16 %v91_v52, %v90_v51 }
  0x3b   :  { %9101 = vmatprep.subr.bf16.mxu1 %v10317_v56  ;;  %7720 = vmatprep.mubr.msk.f32.mxu0 %vm186_vm0, %v10143_v14 }
  0x3c   :  { %7742 = vmatprep.mubr.msk.f32.mxu1 %vm186_vm0, %v10143_v14 }
  0x3d   :  { %9087 = vmatpush3.bf16.msra.mxu0 %v10279_v47 }
  0x3e   :  { %9103 = vmatpush3.bf16.msra.mxu1 %v10317_v56  ;;  %9089 = vmatprep.subr.bf16.mxu0 %v10317_v56 }
  0x3f   :  { %9105 = vmatprep.subr.bf16.mxu1 %v10331_v59 }
  0x41   :  { %9091 = vmatpush3.bf16.msra.mxu0 %v10317_v56 }
  0x42   :  { %9107 = vmatpush3.bf16.msra.mxu1 %v10331_v59  ;;  %9109 = vmatprep.subr.bf16.mxu0 %v10145_v15 }
  0x43   :  { %9125 = vmatprep.subr.bf16.mxu1 %v10147_v16 }
  0x44   :  { %7721 = vmatmul.mubr.msk.f32.vlgmr.msra.gmra.mrb[12].mxu0 %vm186_vm0, %v10177_v23 }
  0x45   :  { %7743 = vmatmul.mubr.msk.f32.vlgmr.msra.gmra.mrb[12].mxu1 %vm186_vm0, %v10177_v23  ;;  %9111 = vmatpush3.bf16.msra.mxu0 %v10145_v15  ;;  %v68_v15 = vld [vmem:[%s12233_s0 + $0x180] sm:$0xff] }
  0x46   :  { %9127 = vmatpush3.bf16.msra.mxu1 %v10147_v16  ;;  %7723 = vmatprep.mubr.msk.f32.mxu0 %vm186_vm0, %v10189_v26 }
  0x47   :  { %7745 = vmatprep.mubr.msk.f32.mxu1 %vm186_vm0, %v10189_v26  ;;  %9113 = vmatprep.subr.bf16.mxu0 %v10147_v16 }
  0x48   :  { %7724 = vmatmul.mubr.msk.f32.gmra.mrb[14].mxu0 %vm186_vm0, %v10207_v31  ;;  %9129 = vmatprep.subr.bf16.mxu1 %v10161_v19 }
  0x49   :  { %7746 = vmatmul.mubr.msk.f32.gmra.mrb[14].mxu1 %vm186_vm0, %v10207_v31  ;;  %9115 = vmatpush3.bf16.msra.mxu0 %v10147_v16  ;;  %v69_v16 = vld [vmem:[%s12233_s0 + $0x188] sm:$0xff] }
  0x4a   :  { %9131 = vmatpush3.bf16.msra.mxu1 %v10161_v19  ;;  %9117 = vmatprep.subr.bf16.mxu0 %v10365_v0  ;;  %v10483_v17 = vpack.c.bf16 %v69_v16, %v68_v15 }
  0x4b   :  { %9133 = vmatprep.subr.bf16.mxu1 %v10370_v1  ;;  %7764 = vmatprep.mubr.msk.f32.mxu0 %vm186_vm0, %v10143_v14 }
  0x4c   :  { %7786 = vmatprep.mubr.msk.f32.mxu1 %vm186_vm0, %v10143_v14 }
  0x4d   :  { %9119 = vmatpush3.bf16.msra.mxu0 %v10365_v0 }
  0x4e   :  { %9135 = vmatpush3.bf16.msra.mxu1 %v10370_v1  ;;  %9121 = vmatprep.subr.bf16.mxu0 %v10370_v1 }
  0x4f   :  { %9137 = vmatprep.subr.bf16.mxu1 %v10387_v4 }
  0x51   :  { %9123 = vmatpush3.bf16.msra.mxu0 %v10370_v1 }
  0x52   :  { %9139 = vmatpush3.bf16.msra.mxu1 %v10387_v4  ;;  %9141 = vmatprep.subr.bf16.mxu0 %v10161_v19 }
  0x53   :  { %9157 = vmatprep.subr.bf16.mxu1 %v10213_v32 }
  0x54   :  { %7765 = vmatmul.mubr.msk.f32.vlgmr.msra.gmra.mrb[16].mxu0 %vm186_vm0, %v10177_v23 }
  0x55   :  { %7787 = vmatmul.mubr.msk.f32.vlgmr.msra.gmra.mrb[16].mxu1 %vm186_vm0, %v10177_v23  ;;  %9143 = vmatpush3.bf16.msra.mxu0 %v10161_v19  ;;  %v71_v19 = vld [vmem:[%s12233_s0 + $0x198] sm:$0xff] }
  0x56   :  { %9159 = vmatpush3.bf16.msra.mxu1 %v10213_v32  ;;  %7767 = vmatprep.mubr.msk.f32.mxu0 %vm186_vm0, %v10189_v26  ;;  %v10514_v20 = vpack.c.bf16 %v71_v19, %v70_v18 }
  0x57   :  { %7789 = vmatprep.mubr.msk.f32.mxu1 %vm186_vm0, %v10189_v26  ;;  %9145 = vmatprep.subr.bf16.mxu0 %v10213_v32 }
  0x58   :  { %7768 = vmatmul.mubr.msk.f32.gmra.mrb[18].mxu0 %vm186_vm0, %v10207_v31  ;;  %9161 = vmatprep.subr.bf16.mxu1 %v10227_v35 }
  0x59   :  { %7790 = vmatmul.mubr.msk.f32.gmra.mrb[18].mxu1 %vm186_vm0, %v10207_v31  ;;  %9147 = vmatpush3.bf16.msra.mxu0 %v10213_v32  ;;  %v10570_v32 = vpack.c.bf16 %v77_v29, %v76_v28 }
  0x5a   :  { %9163 = vmatpush3.bf16.msra.mxu1 %v10227_v35  ;;  %9149 = vmatprep.subr.bf16.mxu0 %v10387_v4 }
  0x5b   :  { %9165 = vmatprep.subr.bf16.mxu1 %v10418_v7  ;;  %7808 = vmatprep.mubr.msk.f32.mxu0 %vm186_vm0, %v10143_v14 }
  0x5c   :  { %7830 = vmatprep.mubr.msk.f32.mxu1 %vm186_vm0, %v10143_v14 }
  0x5d   :  { %9151 = vmatpush3.bf16.msra.mxu0 %v10387_v4 }
  0x5e   :  { %9167 = vmatpush3.bf16.msra.mxu1 %v10418_v7  ;;  %9153 = vmatprep.subr.bf16.mxu0 %v10418_v7 }
  0x5f   :  { %9169 = vmatprep.subr.bf16.mxu1 %v10435_v10 }
  0x61   :  { %9155 = vmatpush3.bf16.msra.mxu0 %v10418_v7 }
  0x62   :  { %9171 = vmatpush3.bf16.msra.mxu1 %v10435_v10  ;;  %9173 = vmatprep.subr.bf16.mxu0 %v10227_v35 }
  0x63   :  { %9189 = vmatprep.subr.bf16.mxu1 %v10265_v44 }
  0x64   :  { %7809 = vmatmul.mubr.msk.f32.vlgmr.msra.gmra.mrb[20].mxu0 %vm186_vm0, %v10177_v23 }
  0x65   :  { %7831 = vmatmul.mubr.msk.f32.vlgmr.msra.gmra.mrb[20].mxu1 %vm186_vm0, %v10177_v23  ;;  %9175 = vmatpush3.bf16.msra.mxu0 %v10227_v35  ;;  %v10587_v35 = vpack.c.bf16 %v79_v34, %v78_v33 }
  0x66   :  { %9191 = vmatpush3.bf16.msra.mxu1 %v10265_v44  ;;  %7811 = vmatprep.mubr.msk.f32.mxu0 %vm186_vm0, %v10189_v26 }
  0x67   :  { %7833 = vmatprep.mubr.msk.f32.mxu1 %vm186_vm0, %v10189_v26  ;;  %9177 = vmatprep.subr.bf16.mxu0 %v10265_v44 }
  0x68   :  { %7812 = vmatmul.mubr.msk.f32.gmra.mrb[22].mxu0 %vm186_vm0, %v10207_v31  ;;  %9193 = vmatprep.subr.bf16.mxu1 %v10279_v47 }
  0x69   :  { %7834 = vmatmul.mubr.msk.f32.gmra.mrb[22].mxu1 %vm186_vm0, %v10207_v31  ;;  %9179 = vmatpush3.bf16.msra.mxu0 %v10265_v44  ;;  %v10666_v44 = vpack.c.bf16 %v85_v43, %v84_v42 }
  0x6a   :  { %9195 = vmatpush3.bf16.msra.mxu1 %v10279_v47  ;;  %9181 = vmatprep.subr.bf16.mxu0 %v10435_v10 }
  0x6b   :  { %9197 = vmatprep.subr.bf16.mxu1 %v10466_v13  ;;  %7852 = vmatprep.mubr.msk.f32.mxu0 %vm186_vm0, %v10143_v14 }
  0x6c   :  { %7874 = vmatprep.mubr.msk.f32.mxu1 %vm186_vm0, %v10143_v14 }
  0x6d   :  { %9183 = vmatpush3.bf16.msra.mxu0 %v10435_v10 }
  0x6e   :  { %9199 = vmatpush3.bf16.msra.mxu1 %v10466_v13  ;;  %9185 = vmatprep.subr.bf16.mxu0 %v10466_v13 }
  0x6f   :  { %9201 = vmatprep.subr.bf16.mxu1 %v10483_v17 }
  0x71   :  { %9187 = vmatpush3.bf16.msra.mxu0 %v10466_v13 }
  0x72   :  { %9203 = vmatpush3.bf16.msra.mxu1 %v10483_v17  ;;  %9205 = vmatprep.subr.bf16.mxu0 %v10279_v47 }
  0x73   :  { %9221 = vmatprep.subr.bf16.mxu1 %v10317_v56 }
  0x74   :  { %7853 = vmatmul.mubr.msk.f32.vlgmr.msra.gmra.mrb[24].mxu0 %vm186_vm0, %v10177_v23 }
  0x75   :  { %7875 = vmatmul.mubr.msk.f32.vlgmr.msra.gmra.mrb[24].mxu1 %vm186_vm0, %v10177_v23  ;;  %9207 = vmatpush3.bf16.msra.mxu0 %v10279_v47  ;;  %v10683_v47 = vpack.c.bf16 %v87_v46, %v86_v45 }
  0x76   :  { %9223 = vmatpush3.bf16.msra.mxu1 %v10317_v56  ;;  %7855 = vmatprep.mubr.msk.f32.mxu0 %vm186_vm0, %v10189_v26 }
  0x77   :  { %7877 = vmatprep.mubr.msk.f32.mxu1 %vm186_vm0, %v10189_v26  ;;  %9209 = vmatprep.subr.bf16.mxu0 %v10317_v56 }
  0x78   :  { %7856 = vmatmul.mubr.msk.f32.gmra.mrb[26].mxu0 %vm186_vm0, %v10207_v31  ;;  %9225 = vmatprep.subr.bf16.mxu1 %v10331_v59 }
  0x79   :  { %7878 = vmatmul.mubr.msk.f32.gmra.mrb[26].mxu1 %vm186_vm0, %v10207_v31  ;;  %9211 = vmatpush3.bf16.msra.mxu0 %v10317_v56  ;;  %v94_v56 = vld [vmem:[%s12233_s0 + $0x250] sm:$0xff] }
  0x7a   :  { %9227 = vmatpush3.bf16.msra.mxu1 %v10331_v59  ;;  %9213 = vmatprep.subr.bf16.mxu0 %v10483_v17  ;;  %v10770_v59 = vpack.c.bf16 %v95_v57, %v94_v56 }
  0x7b   :  { %9229 = vmatprep.subr.bf16.mxu1 %v10514_v20  ;;  %7896 = vmatprep.mubr.msk.f32.mxu0 %vm186_vm0, %v10143_v14 }
  0x7c   :  { %7918 = vmatprep.mubr.msk.f32.mxu1 %vm186_vm0, %v10143_v14 }
  0x7d   :  { %9215 = vmatpush3.bf16.msra.mxu0 %v10483_v17 }
  0x7e   :  { %9231 = vmatpush3.bf16.msra.mxu1 %v10514_v20  ;;  %9217 = vmatprep.subr.bf16.mxu0 %v10514_v20 }
  0x7f   :  { %9233 = vmatprep.subr.bf16.mxu1 %v10531_v24 }
  0x81   :  { %9219 = vmatpush3.bf16.msra.mxu0 %v10514_v20 }
  0x82   :  { %9235 = vmatpush3.bf16.msra.mxu1 %v10531_v24  ;;  %9237 = vmatprep.subr.bf16.mxu0 %v10365_v0 }
  0x83   :  { %9253 = vmatprep.subr.bf16.mxu1 %v10370_v1 }
  0x84   :  { %7897 = vmatmul.mubr.msk.f32.vlgmr.msra.gmra.mrb[28].mxu0 %vm186_vm0, %v10177_v23 }
  0x85   :  { %7919 = vmatmul.mubr.msk.f32.vlgmr.msra.gmra.mrb[28].mxu1 %vm186_vm0, %v10177_v23  ;;  %9239 = vmatpush3.bf16.msra.mxu0 %v10365_v0  ;;  %v99_v0 = vld [vmem:[%s12233_s0 + $0x278] sm:$0xff] }
  0x86   :  { %9255 = vmatpush3.bf16.msra.mxu1 %v10370_v1  ;;  %7899 = vmatprep.mubr.msk.f32.mxu0 %vm186_vm0, %v10189_v26 }
  0x87   :  { %7921 = vmatprep.mubr.msk.f32.mxu1 %vm186_vm0, %v10189_v26  ;;  %9241 = vmatprep.subr.bf16.mxu0 %v10370_v1 }
  0x88   :  { %7900 = vmatmul.mubr.msk.f32.gmra.mrb[30].mxu0 %vm186_vm0, %v10207_v31  ;;  %9257 = vmatprep.subr.bf16.mxu1 %v10387_v4 }
  0x89   :  { %7922 = vmatmul.mubr.msk.f32.gmra.mrb[30].mxu1 %vm186_vm0, %v10207_v31  ;;  %9243 = vmatpush3.bf16.msra.mxu0 %v10370_v1  ;;  %v10818_v1 = vpack.c.bf16 %v99_v0, %v98_v63 }
  0x8a   :  { %9259 = vmatpush3.bf16.msra.mxu1 %v10387_v4  ;;  %9245 = vmatprep.subr.bf16.mxu0 %v10565_v30 }
  0x8b   :  { %9261 = vmatprep.subr.bf16.mxu1 %v10570_v32  ;;  %7940 = vmatprep.mubr.msk.f32.mxu0 %vm186_vm0, %v10143_v14 }
  0x8c   :  { %7962 = vmatprep.mubr.msk.f32.mxu1 %vm186_vm0, %v10143_v14 }
  0x8d   :  { %9247 = vmatpush3.bf16.msra.mxu0 %v10565_v30 }
  0x8e   :  { %9263 = vmatpush3.bf16.msra.mxu1 %v10570_v32  ;;  %9249 = vmatprep.subr.bf16.mxu0 %v10570_v32 }
  0x8f   :  { %9265 = vmatprep.subr.bf16.mxu1 %v10587_v35 }
  0x91   :  { %9251 = vmatpush3.bf16.msra.mxu0 %v10570_v32 }
  0x92   :  { %9267 = vmatpush3.bf16.msra.mxu1 %v10587_v35  ;;  %9269 = vmatprep.subr.bf16.mxu0 %v10387_v4 }
  0x93   :  { %9285 = vmatprep.subr.bf16.mxu1 %v10418_v7 }
  0x94   :  { %7941 = vmatmul.mubr.msk.f32.vlgmr.msra.gmra.mrb[32].mxu0 %vm186_vm0, %v10177_v23 }
  0x95   :  { %7963 = vmatmul.mubr.msk.f32.vlgmr.msra.gmra.mrb[32].mxu1 %vm186_vm0, %v10177_v23  ;;  %9271 = vmatpush3.bf16.msra.mxu0 %v10387_v4  ;;  %v10835_v4 = vpack.c.bf16 %v101_v3, %v100_v2 }
  0x96   :  { %9287 = vmatpush3.bf16.msra.mxu1 %v10418_v7  ;;  %7943 = vmatprep.mubr.msk.f32.mxu0 %vm186_vm0, %v10189_v26 }
  0x97   :  { %7965 = vmatprep.mubr.msk.f32.mxu1 %vm186_vm0, %v10189_v26  ;;  %9273 = vmatprep.subr.bf16.mxu0 %v10418_v7 }
  0x98   :  { %7944 = vmatmul.mubr.msk.f32.gmra.mrb[34].mxu0 %vm186_vm0, %v10207_v31  ;;  %9289 = vmatprep.subr.bf16.mxu1 %v10435_v10 }
  0x99   :  { %7966 = vmatmul.mubr.msk.f32.gmra.mrb[34].mxu1 %vm186_vm0, %v10207_v31  ;;  %9275 = vmatpush3.bf16.msra.mxu0 %v10418_v7 }
  0x9a   :  { %9291 = vmatpush3.bf16.msra.mxu1 %v10435_v10  ;;  %9277 = vmatprep.subr.bf16.mxu0 %v10587_v35 }
  0x9b   :  { %9293 = vmatprep.subr.bf16.mxu1 %v10618_v38  ;;  %7984 = vmatprep.mubr.msk.f32.mxu0 %vm186_vm0, %v10143_v14 }
  0x9c   :  { %8006 = vmatprep.mubr.msk.f32.mxu1 %vm186_vm0, %v10143_v14 }
  0x9d   :  { %9279 = vmatpush3.bf16.msra.mxu0 %v10587_v35 }
  0x9e   :  { %9295 = vmatpush3.bf16.msra.mxu1 %v10618_v38  ;;  %9281 = vmatprep.subr.bf16.mxu0 %v10618_v38 }
  0x9f   :  { %9297 = vmatprep.subr.bf16.mxu1 %v10635_v41 }
  0xa1   :  { %9283 = vmatpush3.bf16.msra.mxu0 %v10618_v38 }
  0xa2   :  { %9299 = vmatpush3.bf16.msra.mxu1 %v10635_v41  ;;  %9301 = vmatprep.subr.bf16.mxu0 %v10435_v10 }
  0xa3   :  { %9317 = vmatprep.subr.bf16.mxu1 %v10466_v13 }
  0xa4   :  { %7985 = vmatmul.mubr.msk.f32.vlgmr.msra.gmra.mrb[36].mxu0 %vm186_vm0, %v10177_v23 }
  0xa5   :  { %8007 = vmatmul.mubr.msk.f32.vlgmr.msra.gmra.mrb[36].mxu1 %vm186_vm0, %v10177_v23  ;;  %9303 = vmatpush3.bf16.msra.mxu0 %v10435_v10 }
  0xa6   :  { %9319 = vmatpush3.bf16.msra.mxu1 %v10466_v13  ;;  %7987 = vmatprep.mubr.msk.f32.mxu0 %vm186_vm0, %v10189_v26 }
  0xa7   :  { %8009 = vmatprep.mubr.msk.f32.mxu1 %vm186_vm0, %v10189_v26  ;;  %9305 = vmatprep.subr.bf16.mxu0 %v10466_v13 }
  0xa8   :  { %7988 = vmatmul.mubr.msk.f32.gmra.mrb[38].mxu0 %vm186_vm0, %v10207_v31  ;;  %9321 = vmatprep.subr.bf16.mxu1 %v10483_v17 }
  0xa9   :  { %8010 = vmatmul.mubr.msk.f32.gmra.mrb[38].mxu1 %vm186_vm0, %v10207_v31  ;;  %9307 = vmatpush3.bf16.msra.mxu0 %v10466_v13  ;;  %v105_v13 = vld [vmem:[%s12233_s0 + $0x2a8] sm:$0xff] }
  0xaa   :  { %9323 = vmatpush3.bf16.msra.mxu1 %v10483_v17  ;;  %9309 = vmatprep.subr.bf16.mxu0 %v10635_v41  ;;  %v10887_v22 = vpack.c.bf16 %v105_v13, %v104_v12  ;;  %v110_v12 = vld [vmem:[%s12233_s0 + $0x2d0] sm:$0xff]  ;;  %v111_v13 = vld [vmem:[%s12233_s0 + $0x2d8] sm:$0xff] }
  0xab   :  { %9325 = vmatprep.subr.bf16.mxu1 %v10666_v44  ;;  %8028 = vmatprep.mubr.msk.f32.mxu0 %vm186_vm0, %v10143_v14 }
  0xac   :  { %8050 = vmatprep.mubr.msk.f32.mxu1 %vm186_vm0, %v10143_v14 }
  0xad   :  { %9311 = vmatpush3.bf16.msra.mxu0 %v10635_v41 }
  0xae   :  { %9327 = vmatpush3.bf16.msra.mxu1 %v10666_v44  ;;  %9313 = vmatprep.subr.bf16.mxu0 %v10666_v44 }
  0xaf   :  { %9329 = vmatprep.subr.bf16.mxu1 %v10683_v47 }
  0xb1   :  { %9315 = vmatpush3.bf16.msra.mxu0 %v10666_v44 }
  0xb2   :  { %9331 = vmatpush3.bf16.msra.mxu1 %v10683_v47  ;;  %9333 = vmatprep.subr.bf16.mxu0 %v10483_v17 }
  0xb3   :  { %9349 = vmatprep.subr.bf16.mxu1 %v10514_v20 }
  0xb4   :  { %8029 = vmatmul.mubr.msk.f32.vlgmr.msra.gmra.mrb[40].mxu0 %vm186_vm0, %v10177_v23 }
  0xb5   :  { %8051 = vmatmul.mubr.msk.f32.vlgmr.msra.gmra.mrb[40].mxu1 %vm186_vm0, %v10177_v23  ;;  %9335 = vmatpush3.bf16.msra.mxu0 %v10483_v17 }
  0xb6   :  { %9351 = vmatpush3.bf16.msra.mxu1 %v10514_v20  ;;  %8031 = vmatprep.mubr.msk.f32.mxu0 %vm186_vm0, %v10189_v26 }
  0xb7   :  { %8053 = vmatprep.mubr.msk.f32.mxu1 %vm186_vm0, %v10189_v26  ;;  %9337 = vmatprep.subr.bf16.mxu0 %v10514_v20 }
  0xb8   :  { %8032 = vmatmul.mubr.msk.f32.gmra.mrb[42].mxu0 %vm186_vm0, %v10207_v31  ;;  %9353 = vmatprep.subr.bf16.mxu1 %v10531_v24 }
  0xb9   :  { %8054 = vmatmul.mubr.msk.f32.gmra.mrb[42].mxu1 %vm186_vm0, %v10207_v31  ;;  %9339 = vmatpush3.bf16.msra.mxu0 %v10514_v20 }
  0xba   :  { %9355 = vmatpush3.bf16.msra.mxu1 %v10531_v24  ;;  %9341 = vmatprep.subr.bf16.mxu0 %v10683_v47 }
  0xbb   :  { %9357 = vmatprep.subr.bf16.mxu1 %v10714_v50  ;;  %8072 = vmatprep.mubr.msk.f32.mxu0 %vm186_vm0, %v10143_v14 }
  0xbc   :  { %8094 = vmatprep.mubr.msk.f32.mxu1 %vm186_vm0, %v10143_v14 }
  0xbd   :  { %9343 = vmatpush3.bf16.msra.mxu0 %v10683_v47 }
  0xbe   :  { %9359 = vmatpush3.bf16.msra.mxu1 %v10714_v50  ;;  %9345 = vmatprep.subr.bf16.mxu0 %v10714_v50 }
  0xbf   :  { %9361 = vmatprep.subr.bf16.mxu1 %v10731_v53 }
  0xc1   :  { %9347 = vmatpush3.bf16.msra.mxu0 %v10714_v50 }
  0xc2   :  { %9363 = vmatpush3.bf16.msra.mxu1 %v10731_v53  ;;  %9365 = vmatprep.subr.bf16.mxu0 %v10565_v30 }
  0xc3   :  { %9381 = vmatprep.subr.bf16.mxu1 %v10570_v32 }
  0xc4   :  { %8073 = vmatmul.mubr.msk.f32.vlgmr.msra.gmra.mrb[44].mxu0 %vm186_vm0, %v10177_v23 }
  0xc5   :  { %8095 = vmatmul.mubr.msk.f32.vlgmr.msra.gmra.mrb[44].mxu1 %vm186_vm0, %v10177_v23  ;;  %9367 = vmatpush3.bf16.msra.mxu0 %v10565_v30 }
  0xc6   :  { %9383 = vmatpush3.bf16.msra.mxu1 %v10570_v32  ;;  %8075 = vmatprep.mubr.msk.f32.mxu0 %vm186_vm0, %v10189_v26 }
  0xc7   :  { %8097 = vmatprep.mubr.msk.f32.mxu1 %vm186_vm0, %v10189_v26  ;;  %9369 = vmatprep.subr.bf16.mxu0 %v10570_v32 }
  0xc8   :  { %8076 = vmatmul.mubr.msk.f32.gmra.mrb[46].mxu0 %vm186_vm0, %v10207_v31  ;;  %9385 = vmatprep.subr.bf16.mxu1 %v10587_v35 }
  0xc9   :  { %8098 = vmatmul.mubr.msk.f32.gmra.mrb[46].mxu1 %vm186_vm0, %v10207_v31  ;;  %9371 = vmatpush3.bf16.msra.mxu0 %v10570_v32 }
  0xca   :  { %9387 = vmatpush3.bf16.msra.mxu1 %v10587_v35  ;;  %9373 = vmatprep.subr.bf16.mxu0 %v10765_v58 }
  0xcb   :  { %9389 = vmatprep.subr.bf16.mxu1 %v10770_v59  ;;  %8116 = vmatprep.mubr.msk.f32.mxu0 %vm186_vm0, %v10143_v14 }
  0xcc   :  { %8138 = vmatprep.mubr.msk.f32.mxu1 %vm186_vm0, %v10143_v14 }
  0xcd   :  { %9375 = vmatpush3.bf16.msra.mxu0 %v10765_v58 }
  0xce   :  { %9391 = vmatpush3.bf16.msra.mxu1 %v10770_v59  ;;  %9377 = vmatprep.subr.bf16.mxu0 %v10770_v59 }
  0xcf   :  { %9393 = vmatprep.subr.bf16.mxu1 %v10787_v62 }
  0xd1   :  { %9379 = vmatpush3.bf16.msra.mxu0 %v10770_v59 }
  0xd2   :  { %9395 = vmatpush3.bf16.msra.mxu1 %v10787_v62  ;;  %9397 = vmatprep.subr.bf16.mxu0 %v10587_v35 }
  0xd3   :  { %9413 = vmatprep.subr.bf16.mxu1 %v10618_v38 }
  0xd4   :  { %8117 = vmatmul.mubr.msk.f32.vlgmr.msra.gmra.mrb[48].mxu0 %vm186_vm0, %v10177_v23 }
  0xd5   :  { %8139 = vmatmul.mubr.msk.f32.vlgmr.msra.gmra.mrb[48].mxu1 %vm186_vm0, %v10177_v23  ;;  %9399 = vmatpush3.bf16.msra.mxu0 %v10587_v35 }
  0xd6   :  { %9415 = vmatpush3.bf16.msra.mxu1 %v10618_v38  ;;  %8119 = vmatprep.mubr.msk.f32.mxu0 %vm186_vm0, %v10189_v26 }
  0xd7   :  { %8141 = vmatprep.mubr.msk.f32.mxu1 %vm186_vm0, %v10189_v26  ;;  %9401 = vmatprep.subr.bf16.mxu0 %v10618_v38 }
  0xd8   :  { %8120 = vmatmul.mubr.msk.f32.gmra.mrb[50].mxu0 %vm186_vm0, %v10207_v31  ;;  %9417 = vmatprep.subr.bf16.mxu1 %v10635_v41 }
  0xd9   :  { %8142 = vmatmul.mubr.msk.f32.gmra.mrb[50].mxu1 %vm186_vm0, %v10207_v31  ;;  %9403 = vmatpush3.bf16.msra.mxu0 %v10618_v38 }
  0xda   :  { %9419 = vmatpush3.bf16.msra.mxu1 %v10635_v41  ;;  %9405 = vmatprep.subr.bf16.mxu0 %v10787_v62 }
  0xdb   :  { %9421 = vmatprep.subr.bf16.mxu1 %v10818_v1  ;;  %8160 = vmatprep.mubr.msk.f32.mxu0 %vm186_vm0, %v10143_v14 }
  0xdc   :  { %8182 = vmatprep.mubr.msk.f32.mxu1 %vm186_vm0, %v10143_v14 }
  0xdd   :  { %9407 = vmatpush3.bf16.msra.mxu0 %v10787_v62 }
  0xde   :  { %9423 = vmatpush3.bf16.msra.mxu1 %v10818_v1  ;;  %9409 = vmatprep.subr.bf16.mxu0 %v10818_v1 }
  0xdf   :  { %9425 = vmatprep.subr.bf16.mxu1 %v10835_v4 }
  0xe1   :  { %9411 = vmatpush3.bf16.msra.mxu0 %v10818_v1 }
  0xe2   :  { %9427 = vmatpush3.bf16.msra.mxu1 %v10835_v4  ;;  %9429 = vmatprep.subr.bf16.mxu0 %v10635_v41 }
  0xe3   :  { %9445 = vmatprep.subr.bf16.mxu1 %v10666_v44 }
  0xe4   :  { %8161 = vmatmul.mubr.msk.f32.vlgmr.msra.gmra.mrb[52].mxu0 %vm186_vm0, %v10177_v23 }
  0xe5   :  { %8183 = vmatmul.mubr.msk.f32.vlgmr.msra.gmra.mrb[52].mxu1 %vm186_vm0, %v10177_v23  ;;  %9431 = vmatpush3.bf16.msra.mxu0 %v10635_v41 }
  0xe6   :  { %9447 = vmatpush3.bf16.msra.mxu1 %v10666_v44  ;;  %8163 = vmatprep.mubr.msk.f32.mxu0 %vm186_vm0, %v10189_v26 }
  0xe7   :  { %v7590_v7 = vpop.f32.mrb[0].mxu0  ;;  %8185 = vmatprep.mubr.msk.f32.mxu1 %vm186_vm0, %v10189_v26  ;;  %9433 = vmatprep.subr.bf16.mxu0 %v10666_v44 }
  0xe8   :  { %v5641_v9 = vsel %vm5639_vm1, %v7590_v7, -inf  ;;  %v7612_v10 = vpop.f32.mrb[0].mxu1  ;;  %v265_v11 = vpop.f32.mrb[1].mxu0  ;;  %8164 = vmatmul.mubr.msk.f32.gmra.mrb[54].mxu0 %vm186_vm0, %v10207_v31  ;;  %9449 = vmatprep.subr.bf16.mxu1 %v10683_v47 }
  0xe9   :  { %v5648_v15 = vsel %vm5639_vm1, %v7612_v10, -inf  ;;  %v5640_v16 = vsel %vm5639_vm1, %v265_v11, -inf  ;;  %v350_v17 = vpop.f32.mrb[1].mxu1  ;;  %8186 = vmatmul.mubr.msk.f32.gmra.mrb[54].mxu1 %vm186_vm0, %v10207_v31  ;;  %9435 = vmatpush3.bf16.msra.mxu0 %v10666_v44  ;;  %v10926_v44 = vpack.c.bf16 %v107_v40, %v106_v39 }
  0xea   :  { %v5642_v18 = vmax.f32 %v5640_v16, %v5641_v9  ;;  %v5647_v19 = vsel %vm5639_vm1, %v350_v17, -inf  ;;  %9451 = vmatpush3.bf16.msra.mxu1 %v10683_v47  ;;  %9437 = vmatprep.subr.bf16.mxu0 %v10835_v4  ;;  %v10983_v16 = vld [vmem:[%s12234_s1 + $0x8] sm:$0xff]  ;;  %v112_v17 = vld [vmem:[%s12233_s0 + $0x2e0] sm:$0xff] }
  0xeb   :  { %v5649_v20 = vmax.f32 %v5647_v19, %v5648_v15  ;;  %v7593_v21 = vpop.f32.mrb[2].mxu0  ;;  %9453 = vmatprep.subr.bf16.mxu1 %v10866_v8  ;;  %8204 = vmatprep.mubr.msk.f32.mxu0 %vm186_vm0, %v10143_v14 }
  0xec   :  { %v7615_v24 = vpop.f32.mrb[2].mxu1  ;;  %v275_v25 = vpop.f32.mrb[3].mxu0  ;;  %8226 = vmatprep.mubr.msk.f32.mxu1 %vm186_vm0, %v10143_v14  ;;  %v5645_v27 = vsel %vm5639_vm1, %v7593_v21, -inf  ;;  %v11004_v21 = vpack.c.bf16 %v111_v13, %v110_v12 }
  0xed   :  { %v5643_v28 = vsel %vm5639_vm1, %v275_v25, -inf  ;;  %v360_v29 = vpop.f32.mrb[3].mxu1  ;;  %9439 = vmatpush3.bf16.msra.mxu0 %v10835_v4  ;;  %v5652_v30 = vsel %vm5639_vm1, %v7615_v24, -inf  ;;  %v10901_v14 = vpop.permute.xlu0 %6091 }
  0xee   :  { %v5644_v32 = vmax.f32 %v5642_v18, %v5643_v28  ;;  %v5650_v33 = vsel %vm5639_vm1, %v360_v29, -inf  ;;  %9455 = vmatpush3.bf16.msra.mxu1 %v10866_v8  ;;  %9441 = vmatprep.subr.bf16.mxu0 %v10866_v8  ;;  %v113_v18 = vld [vmem:[%s12233_s0 + $0x2e8] sm:$0xff] }
  0xef   :  { %v5651_v34 = vmax.f32 %v5649_v20, %v5650_v33  ;;  %9457 = vmatprep.subr.bf16.mxu1 %v10887_v22  ;;  %v11000_v20 = vld [vmem:[%s12234_s1 + $0x10] sm:$0xff]  ;;  %v11009_v25 = vpack.c.bf16 %v113_v18, %v112_v17  ;;  %v115_v33 = vld [vmem:[%s12233_s0 + $0x2f8] sm:$0xff] }
  0xf0   :  { %v5646_v35 = vmax.f32 %v5644_v32, %v5645_v27  ;;  %v114_v32 = vld [vmem:[%s12233_s0 + $0x2f0] sm:$0xff] }
  0xf1   :  { %v5653_v36 = vmax.f32 %v5651_v34, %v5652_v30  ;;  %9443 = vmatpush3.bf16.msra.mxu0 %v10866_v8  ;;  %v11017_v30 = vld [vmem:[%s12234_s1 + $0x18] sm:$0xff] }
  0xf2   :  { %9459 = vmatpush3.bf16.msra.mxu1 %v10887_v22  ;;  %9461 = vmatprep.subr.bf16.mxu0 %v10683_v47  ;;  %v6094_v37 = vadd.f32 %v10901_v14, %v5646_v35 }
  0xf3   :  { %9477 = vmatprep.subr.bf16.mxu1 %v10714_v50  ;;  %v6095_v38 = vadd.f32 %v10901_v14, %v5653_v36 }
  0xf4   :  { %8205 = vmatmul.mubr.msk.f32.vlgmr.msra.gmra.mrb[56].mxu0 %vm186_vm0, %v10177_v23  ;;  %v6158_v41 = vmax.f32 %v6094_v37, 0.0 }
  0xf5   :  { %8227 = vmatmul.mubr.msk.f32.vlgmr.msra.gmra.mrb[56].mxu1 %vm186_vm0, %v10177_v23  ;;  %9463 = vmatpush3.bf16.msra.mxu0 %v10683_v47  ;;  %v6159_v42 = vmax.f32 %v6095_v38, 0.0 }
  0xf6   :  { %9479 = vmatpush3.bf16.msra.mxu1 %v10714_v50  ;;  %8207 = vmatprep.mubr.msk.f32.mxu0 %vm186_vm0, %v10189_v26 }
  0xf7   :  { %v7634_v43 = vpop.f32.mrb[4].mxu0  ;;  %8229 = vmatprep.mubr.msk.f32.mxu1 %vm186_vm0, %v10189_v26  ;;  %9465 = vmatprep.subr.bf16.mxu0 %v10714_v50  ;;  %v10928_v45 = vpack.c.bf16 %v6159_v42, %v6158_v41  ;;  %v109_v26 = vld [vmem:[%s12233_s0 + $0x2c8] sm:$0xff]  ;;  %v11037_v41 = vpack.c.bf16 %v115_v33, %v114_v32 }
  0xf8   :  { %v5655_v23 = vsel %vm5639_vm1, %v7634_v43, -inf  ;;  %v7656_v46 = vpop.f32.mrb[4].mxu1  ;;  %v435_v47 = vpop.f32.mrb[5].mxu0  ;;  %8208 = vmatmul.mubr.msk.f32.gmra.mrb[58].mxu0 %vm186_vm0, %v10207_v31  ;;  %9481 = vmatprep.subr.bf16.mxu1 %v10731_v53  ;;  %v10949_v60 = vpack.c.bf16 %v109_v26, %v108_v48 }
  0xf9   :  { %v5662_v49 = vsel %vm5639_vm1, %v7656_v46, -inf  ;;  %v5654_v51 = vsel %vm5639_vm1, %v435_v47, -inf  ;;  %v520_v52 = vpop.f32.mrb[5].mxu1  ;;  %8230 = vmatmul.mubr.msk.f32.gmra.mrb[58].mxu1 %vm186_vm0, %v10207_v31  ;;  %9467 = vmatpush3.bf16.msra.mxu0 %v10714_v50 }
  0xfa   :  { %v5656_v54 = vmax.f32 %v5654_v51, %v5655_v23  ;;  %v5661_v55 = vsel %vm5639_vm1, %v520_v52, -inf  ;;  %9483 = vmatpush3.bf16.msra.mxu1 %v10731_v53  ;;  %9469 = vmatprep.subr.bf16.mxu0 %v10887_v22 }
  0xfb   :  { %v5663_v56 = vmax.f32 %v5661_v55, %v5662_v49  ;;  %v7637_v57 = vpop.f32.mrb[6].mxu0  ;;  %9485 = vmatprep.subr.bf16.mxu1 %v10926_v44  ;;  %8248 = vmatprep.mubr.msk.f32.mxu0 %vm186_vm0, %v10954_v61 }
  0xfc   :  { %v7659_v31 = vpop.f32.mrb[6].mxu1  ;;  %v445_v50 = vpop.f32.mrb[7].mxu0  ;;  %8270 = vmatprep.mubr.msk.f32.mxu1 %vm186_vm0, %v10954_v61  ;;  %v5659_v53 = vsel %vm5639_vm1, %v7637_v57, -inf  ;;  %v116_v57 = vld [vmem:[%s12233_s0 + $0x300] sm:$0xff] }
  0xfd   :  { %v5657_v63 = vsel %vm5639_vm1, %v445_v50, -inf  ;;  %v530_v0 = vpop.f32.mrb[7].mxu1  ;;  %9471 = vmatpush3.bf16.msra.mxu0 %v10887_v22  ;;  %v5666_v2 = vsel %vm5639_vm1, %v7659_v31, -inf  ;;  %v117_v31 = vld [vmem:[%s12233_s0 + $0x308] sm:$0xff] }
  0xfe   :  { %v5658_v3 = vmax.f32 %v5656_v54, %v5657_v63  ;;  %v5664_v5 = vsel %vm5639_vm1, %v530_v0, -inf  ;;  %9487 = vmatpush3.bf16.msra.mxu1 %v10926_v44  ;;  %9473 = vmatprep.subr.bf16.mxu0 %v10926_v44  ;;  %v11074_v63 = vpack.c.bf16 %v117_v31, %v116_v57 }
  0xff   :  { %v5665_v6 = vmax.f32 %v5663_v56, %v5664_v5  ;;  %9489 = vmatprep.subr.bf16.mxu1 %v10949_v60 }
 0x100   :  { %v5660_v7 = vmax.f32 %v5658_v3, %v5659_v53 }
 0x101   :  { %v5667_v9 = vmax.f32 %v5665_v6, %v5666_v2  ;;  %9475 = vmatpush3.bf16.msra.mxu0 %v10926_v44  ;;  %v119_v6 = vld [vmem:[%s12233_s0 + $0x318] sm:$0xff] }
 0x102   :  { %v6096_v10 = vadd.f32 %v10901_v14, %v5660_v7  ;;  %9491 = vmatpush3.bf16.msra.mxu1 %v10949_v60  ;;  %9493 = vmatprep.subr.bf16.mxu0 %v10765_v58 }
 0x103   :  { %v6097_v11 = vadd.f32 %v10901_v14, %v5667_v9  ;;  %9509 = vmatprep.subr.bf16.mxu1 %v10770_v59 }
 0x104   :  { %v6160_v15 = vmax.f32 %v6096_v10, 0.0  ;;  %8249 = vmatmul.mubr.msk.f32.vlgmr.msra.gmra.mrb[60].mxu0 %vm186_vm0, %v10983_v16 }
 0x105   :  { %v6161_v19 = vmax.f32 %v6097_v11, 0.0  ;;  %8271 = vmatmul.mubr.msk.f32.vlgmr.msra.gmra.mrb[60].mxu1 %vm186_vm0, %v10983_v16  ;;  %9495 = vmatpush3.bf16.msra.mxu0 %v10765_v58 }
 0x106   :  { %9511 = vmatpush3.bf16.msra.mxu1 %v10770_v59  ;;  %8251 = vmatprep.mubr.msk.f32.mxu0 %vm186_vm0, %v11000_v20 }
 0x107   :  { %v7678_v24 = vpop.f32.mrb[8].mxu0  ;;  %8273 = vmatprep.mubr.msk.f32.mxu1 %vm186_vm0, %v11000_v20  ;;  %9497 = vmatprep.subr.bf16.mxu0 %v10770_v59  ;;  %v11011_v58 = vpack.c.bf16 %v6161_v19, %v6160_v15 }
 0x108   :  { %v5669_v27 = vsel %vm5639_vm1, %v7678_v24, -inf  ;;  %v7700_v28 = vpop.f32.mrb[8].mxu1  ;;  %v605_v29 = vpop.f32.mrb[9].mxu0  ;;  %8252 = vmatmul.mubr.msk.f32.gmra.mrb[62].mxu0 %vm186_vm0, %v11017_v30  ;;  %9513 = vmatprep.subr.bf16.mxu1 %v10787_v62 }
 0x109   :  { %v5676_v34 = vsel %vm5639_vm1, %v7700_v28, -inf  ;;  %v5668_v35 = vsel %vm5639_vm1, %v605_v29, -inf  ;;  %v690_v36 = vpop.f32.mrb[9].mxu1  ;;  %8274 = vmatmul.mubr.msk.f32.gmra.mrb[62].mxu1 %vm186_vm0, %v11017_v30  ;;  %9499 = vmatpush3.bf16.msra.mxu0 %v10770_v59 }
 0x10a   :  { %v5670_v37 = vmax.f32 %v5668_v35, %v5669_v27  ;;  %v5675_v38 = vsel %vm5639_vm1, %v690_v36, -inf  ;;  %9515 = vmatpush3.bf16.msra.mxu1 %v10787_v62  ;;  %9501 = vmatprep.subr.bf16.mxu0 %v11004_v21 }
 0x10b   :  { %v5677_v39 = vmax.f32 %v5675_v38, %v5676_v34  ;;  %v7681_v40 = vpop.f32.mrb[10].mxu0  ;;  %9517 = vmatprep.subr.bf16.mxu1 %v11009_v25  ;;  %8292 = vmatprep.mubr.msk.f32.mxu0 %vm186_vm0, %v10954_v61 }
 0x10c   :  { %v7703_v42 = vpop.f32.mrb[10].mxu1  ;;  %v615_v43 = vpop.f32.mrb[11].mxu0  ;;  %8314 = vmatprep.mubr.msk.f32.mxu1 %vm186_vm0, %v10954_v61  ;;  %v5673_v59 = vsel %vm5639_vm1, %v7681_v40, -inf  ;;  %v121_v40 = vld [vmem:[%s12233_s0 + $0x328] sm:$0xff] }
 0x10d   :  { %v5671_v23 = vsel %vm5639_vm1, %v615_v43, -inf  ;;  %v700_v46 = vpop.f32.mrb[11].mxu1  ;;  %9503 = vmatpush3.bf16.msra.mxu0 %v11004_v21  ;;  %v5680_v47 = vsel %vm5639_vm1, %v7703_v42, -inf }
 0x10e   :  { %v5672_v48 = vmax.f32 %v5670_v37, %v5671_v23  ;;  %v5678_v26 = vsel %vm5639_vm1, %v700_v46, -inf  ;;  %9519 = vmatpush3.bf16.msra.mxu1 %v11009_v25  ;;  %9505 = vmatprep.subr.bf16.mxu0 %v11009_v25 }
 0x10f   :  { %v5679_v49 = vmax.f32 %v5677_v39, %v5678_v26  ;;  %9521 = vmatprep.subr.bf16.mxu1 %v11037_v41  ;;  %v120_v39 = vld [vmem:[%s12233_s0 + $0x320] sm:$0xff]  ;;  %v123_v26 = vld [vmem:[%s12233_s0 + $0x338] sm:$0xff] }
 0x110   :  { %v5674_v51 = vmax.f32 %v5672_v48, %v5673_v59  ;;  %v11134_v59 = vpack.c.bf16 %v121_v40, %v120_v39 }
 0x111   :  { %v5681_v52 = vmax.f32 %v5679_v49, %v5680_v47  ;;  %9507 = vmatpush3.bf16.msra.mxu0 %v11009_v25 }
 0x112   :  { %v6098_v54 = vadd.f32 %v10901_v14, %v5674_v51  ;;  %9523 = vmatpush3.bf16.msra.mxu1 %v11037_v41  ;;  %9525 = vmatprep.subr.bf16.mxu0 %v10787_v62 }
 0x113   :  { %v6099_v55 = vadd.f32 %v10901_v14, %v5681_v52  ;;  %9541 = vmatprep.subr.bf16.mxu1 %v10818_v1 }
 0x114   :  { %v6162_v56 = vmax.f32 %v6098_v54, 0.0  ;;  %8293 = vmatmul.mubr.msk.f32.vlgmr.msra.gmra.mrb[64].mxu0 %vm186_vm0, %v10983_v16 }
 0x115   :  { %v6163_v50 = vmax.f32 %v6099_v55, 0.0  ;;  %8315 = vmatmul.mubr.msk.f32.vlgmr.msra.gmra.mrb[64].mxu1 %vm186_vm0, %v10983_v16  ;;  %9527 = vmatpush3.bf16.msra.mxu0 %v10787_v62  ;;  %v118_v62 = vld [vmem:[%s12233_s0 + $0x310] sm:$0xff] }
 0x116   :  { %9543 = vmatpush3.bf16.msra.mxu1 %v10818_v1  ;;  %8295 = vmatprep.mubr.msk.f32.mxu0 %vm186_vm0, %v11000_v20  ;;  %v11097_v17 = vpack.c.bf16 %v119_v6, %v118_v62 }
 0x117   :  { %v7722_v53 = vpop.f32.mrb[12].mxu0  ;;  %8317 = vmatprep.mubr.msk.f32.mxu1 %vm186_vm0, %v11000_v20  ;;  %9529 = vmatprep.subr.bf16.mxu0 %v10818_v1  ;;  %v11076_v0 = vpack.c.bf16 %v6163_v50, %v6162_v56 }
 0x118   :  { %v5683_v2 = vsel %vm5639_vm1, %v7722_v53, -inf  ;;  %v7744_v3 = vpop.f32.mrb[12].mxu1  ;;  %v775_v5 = vpop.f32.mrb[13].mxu0  ;;  %8296 = vmatmul.mubr.msk.f32.gmra.mrb[66].mxu0 %vm186_vm0, %v11017_v30  ;;  %9545 = vmatprep.subr.bf16.mxu1 %v10835_v4 }
 0x119   :  { %v5690_v7 = vsel %vm5639_vm1, %v7744_v3, -inf  ;;  %v5682_v9 = vsel %vm5639_vm1, %v775_v5, -inf  ;;  %v860_v10 = vpop.f32.mrb[13].mxu1  ;;  %8318 = vmatmul.mubr.msk.f32.gmra.mrb[66].mxu1 %vm186_vm0, %v11017_v30  ;;  %9531 = vmatpush3.bf16.msra.mxu0 %v10818_v1 }
 0x11a   :  { %v5684_v11 = vmax.f32 %v5682_v9, %v5683_v2  ;;  %v5689_v12 = vsel %vm5639_vm1, %v860_v10, -inf  ;;  %9547 = vmatpush3.bf16.msra.mxu1 %v10835_v4  ;;  %9533 = vmatprep.subr.bf16.mxu0 %v11037_v41 }
 0x11b   :  { %v5691_v13 = vmax.f32 %v5689_v12, %v5690_v7  ;;  %v7725_v15 = vpop.f32.mrb[14].mxu0  ;;  %9549 = vmatprep.subr.bf16.mxu1 %v11074_v63  ;;  %8336 = vmatprep.mubr.msk.f32.mxu0 %vm186_vm0, %v10954_v61 }
 0x11c   :  { %v7747_v18 = vpop.f32.mrb[14].mxu1  ;;  %v785_v19 = vpop.f32.mrb[15].mxu0  ;;  %8358 = vmatprep.mubr.msk.f32.mxu1 %vm186_vm0, %v10954_v61  ;;  %v5687_v1 = vsel %vm5639_vm1, %v7725_v15, -inf  ;;  %v124_v15 = vld [vmem:[%s12233_s0 + $0x340] sm:$0xff] }
 0x11d   :  { %v5685_v24 = vsel %vm5639_vm1, %v785_v19, -inf  ;;  %v870_v27 = vpop.f32.mrb[15].mxu1  ;;  %9535 = vmatpush3.bf16.msra.mxu0 %v11037_v41  ;;  %v5694_v28 = vsel %vm5639_vm1, %v7747_v18, -inf  ;;  %v125_v18 = vld [vmem:[%s12233_s0 + $0x348] sm:$0xff] }
 0x11e   :  { %v5686_v29 = vmax.f32 %v5684_v11, %v5685_v24  ;;  %v5692_v32 = vsel %vm5639_vm1, %v870_v27, -inf  ;;  %9551 = vmatpush3.bf16.msra.mxu1 %v11074_v63  ;;  %9537 = vmatprep.subr.bf16.mxu0 %v11074_v63  ;;  %v11194_v24 = vpack.c.bf16 %v125_v18, %v124_v15 }
 0x11f   :  { %v5693_v33 = vmax.f32 %v5691_v13, %v5692_v32  ;;  %9553 = vmatprep.subr.bf16.mxu1 %v11097_v17 }
 0x120   :  { %v5688_v34 = vmax.f32 %v5686_v29, %v5687_v1 }
 0x121   :  { %v5695_v35 = vmax.f32 %v5693_v33, %v5694_v28  ;;  %9539 = vmatpush3.bf16.msra.mxu0 %v11074_v63  ;;  %v127_v33 = vld [vmem:[%s12233_s0 + $0x358] sm:$0xff] }
 0x122   :  { %v6100_v36 = vadd.f32 %v10901_v14, %v5688_v34  ;;  %9555 = vmatpush3.bf16.msra.mxu1 %v11097_v17  ;;  %9557 = vmatprep.subr.bf16.mxu0 %v10835_v4 }
 0x123   :  { %v6101_v37 = vadd.f32 %v10901_v14, %v5695_v35  ;;  %9573 = vmatprep.subr.bf16.mxu1 %v10866_v8 }
 0x124   :  { %v6164_v38 = vmax.f32 %v6100_v36, 0.0  ;;  %8337 = vmatmul.mubr.msk.f32.vlgmr.msra.gmra.mrb[68].mxu0 %vm186_vm0, %v10983_v16 }
 0x125   :  { %v6165_v42 = vmax.f32 %v6101_v37, 0.0  ;;  %8359 = vmatmul.mubr.msk.f32.vlgmr.msra.gmra.mrb[68].mxu1 %vm186_vm0, %v10983_v16  ;;  %9559 = vmatpush3.bf16.msra.mxu0 %v10835_v4  ;;  %v122_v4 = vld [vmem:[%s12233_s0 + $0x330] sm:$0xff] }
 0x126   :  { %9575 = vmatpush3.bf16.msra.mxu1 %v10866_v8  ;;  %8339 = vmatprep.mubr.msk.f32.mxu0 %vm186_vm0, %v11000_v20  ;;  %v11157_v31 = vpack.c.bf16 %v123_v26, %v122_v4 }
 0x127   :  { %v7766_v43 = vpop.f32.mrb[16].mxu0  ;;  %8361 = vmatprep.mubr.msk.f32.mxu1 %vm186_vm0, %v11000_v20  ;;  %9561 = vmatprep.subr.bf16.mxu0 %v10866_v8  ;;  %v11136_v23 = vpack.c.bf16 %v6165_v42, %v6164_v38 }
 0x128   :  { %v5697_v46 = vsel %vm5639_vm1, %v7766_v43, -inf  ;;  %v7788_v47 = vpop.f32.mrb[16].mxu1  ;;  %v945_v48 = vpop.f32.mrb[17].mxu0  ;;  %8340 = vmatmul.mubr.msk.f32.gmra.mrb[70].mxu0 %vm186_vm0, %v11017_v30  ;;  %9577 = vmatprep.subr.bf16.mxu1 %v10887_v22 }
 0x129   :  { %v5704_v49 = vsel %vm5639_vm1, %v7788_v47, -inf  ;;  %v5696_v51 = vsel %vm5639_vm1, %v945_v48, -inf  ;;  %v1030_v52 = vpop.f32.mrb[17].mxu1  ;;  %8362 = vmatmul.mubr.msk.f32.gmra.mrb[70].mxu1 %vm186_vm0, %v11017_v30  ;;  %9563 = vmatpush3.bf16.msra.mxu0 %v10866_v8 }
 0x12a   :  { %v5698_v54 = vmax.f32 %v5696_v51, %v5697_v46  ;;  %v5703_v55 = vsel %vm5639_vm1, %v1030_v52, -inf  ;;  %9579 = vmatpush3.bf16.msra.mxu1 %v10887_v22  ;;  %9565 = vmatprep.subr.bf16.mxu0 %v11097_v17 }
 0x12b   :  { %v5705_v56 = vmax.f32 %v5703_v55, %v5704_v49  ;;  %v7769_v57 = vpop.f32.mrb[18].mxu0  ;;  %9581 = vmatprep.subr.bf16.mxu1 %v11134_v59  ;;  %8380 = vmatprep.mubr.msk.f32.mxu0 %vm186_vm0, %v10954_v61 }
 0x12c   :  { %v7791_v50 = vpop.f32.mrb[18].mxu1  ;;  %v955_v53 = vpop.f32.mrb[19].mxu0  ;;  %8402 = vmatprep.mubr.msk.f32.mxu1 %vm186_vm0, %v10954_v61  ;;  %v5701_v8 = vsel %vm5639_vm1, %v7769_v57, -inf  ;;  %v129_v57 = vld [vmem:[%s12233_s0 + $0x368] sm:$0xff] }
 0x12d   :  { %v5699_v2 = vsel %vm5639_vm1, %v955_v53, -inf  ;;  %v1040_v3 = vpop.f32.mrb[19].mxu1  ;;  %9567 = vmatpush3.bf16.msra.mxu0 %v11097_v17  ;;  %v5708_v5 = vsel %vm5639_vm1, %v7791_v50, -inf  ;;  %v130_v53 = vld [vmem:[%s12233_s0 + $0x370] sm:$0xff] }
 0x12e   :  { %v5700_v62 = vmax.f32 %v5698_v54, %v5699_v2  ;;  %v5706_v6 = vsel %vm5639_vm1, %v1040_v3, -inf  ;;  %9583 = vmatpush3.bf16.msra.mxu1 %v11134_v59  ;;  %9569 = vmatprep.subr.bf16.mxu0 %v11134_v59 }
 0x12f   :  { %v5707_v7 = vmax.f32 %v5705_v56, %v5706_v6  ;;  %9585 = vmatprep.subr.bf16.mxu1 %v11157_v31  ;;  %v128_v56 = vld [vmem:[%s12233_s0 + $0x360] sm:$0xff] }
 0x130   :  { %v5702_v9 = vmax.f32 %v5700_v62, %v5701_v8  ;;  %v131_v8 = vld [vmem:[%s12233_s0 + $0x378] sm:$0xff]  ;;  %v11257_v3 = vpack.c.bf16 %v129_v57, %v128_v56 }
 0x131   :  { %v5709_v10 = vmax.f32 %v5707_v7, %v5708_v5  ;;  %9571 = vmatpush3.bf16.msra.mxu0 %v11134_v59  ;;  %v11262_v62 = vpack.c.bf16 %v131_v8, %v130_v53 }
 0x132   :  { %v6102_v11 = vadd.f32 %v10901_v14, %v5702_v9  ;;  %9587 = vmatpush3.bf16.msra.mxu1 %v11157_v31  ;;  %9589 = vmatprep.subr.bf16.mxu0 %v10887_v22 }
 0x133   :  { %v6103_v12 = vadd.f32 %v10901_v14, %v5709_v10  ;;  %9605 = vmatprep.subr.bf16.mxu1 %v10926_v44  ;;  %v132_v10 = vld [vmem:[%s12233_s0 + $0x380] sm:$0xff] }
 0x134   :  { %v6166_v13 = vmax.f32 %v6102_v11, 0.0  ;;  %8381 = vmatmul.mubr.msk.f32.vlgmr.msra.gmra.mrb[72].mxu0 %vm186_vm0, %v10983_v16  ;;  %v133_v11 = vld [vmem:[%s12233_s0 + $0x388] sm:$0xff] }
 0x135   :  { %v6167_v19 = vmax.f32 %v6103_v12, 0.0  ;;  %8403 = vmatmul.mubr.msk.f32.vlgmr.msra.gmra.mrb[72].mxu1 %vm186_vm0, %v10983_v16  ;;  %9591 = vmatpush3.bf16.msra.mxu0 %v10887_v22  ;;  %v126_v22 = vld [vmem:[%s12233_s0 + $0x350] sm:$0xff] }
 0x136   :  { %9607 = vmatpush3.bf16.msra.mxu1 %v10926_v44  ;;  %8383 = vmatprep.mubr.msk.f32.mxu0 %vm186_vm0, %v11000_v20  ;;  %v11217_v42 = vpack.c.bf16 %v127_v33, %v126_v22 }
 0x137   :  { %v7810_v1 = vpop.f32.mrb[20].mxu0  ;;  %8405 = vmatprep.mubr.msk.f32.mxu1 %vm186_vm0, %v11000_v20  ;;  %9593 = vmatprep.subr.bf16.mxu0 %v10926_v44  ;;  %v11196_v27 = vpack.c.bf16 %v6167_v19, %v6166_v13 }
 0x138   :  { %v5711_v28 = vsel %vm5639_vm1, %v7810_v1, -inf  ;;  %v7832_v29 = vpop.f32.mrb[20].mxu1  ;;  %v1115_v32 = vpop.f32.mrb[21].mxu0  ;;  %8384 = vmatmul.mubr.msk.f32.gmra.mrb[74].mxu0 %vm186_vm0, %v11017_v30  ;;  %9609 = vmatprep.subr.bf16.mxu1 %v10949_v60 }
 0x139   :  { %v5718_v34 = vsel %vm5639_vm1, %v7832_v29, -inf  ;;  %v5710_v35 = vsel %vm5639_vm1, %v1115_v32, -inf  ;;  %v1200_v36 = vpop.f32.mrb[21].mxu1  ;;  %8406 = vmatmul.mubr.msk.f32.gmra.mrb[74].mxu1 %vm186_vm0, %v11017_v30  ;;  %9595 = vmatpush3.bf16.msra.mxu0 %v10926_v44  ;;  %v11285_v29 = vpack.c.bf16 %v133_v11, %v132_v10 }
 0x13a   :  { %v5712_v37 = vmax.f32 %v5710_v35, %v5711_v28  ;;  %v5717_v38 = vsel %vm5639_vm1, %v1200_v36, -inf  ;;  %9611 = vmatpush3.bf16.msra.mxu1 %v10949_v60  ;;  %9597 = vmatprep.subr.bf16.mxu0 %v11157_v31 }
 0x13b   :  { %v5719_v39 = vmax.f32 %v5717_v38, %v5718_v34  ;;  %v7813_v40 = vpop.f32.mrb[22].mxu0  ;;  %9613 = vmatprep.subr.bf16.mxu1 %v11194_v24  ;;  %8424 = vmatprep.mubr.msk.f32.mxu0 %vm186_vm0, %v10954_v61 }
 0x13c   :  { %v7835_v43 = vpop.f32.mrb[22].mxu1  ;;  %v1125_v46 = vpop.f32.mrb[23].mxu0  ;;  %8446 = vmatprep.mubr.msk.f32.mxu1 %vm186_vm0, %v10954_v61  ;;  %v5715_v44 = vsel %vm5639_vm1, %v7813_v40, -inf }
 0x13d   :  { %v5713_v60 = vsel %vm5639_vm1, %v1125_v46, -inf  ;;  %v1210_v47 = vpop.f32.mrb[23].mxu1  ;;  %9599 = vmatpush3.bf16.msra.mxu0 %v11157_v31  ;;  %v5722_v48 = vsel %vm5639_vm1, %v7835_v43, -inf }
 0x13e   :  { %v5714_v4 = vmax.f32 %v5712_v37, %v5713_v60  ;;  %v5720_v26 = vsel %vm5639_vm1, %v1210_v47, -inf  ;;  %9615 = vmatpush3.bf16.msra.mxu1 %v11194_v24  ;;  %9601 = vmatprep.subr.bf16.mxu0 %v11194_v24  ;;  %v134_v60 = vld [vmem:[%s12233_s0 + $0x390] sm:$0xff]  ;;  %v135_v47 = vld [vmem:[%s12233_s0 + $0x398] sm:$0xff] }
 0x13f   :  { %v5721_v49 = vmax.f32 %v5719_v39, %v5720_v26  ;;  %9617 = vmatprep.subr.bf16.mxu1 %v11217_v42  ;;  %v11322_v26 = vpack.c.bf16 %v135_v47, %v134_v60 }
 0x140   :  { %v5716_v51 = vmax.f32 %v5714_v4, %v5715_v44 }
 0x141   :  { %v5723_v52 = vmax.f32 %v5721_v49, %v5722_v48  ;;  %9603 = vmatpush3.bf16.msra.mxu0 %v11194_v24 }
 0x142   :  { %v6104_v54 = vadd.f32 %v10901_v14, %v5716_v51  ;;  %9619 = vmatpush3.bf16.msra.mxu1 %v11217_v42  ;;  %9621 = vmatprep.subr.bf16.mxu0 %v11004_v21 }
 0x143   :  { %v6105_v55 = vadd.f32 %v10901_v14, %v5723_v52  ;;  %9637 = vmatprep.subr.bf16.mxu1 %v11009_v25 }
 0x144   :  { %v6168_v50 = vmax.f32 %v6104_v54, 0.0  ;;  %8425 = vmatmul.mubr.msk.f32.vlgmr.msra.gmra.mrb[76].mxu0 %vm186_vm0, %v10983_v16 }
 0x145   :  { %v6169_v2 = vmax.f32 %v6105_v55, 0.0  ;;  %8447 = vmatmul.mubr.msk.f32.vlgmr.msra.gmra.mrb[76].mxu1 %vm186_vm0, %v10983_v16  ;;  %9623 = vmatpush3.bf16.msra.mxu0 %v11004_v21  ;;  %v137_v55 = vld [vmem:[%s12233_s0 + $0x3a8] sm:$0xff] }
 0x146   :  { %9639 = vmatpush3.bf16.msra.mxu1 %v11009_v25  ;;  %8427 = vmatprep.mubr.msk.f32.mxu0 %vm186_vm0, %v11000_v20 }
 0x147   :  { %v7854_v5 = vpop.f32.mrb[24].mxu0  ;;  %8449 = vmatprep.mubr.msk.f32.mxu1 %vm186_vm0, %v11000_v20  ;;  %9625 = vmatprep.subr.bf16.mxu0 %v11009_v25  ;;  %v11264_v6 = vpack.c.bf16 %v6169_v2, %v6168_v50 }
 0x148   :  { %v5725_v7 = vsel %vm5639_vm1, %v7854_v5, -inf  ;;  %v7876_v21 = vpop.f32.mrb[24].mxu1  ;;  %v1285_v9 = vpop.f32.mrb[25].mxu0  ;;  %8428 = vmatmul.mubr.msk.f32.gmra.mrb[78].mxu0 %vm186_vm0, %v11017_v30  ;;  %9641 = vmatprep.subr.bf16.mxu1 %v11037_v41 }
 0x149   :  { %v5732_v12 = vsel %vm5639_vm1, %v7876_v21, -inf  ;;  %v5724_v13 = vsel %vm5639_vm1, %v1285_v9, -inf  ;;  %v1370_v15 = vpop.f32.mrb[25].mxu1  ;;  %8450 = vmatmul.mubr.msk.f32.gmra.mrb[78].mxu1 %vm186_vm0, %v11017_v30  ;;  %9627 = vmatpush3.bf16.msra.mxu0 %v11009_v25 }
 0x14a   :  { %v5726_v18 = vmax.f32 %v5724_v13, %v5725_v7  ;;  %v5731_v19 = vsel %vm5639_vm1, %v1370_v15, -inf  ;;  %9643 = vmatpush3.bf16.msra.mxu1 %v11037_v41  ;;  %9629 = vmatprep.subr.bf16.mxu0 %v11257_v3 }
 0x14b   :  { %v5733_v1 = vmax.f32 %v5731_v19, %v5732_v12  ;;  %v7857_v28 = vpop.f32.mrb[26].mxu0  ;;  %9645 = vmatprep.subr.bf16.mxu1 %v11262_v62  ;;  %8468 = vmatprep.mubr.msk.f32.mxu0 %vm186_vm0, %v10954_v61 }
 0x14c   :  { %v7879_v32 = vpop.f32.mrb[26].mxu1  ;;  %v1295_v22 = vpop.f32.mrb[27].mxu0  ;;  %8490 = vmatprep.mubr.msk.f32.mxu1 %vm186_vm0, %v10954_v61  ;;  %v5729_v25 = vsel %vm5639_vm1, %v7857_v28, -inf }
 0x14d   :  { %v5727_v33 = vsel %vm5639_vm1, %v1295_v22, -inf  ;;  %v1380_v34 = vpop.f32.mrb[27].mxu1  ;;  %9631 = vmatpush3.bf16.msra.mxu0 %v11257_v3  ;;  %v5736_v35 = vsel %vm5639_vm1, %v7879_v32, -inf }
 0x14e   :  { %v5728_v36 = vmax.f32 %v5726_v18, %v5727_v33  ;;  %v5734_v37 = vsel %vm5639_vm1, %v1380_v34, -inf  ;;  %9647 = vmatpush3.bf16.msra.mxu1 %v11262_v62  ;;  %9633 = vmatprep.subr.bf16.mxu0 %v11262_v62  ;;  %v139_v33 = vld [vmem:[%s12233_s0 + $0x3b8] sm:$0xff] }
 0x14f   :  { %v5735_v38 = vmax.f32 %v5733_v1, %v5734_v37  ;;  %9649 = vmatprep.subr.bf16.mxu1 %v11285_v29 }
 0x150   :  { %v5730_v39 = vmax.f32 %v5728_v36, %v5729_v25  ;;  %v138_v25 = vld [vmem:[%s12233_s0 + $0x3b0] sm:$0xff] }
 0x151   :  { %v5737_v40 = vmax.f32 %v5735_v38, %v5736_v35  ;;  %9635 = vmatpush3.bf16.msra.mxu0 %v11262_v62  ;;  %v11382_v36 = vpack.c.bf16 %v139_v33, %v138_v25 }
 0x152   :  { %v6106_v43 = vadd.f32 %v10901_v14, %v5730_v39  ;;  %9651 = vmatpush3.bf16.msra.mxu1 %v11285_v29  ;;  %9653 = vmatprep.subr.bf16.mxu0 %v11037_v41 }
 0x153   :  { %v6107_v46 = vadd.f32 %v10901_v14, %v5737_v40  ;;  %9669 = vmatprep.subr.bf16.mxu1 %v11074_v63 }
 0x154   :  { %v6170_v44 = vmax.f32 %v6106_v43, 0.0  ;;  %8469 = vmatmul.mubr.msk.f32.vlgmr.msra.gmra.mrb[80].mxu0 %vm186_vm0, %v10983_v16  ;;  %v141_v43 = vld [vmem:[%s12233_s0 + $0x3c8] sm:$0xff] }
 0x155   :  { %v6171_v48 = vmax.f32 %v6107_v46, 0.0  ;;  %8491 = vmatmul.mubr.msk.f32.vlgmr.msra.gmra.mrb[80].mxu1 %vm186_vm0, %v10983_v16  ;;  %9655 = vmatpush3.bf16.msra.mxu0 %v11037_v41  ;;  %v136_v41 = vld [vmem:[%s12233_s0 + $0x3a0] sm:$0xff] }
 0x156   :  { %9671 = vmatpush3.bf16.msra.mxu1 %v11074_v63  ;;  %8471 = vmatprep.mubr.msk.f32.mxu0 %vm186_vm0, %v11000_v20  ;;  %v11345_v7 = vpack.c.bf16 %v137_v55, %v136_v41 }
 0x157   :  { %v7898_v4 = vpop.f32.mrb[28].mxu0  ;;  %8493 = vmatprep.mubr.msk.f32.mxu1 %vm186_vm0, %v11000_v20  ;;  %9657 = vmatprep.subr.bf16.mxu0 %v11074_v63  ;;  %v11324_v49 = vpack.c.bf16 %v6171_v48, %v6170_v44 }
 0x158   :  { %v5739_v51 = vsel %vm5639_vm1, %v7898_v4, -inf  ;;  %v7920_v52 = vpop.f32.mrb[28].mxu1  ;;  %v1455_v54 = vpop.f32.mrb[29].mxu0  ;;  %8472 = vmatmul.mubr.msk.f32.gmra.mrb[82].mxu0 %vm186_vm0, %v11017_v30  ;;  %9673 = vmatprep.subr.bf16.mxu1 %v11097_v17 }
 0x159   :  { %v5746_v56 = vsel %vm5639_vm1, %v7920_v52, -inf  ;;  %v5738_v57 = vsel %vm5639_vm1, %v1455_v54, -inf  ;;  %v1540_v50 = vpop.f32.mrb[29].mxu1  ;;  %8494 = vmatmul.mubr.msk.f32.gmra.mrb[82].mxu1 %vm186_vm0, %v11017_v30  ;;  %9659 = vmatpush3.bf16.msra.mxu0 %v11074_v63 }
 0x15a   :  { %v5740_v53 = vmax.f32 %v5738_v57, %v5739_v51  ;;  %v5745_v8 = vsel %vm5639_vm1, %v1540_v50, -inf  ;;  %9675 = vmatpush3.bf16.msra.mxu1 %v11097_v17  ;;  %9661 = vmatprep.subr.bf16.mxu0 %v11285_v29 }
 0x15b   :  { %v5747_v2 = vmax.f32 %v5745_v8, %v5746_v56  ;;  %v7901_v5 = vpop.f32.mrb[30].mxu0  ;;  %9677 = vmatprep.subr.bf16.mxu1 %v11322_v26  ;;  %8512 = vmatprep.mubr.msk.f32.mxu0 %vm186_vm0, %v10954_v61 }
 0x15c   :  { %v7923_v21 = vpop.f32.mrb[30].mxu1  ;;  %v1465_v9 = vpop.f32.mrb[31].mxu0  ;;  %8534 = vmatprep.mubr.msk.f32.mxu1 %vm186_vm0, %v10954_v61  ;;  %v5743_v63 = vsel %vm5639_vm1, %v7901_v5, -inf }
 0x15d   :  { %v5741_v10 = vsel %vm5639_vm1, %v1465_v9, -inf  ;;  %v1550_v11 = vpop.f32.mrb[31].mxu1  ;;  %9663 = vmatpush3.bf16.msra.mxu0 %v11285_v29  ;;  %v5750_v12 = vsel %vm5639_vm1, %v7923_v21, -inf }
 0x15e   :  { %v5742_v13 = vmax.f32 %v5740_v53, %v5741_v10  ;;  %v5748_v15 = vsel %vm5639_vm1, %v1550_v11, -inf  ;;  %9679 = vmatpush3.bf16.msra.mxu1 %v11322_v26  ;;  %9665 = vmatprep.subr.bf16.mxu0 %v11322_v26  ;;  %v143_v10 = vld [vmem:[%s12233_s0 + $0x3d8] sm:$0xff] }
 0x15f   :  { %v5749_v18 = vmax.f32 %v5747_v2, %v5748_v15  ;;  %9681 = vmatprep.subr.bf16.mxu1 %v11345_v7 }
 0x160   :  { %v5744_v19 = vmax.f32 %v5742_v13, %v5743_v63  ;;  %v142_v63 = vld [vmem:[%s12233_s0 + $0x3d0] sm:$0xff] }
 0x161   :  { %v5751_v1 = vmax.f32 %v5749_v18, %v5750_v12  ;;  %9667 = vmatpush3.bf16.msra.mxu0 %v11322_v26  ;;  %v11442_v15 = vpack.c.bf16 %v143_v10, %v142_v63 }
 0x162   :  { %v6108_v28 = vadd.f32 %v10901_v14, %v5744_v19  ;;  %9683 = vmatpush3.bf16.msra.mxu1 %v11345_v7  ;;  %9685 = vmatprep.subr.bf16.mxu0 %v11097_v17 }
 0x163   :  { %v6109_v32 = vadd.f32 %v10901_v14, %v5751_v1  ;;  %9701 = vmatprep.subr.bf16.mxu1 %v11134_v59 }
 0x164   :  { %v6172_v22 = vmax.f32 %v6108_v28, 0.0  ;;  %8513 = vmatmul.mubr.msk.f32.vlgmr.msra.gmra.mrb[84].mxu0 %vm186_vm0, %v10983_v16  ;;  %v144_v28 = vld [vmem:[%s12233_s0 + $0x3e0] sm:$0xff] }
 0x165   :  { %v6173_v34 = vmax.f32 %v6109_v32, 0.0  ;;  %8535 = vmatmul.mubr.msk.f32.vlgmr.msra.gmra.mrb[84].mxu1 %vm186_vm0, %v10983_v16  ;;  %9687 = vmatpush3.bf16.msra.mxu0 %v11097_v17  ;;  %v140_v17 = vld [vmem:[%s12233_s0 + $0x3c0] sm:$0xff]  ;;  %v145_v32 = vld [vmem:[%s12233_s0 + $0x3e8] sm:$0xff] }
 0x166   :  { %9703 = vmatpush3.bf16.msra.mxu1 %v11134_v59  ;;  %8515 = vmatprep.mubr.msk.f32.mxu0 %vm186_vm0, %v11000_v20  ;;  %v11405_v52 = vpack.c.bf16 %v141_v43, %v140_v17 }
 0x167   :  { %v7942_v35 = vpop.f32.mrb[32].mxu0  ;;  %8537 = vmatprep.mubr.msk.f32.mxu1 %vm186_vm0, %v11000_v20  ;;  %9689 = vmatprep.subr.bf16.mxu0 %v11134_v59  ;;  %v11384_v37 = vpack.c.bf16 %v6173_v34, %v6172_v22 }
 0x168   :  { %v5753_v38 = vsel %vm5639_vm1, %v7942_v35, -inf  ;;  %v7964_v39 = vpop.f32.mrb[32].mxu1  ;;  %v1625_v40 = vpop.f32.mrb[33].mxu0  ;;  %8516 = vmatmul.mubr.msk.f32.gmra.mrb[86].mxu0 %vm186_vm0, %v11017_v30  ;;  %9705 = vmatprep.subr.bf16.mxu1 %v11157_v31 }
 0x169   :  { %v5760_v46 = vsel %vm5639_vm1, %v7964_v39, -inf  ;;  %v5752_v44 = vsel %vm5639_vm1, %v1625_v40, -inf  ;;  %v1710_v60 = vpop.f32.mrb[33].mxu1  ;;  %8538 = vmatmul.mubr.msk.f32.gmra.mrb[86].mxu1 %vm186_vm0, %v11017_v30  ;;  %9691 = vmatpush3.bf16.msra.mxu0 %v11134_v59  ;;  %v11465_v40 = vpack.c.bf16 %v145_v32, %v144_v28  ;;  %v11538_v28 = vld [vmem:[%s12234_s1] sm:$0xff] }
 0x16a   :  { %v5754_v47 = vmax.f32 %v5752_v44, %v5753_v38  ;;  %v5759_v48 = vsel %vm5639_vm1, %v1710_v60, -inf  ;;  %9707 = vmatpush3.bf16.msra.mxu1 %v11157_v31  ;;  %9693 = vmatprep.subr.bf16.mxu0 %v11345_v7 }
 0x16b   :  { %v5761_v4 = vmax.f32 %v5759_v48, %v5760_v46  ;;  %v7945_v51 = vpop.f32.mrb[34].mxu0  ;;  %9709 = vmatprep.subr.bf16.mxu1 %v11382_v36  ;;  %8556 = vmatprep.mubr.msk.f32.mxu0 %vm186_vm0, %v10954_v61 }
 0x16c   :  { %v7967_v54 = vpop.f32.mrb[34].mxu1  ;;  %v1635_v41 = vpop.f32.mrb[35].mxu0  ;;  %8578 = vmatprep.mubr.msk.f32.mxu1 %vm186_vm0, %v10954_v61  ;;  %v5757_v59 = vsel %vm5639_vm1, %v7945_v51, -inf }
 0x16d   :  { %v5755_v55 = vsel %vm5639_vm1, %v1635_v41, -inf  ;;  %v1720_v56 = vpop.f32.mrb[35].mxu1  ;;  %9695 = vmatpush3.bf16.msra.mxu0 %v11345_v7  ;;  %v5764_v57 = vsel %vm5639_vm1, %v7967_v54, -inf  ;;  %v146_v41 = vld [vmem:[%s12233_s0 + $0x3f0] sm:$0xff] }
 0x16e   :  { %v5756_v50 = vmax.f32 %v5754_v47, %v5755_v55  ;;  %v5762_v53 = vsel %vm5639_vm1, %v1720_v56, -inf  ;;  %9711 = vmatpush3.bf16.msra.mxu1 %v11382_v36  ;;  %9697 = vmatprep.subr.bf16.mxu0 %v11382_v36  ;;  %v148_v55 = vld [vmem:[%s12233_s0 + $0x400] sm:$0xff]  ;;  %v149_v56 = vld [vmem:[%s12233_s0 + $0x408] sm:$0xff] }
 0x16f   :  { %v5763_v8 = vmax.f32 %v5761_v4, %v5762_v53  ;;  %9713 = vmatprep.subr.bf16.mxu1 %v11405_v52 }
 0x170   :  { %v5758_v2 = vmax.f32 %v5756_v50, %v5757_v59  ;;  %v147_v59 = vld [vmem:[%s12233_s0 + $0x3f8] sm:$0xff] }
 0x171   :  { %v5765_v5 = vmax.f32 %v5763_v8, %v5764_v57  ;;  %9699 = vmatpush3.bf16.msra.mxu0 %v11382_v36  ;;  %v11505_v53 = vpack.c.bf16 %v147_v59, %v146_v41  ;;  %v11593_v59 = vld [vmem:[%s12234_s1 + $0x18] sm:$0xff] }
 0x172   :  { %v6110_v21 = vadd.f32 %v10901_v14, %v5758_v2  ;;  %9715 = vmatpush3.bf16.msra.mxu1 %v11405_v52  ;;  %9717 = vmatprep.subr.bf16.mxu0 %v11157_v31  ;;  %v11510_v2 = vpack.c.bf16 %v149_v56, %v148_v55  ;;  %v154_v55 = vld [vmem:[%s12233_s0 + $0x430] sm:$0xff]  ;;  %v155_v56 = vld [vmem:[%s12233_s0 + $0x438] sm:$0xff] }
 0x173   :  { %v6111_v9 = vadd.f32 %v10901_v14, %v5765_v5  ;;  %9733 = vmatprep.subr.bf16.mxu1 %v11194_v24 }
 0x174   :  { %8557 = vmatmul.mubr.msk.f32.vlgmr.msra.gmra.mrb[88].mxu0 %vm186_vm0, %v10983_v16  ;;  %v6174_v11 = vmax.f32 %v6110_v21, 0.0 }
 0x175   :  { %8579 = vmatmul.mubr.msk.f32.vlgmr.msra.gmra.mrb[88].mxu1 %vm186_vm0, %v10983_v16  ;;  %9719 = vmatpush3.bf16.msra.mxu0 %v11157_v31  ;;  %v6175_v12 = vmax.f32 %v6111_v9, 0.0  ;;  %v150_v9 = vld [vmem:[%s12233_s0 + $0x410] sm:$0xff] }
 0x176   :  { %9735 = vmatpush3.bf16.msra.mxu1 %v11194_v24  ;;  %8559 = vmatprep.mubr.msk.f32.mxu0 %vm186_vm0, %v11000_v20 }
 0x177   :  { %v7986_v13 = vpop.f32.mrb[36].mxu0  ;;  %8581 = vmatprep.mubr.msk.f32.mxu1 %vm186_vm0, %v11000_v20  ;;  %9721 = vmatprep.subr.bf16.mxu0 %v11194_v24  ;;  %v11444_v18 = vpack.c.bf16 %v6175_v12, %v6174_v11 }
 0x178   :  { %v5767_v19 = vsel %vm5639_vm1, %v7986_v13, -inf  ;;  %v8008_v1 = vpop.f32.mrb[36].mxu1  ;;  %v1795_v31 = vpop.f32.mrb[37].mxu0  ;;  %8560 = vmatmul.mubr.msk.f32.gmra.mrb[90].mxu0 %vm186_vm0, %v11017_v30  ;;  %9737 = vmatprep.subr.bf16.mxu1 %v11217_v42 }
 0x179   :  { %v5774_v22 = vsel %vm5639_vm1, %v8008_v1, -inf  ;;  %v5766_v25 = vsel %vm5639_vm1, %v1795_v31, -inf  ;;  %v1880_v33 = vpop.f32.mrb[37].mxu1  ;;  %8582 = vmatmul.mubr.msk.f32.gmra.mrb[90].mxu1 %vm186_vm0, %v11017_v30  ;;  %9723 = vmatpush3.bf16.msra.mxu0 %v11194_v24 }
 0x17a   :  { %v5768_v34 = vmax.f32 %v5766_v25, %v5767_v19  ;;  %v5773_v35 = vsel %vm5639_vm1, %v1880_v33, -inf  ;;  %9739 = vmatpush3.bf16.msra.mxu1 %v11217_v42  ;;  %9725 = vmatprep.subr.bf16.mxu0 %v11405_v52 }
 0x17b   :  { %v5775_v38 = vmax.f32 %v5773_v35, %v5774_v22  ;;  %v7989_v39 = vpop.f32.mrb[38].mxu0  ;;  %9741 = vmatprep.subr.bf16.mxu1 %v11442_v15  ;;  %8600 = vmatprep.mubr.msk.f32.mxu0 %vm186_vm0, %v10954_v61 }
 0x17c   :  { %v8011_v17 = vpop.f32.mrb[38].mxu1  ;;  %v1805_v43 = vpop.f32.mrb[39].mxu0  ;;  %8622 = vmatprep.mubr.msk.f32.mxu1 %vm186_vm0, %v10954_v61  ;;  %v5771_v24 = vsel %vm5639_vm1, %v7989_v39, -inf }
 0x17d   :  { %v5769_v42 = vsel %vm5639_vm1, %v1805_v43, -inf  ;;  %v1890_v46 = vpop.f32.mrb[39].mxu1  ;;  %9727 = vmatpush3.bf16.msra.mxu0 %v11405_v52  ;;  %v5778_v44 = vsel %vm5639_vm1, %v8011_v17, -inf }
 0x17e   :  { %v5770_v60 = vmax.f32 %v5768_v34, %v5769_v42  ;;  %v5776_v47 = vsel %vm5639_vm1, %v1890_v46, -inf  ;;  %9743 = vmatpush3.bf16.msra.mxu1 %v11442_v15  ;;  %9729 = vmatprep.subr.bf16.mxu0 %v11442_v15  ;;  %v11561_v42 = vld [vmem:[%s12234_s1 + $0x8] sm:$0xff]  ;;  %v152_v46 = vld [vmem:[%s12233_s0 + $0x420] sm:$0xff] }
 0x17f   :  { %v5777_v48 = vmax.f32 %v5775_v38, %v5776_v47  ;;  %9745 = vmatprep.subr.bf16.mxu1 %v11465_v40 }
 0x180   :  { %v5772_v61 = vmax.f32 %v5770_v60, %v5771_v24 }
 0x181   :  { %v5779_v4 = vmax.f32 %v5777_v48, %v5778_v44  ;;  %9731 = vmatpush3.bf16.msra.mxu0 %v11442_v15  ;;  %v153_v44 = vld [vmem:[%s12233_s0 + $0x428] sm:$0xff]  ;;  %v11578_v48 = vld [vmem:[%s12234_s1 + $0x10] sm:$0xff] }
 0x182   :  { %v6112_v51 = vadd.f32 %v10901_v14, %v5772_v61  ;;  %9747 = vmatpush3.bf16.msra.mxu1 %v11465_v40  ;;  %9749 = vmatprep.subr.bf16.mxu0 %v11257_v3 }
 0x183   :  { %v6113_v54 = vadd.f32 %v10901_v14, %v5779_v4  ;;  %9765 = vmatprep.subr.bf16.mxu1 %v11262_v62  ;;  %v11585_v4 = vpack.c.bf16 %v153_v44, %v152_v46  ;;  %v158_v44 = vld [vmem:[%s12233_s0 + $0x450] sm:$0xff] }
 0x184   :  { %8601 = vmatmul.mubr.msk.f32.vlgmr.msra.gmra.mrb[92].mxu0 %vm186_vm0, %v10983_v16  ;;  %v6176_v57 = vmax.f32 %v6112_v51, 0.0 }
 0x185   :  { %8623 = vmatmul.mubr.msk.f32.vlgmr.msra.gmra.mrb[92].mxu1 %vm186_vm0, %v10983_v16  ;;  %9751 = vmatpush3.bf16.msra.mxu0 %v11257_v3  ;;  %v6177_v50 = vmax.f32 %v6113_v54, 0.0 }
 0x186   :  { %9767 = vmatpush3.bf16.msra.mxu1 %v11262_v62  ;;  %8603 = vmatprep.mubr.msk.f32.mxu0 %vm186_vm0, %v11000_v20 }
 0x187   :  { %v8030_v8 = vpop.f32.mrb[40].mxu0  ;;  %8625 = vmatprep.mubr.msk.f32.mxu1 %vm186_vm0, %v11000_v20  ;;  %9753 = vmatprep.subr.bf16.mxu0 %v11262_v62  ;;  %v11512_v5 = vpack.c.bf16 %v6177_v50, %v6176_v57  ;;  %v151_v20 = vld [vmem:[%s12233_s0 + $0x418] sm:$0xff] }
 0x188   :  { %v5781_v16 = vsel %vm5639_vm1, %v8030_v8, -inf  ;;  %v8052_v3 = vpop.f32.mrb[40].mxu1  ;;  %v1965_v21 = vpop.f32.mrb[41].mxu0  ;;  %8604 = vmatmul.mubr.msk.f32.gmra.mrb[94].mxu0 %vm186_vm0, %v11017_v30  ;;  %9769 = vmatprep.subr.bf16.mxu1 %v11285_v29  ;;  %v11533_v31 = vpack.c.bf16 %v151_v20, %v150_v9  ;;  %v11613_v20 = vpack.c.bf16 %v155_v56, %v154_v55 }
 0x189   :  { %v5788_v63 = vsel %vm5639_vm1, %v8052_v3, -inf  ;;  %v5780_v10 = vsel %vm5639_vm1, %v1965_v21, -inf  ;;  %v2050_v11 = vpop.f32.mrb[41].mxu1  ;;  %8626 = vmatmul.mubr.msk.f32.gmra.mrb[94].mxu1 %vm186_vm0, %v11017_v30  ;;  %9755 = vmatpush3.bf16.msra.mxu0 %v11262_v62 }
 0x18a   :  { %v5782_v12 = vmax.f32 %v5780_v10, %v5781_v16  ;;  %v5787_v13 = vsel %vm5639_vm1, %v2050_v11, -inf  ;;  %9771 = vmatpush3.bf16.msra.mxu1 %v11285_v29  ;;  %9757 = vmatprep.subr.bf16.mxu0 %v11505_v53 }
 0x18b   :  { %v5789_v19 = vmax.f32 %v5787_v13, %v5788_v63  ;;  %v8033_v1 = vpop.f32.mrb[42].mxu0  ;;  %9773 = vmatprep.subr.bf16.mxu1 %v11510_v2  ;;  %8644 = vmatprep.mubr.msk.f32.mxu0 %vm186_vm0, %v11538_v28 }
 0x18c   :  { %v8055_v30 = vpop.f32.mrb[42].mxu1  ;;  %v1975_v62 = vpop.f32.mrb[43].mxu0  ;;  %8666 = vmatprep.mubr.msk.f32.mxu1 %vm186_vm0, %v11538_v28  ;;  %v5785_v32 = vsel %vm5639_vm1, %v8033_v1, -inf }
 0x18d   :  { %v5783_v22 = vsel %vm5639_vm1, %v1975_v62, -inf  ;;  %v2060_v25 = vpop.f32.mrb[43].mxu1  ;;  %9759 = vmatpush3.bf16.msra.mxu0 %v11505_v53  ;;  %v5792_v33 = vsel %vm5639_vm1, %v8055_v30, -inf }
 0x18e   :  { %v5784_v34 = vmax.f32 %v5782_v12, %v5783_v22  ;;  %v5790_v35 = vsel %vm5639_vm1, %v2060_v25, -inf  ;;  %9775 = vmatpush3.bf16.msra.mxu1 %v11510_v2  ;;  %9761 = vmatprep.subr.bf16.mxu0 %v11510_v2 }
 0x18f   :  { %v5791_v38 = vmax.f32 %v5789_v19, %v5790_v35  ;;  %9777 = vmatprep.subr.bf16.mxu1 %v11533_v31 }
 0x190   :  { %v5786_v39 = vmax.f32 %v5784_v34, %v5785_v32  ;;  %v157_v34 = vld [vmem:[%s12233_s0 + $0x448] sm:$0xff] }
 0x191   :  { %v5793_v17 = vmax.f32 %v5791_v38, %v5792_v33  ;;  %9763 = vmatpush3.bf16.msra.mxu0 %v11510_v2  ;;  %v156_v33 = vld [vmem:[%s12233_s0 + $0x440] sm:$0xff] }
 0x192   :  { %v6114_v43 = vadd.f32 %v10901_v14, %v5786_v39  ;;  %9779 = vmatpush3.bf16.msra.mxu1 %v11533_v31  ;;  %9781 = vmatprep.subr.bf16.mxu0 %v11285_v29 }
 0x193   :  { %v6115_v24 = vadd.f32 %v10901_v14, %v5793_v17  ;;  %9797 = vmatprep.subr.bf16.mxu1 %v11322_v26  ;;  %v11650_v17 = vpack.c.bf16 %v157_v34, %v156_v33 }
 0x194   :  { %8645 = vmatmul.mubr.msk.f32.vlgmr.msra.gmra.mrb[96].mxu0 %vm186_vm0, %v11561_v42  ;;  %v6178_v60 = vmax.f32 %v6114_v43, 0.0 }
 0x195   :  { %8667 = vmatmul.mubr.msk.f32.vlgmr.msra.gmra.mrb[96].mxu1 %vm186_vm0, %v11561_v42  ;;  %9783 = vmatpush3.bf16.msra.mxu0 %v11285_v29  ;;  %v6179_v47 = vmax.f32 %v6115_v24, 0.0 }
 0x196   :  { %9799 = vmatpush3.bf16.msra.mxu1 %v11322_v26  ;;  %8647 = vmatprep.mubr.msk.f32.mxu0 %vm186_vm0, %v11578_v48 }
 0x197   :  { %v8074_v61 = vpop.f32.mrb[44].mxu0  ;;  %8669 = vmatprep.mubr.msk.f32.mxu1 %vm186_vm0, %v11578_v48  ;;  %9785 = vmatprep.subr.bf16.mxu0 %v11322_v26  ;;  %v11587_v29 = vpack.c.bf16 %v6179_v47, %v6178_v60  ;;  %v159_v60 = vld [vmem:[%s12233_s0 + $0x458] sm:$0xff] }
 0x198   :  { %v5795_v51 = vsel %vm5639_vm1, %v8074_v61, -inf  ;;  %v8096_v54 = vpop.f32.mrb[44].mxu1  ;;  %v2135_v41 = vpop.f32.mrb[45].mxu0  ;;  %8648 = vmatmul.mubr.msk.f32.gmra.mrb[98].mxu0 %vm186_vm0, %v11593_v59  ;;  %9801 = vmatprep.subr.bf16.mxu1 %v11345_v7 }
 0x199   :  { %v5802_v57 = vsel %vm5639_vm1, %v8096_v54, -inf  ;;  %v5794_v50 = vsel %vm5639_vm1, %v2135_v41, -inf  ;;  %v2220_v8 = vpop.f32.mrb[45].mxu1  ;;  %8670 = vmatmul.mubr.msk.f32.gmra.mrb[98].mxu1 %vm186_vm0, %v11593_v59  ;;  %9787 = vmatpush3.bf16.msra.mxu0 %v11322_v26 }
 0x19a   :  { %v5796_v16 = vmax.f32 %v5794_v50, %v5795_v51  ;;  %v5801_v3 = vsel %vm5639_vm1, %v2220_v8, -inf  ;;  %9803 = vmatpush3.bf16.msra.mxu1 %v11345_v7  ;;  %9789 = vmatprep.subr.bf16.mxu0 %v11533_v31 }
 0x19b   :  { %v5803_v21 = vmax.f32 %v5801_v3, %v5802_v57  ;;  %v8077_v9 = vpop.f32.mrb[46].mxu0  ;;  %9805 = vmatprep.subr.bf16.mxu1 %v11585_v4  ;;  %8688 = vmatprep.mubr.msk.f32.mxu0 %vm186_vm0, %v11538_v28  ;;  %v11673_v57 = vpack.c.bf16 %v159_v60, %v158_v44 }
 0x19c   :  { %v8099_v63 = vpop.f32.mrb[46].mxu1  ;;  %v2145_v10 = vpop.f32.mrb[47].mxu0  ;;  %8710 = vmatprep.mubr.msk.f32.mxu1 %vm186_vm0, %v11538_v28  ;;  %v5799_v26 = vsel %vm5639_vm1, %v8077_v9, -inf }
 0x19d   :  { %v5797_v11 = vsel %vm5639_vm1, %v2145_v10, -inf  ;;  %v2230_v12 = vpop.f32.mrb[47].mxu1  ;;  %9791 = vmatpush3.bf16.msra.mxu0 %v11533_v31  ;;  %v5806_v13 = vsel %vm5639_vm1, %v8099_v63, -inf }
 0x19e   :  { %v5798_v19 = vmax.f32 %v5796_v16, %v5797_v11  ;;  %v5804_v1 = vsel %vm5639_vm1, %v2230_v12, -inf  ;;  %9807 = vmatpush3.bf16.msra.mxu1 %v11585_v4  ;;  %9793 = vmatprep.subr.bf16.mxu0 %v11585_v4 }
 0x19f   :  { %v5805_v30 = vmax.f32 %v5803_v21, %v5804_v1  ;;  %9809 = vmatprep.subr.bf16.mxu1 %v11613_v20  ;;  %v161_v1 = vld [vmem:[%s12233_s0 + $0x468] sm:$0xff] }
 0x1a0   :  { %v5800_v62 = vmax.f32 %v5798_v19, %v5799_v26  ;;  %v160_v19 = vld [vmem:[%s12233_s0 + $0x460] sm:$0xff] }
 0x1a1   :  { %v5807_v32 = vmax.f32 %v5805_v30, %v5806_v13  ;;  %9795 = vmatpush3.bf16.msra.mxu0 %v11585_v4 }
 0x1a2   :  { %v6116_v22 = vadd.f32 %v10901_v14, %v5800_v62  ;;  %9811 = vmatpush3.bf16.msra.mxu1 %v11613_v20  ;;  %9813 = vmatprep.subr.bf16.mxu0 %v11345_v7 }
 0x1a3   :  { %v6117_v25 = vadd.f32 %v10901_v14, %v5807_v32  ;;  %9829 = vmatprep.subr.bf16.mxu1 %v11382_v36 }
 0x1a4   :  { %8689 = vmatmul.mubr.msk.f32.vlgmr.msra.gmra.mrb[100].mxu0 %vm186_vm0, %v11561_v42  ;;  %v6180_v35 = vmax.f32 %v6116_v22, 0.0  ;;  %v11710_v22 = vpack.c.bf16 %v161_v1, %v160_v19 }
 0x1a5   :  { %8711 = vmatmul.mubr.msk.f32.vlgmr.msra.gmra.mrb[100].mxu1 %vm186_vm0, %v11561_v42  ;;  %9815 = vmatpush3.bf16.msra.mxu0 %v11345_v7  ;;  %v6181_v38 = vmax.f32 %v6117_v25, 0.0 }
 0x1a6   :  { %9831 = vmatpush3.bf16.msra.mxu1 %v11382_v36  ;;  %8691 = vmatprep.mubr.msk.f32.mxu0 %vm186_vm0, %v11578_v48 }
 0x1a7   :  { %v8118_v39 = vpop.f32.mrb[48].mxu0  ;;  %8713 = vmatprep.mubr.msk.f32.mxu1 %vm186_vm0, %v11578_v48  ;;  %9817 = vmatprep.subr.bf16.mxu0 %v11382_v36  ;;  %v11652_v43 = vpack.c.bf16 %v6181_v38, %v6180_v35  ;;  %v162_v35 = vld [vmem:[%s12233_s0 + $0x470] sm:$0xff]  ;;  %v163_v38 = vld [vmem:[%s12233_s0 + $0x478] sm:$0xff] }
 0x1a8   :  { %v5809_v24 = vsel %vm5639_vm1, %v8118_v39, -inf  ;;  %v8140_v46 = vpop.f32.mrb[48].mxu1  ;;  %v2305_v7 = vpop.f32.mrb[49].mxu0  ;;  %8692 = vmatmul.mubr.msk.f32.gmra.mrb[102].mxu0 %vm186_vm0, %v11593_v59  ;;  %9833 = vmatprep.subr.bf16.mxu1 %v11405_v52 }
 0x1a9   :  { %v5816_v47 = vsel %vm5639_vm1, %v8140_v46, -inf  ;;  %v5808_v61 = vsel %vm5639_vm1, %v2305_v7, -inf  ;;  %v2390_v51 = vpop.f32.mrb[49].mxu1  ;;  %8714 = vmatmul.mubr.msk.f32.gmra.mrb[102].mxu1 %vm186_vm0, %v11593_v59  ;;  %9819 = vmatpush3.bf16.msra.mxu0 %v11382_v36 }
 0x1aa   :  { %v5810_v54 = vmax.f32 %v5808_v61, %v5809_v24  ;;  %v5815_v41 = vsel %vm5639_vm1, %v2390_v51, -inf  ;;  %9835 = vmatpush3.bf16.msra.mxu1 %v11405_v52  ;;  %9821 = vmatprep.subr.bf16.mxu0 %v11613_v20  ;;  %v11733_v61 = vpack.c.bf16 %v163_v38, %v162_v35 }
 0x1ab   :  { %v5817_v55 = vmax.f32 %v5815_v41, %v5816_v47  ;;  %v8121_v56 = vpop.f32.mrb[50].mxu0  ;;  %9837 = vmatprep.subr.bf16.mxu1 %v11650_v17  ;;  %8732 = vmatprep.mubr.msk.f32.mxu0 %vm186_vm0, %v11538_v28 }
 0x1ac   :  { %v8143_v50 = vpop.f32.mrb[50].mxu1  ;;  %v2315_v8 = vpop.f32.mrb[51].mxu0  ;;  %8754 = vmatprep.mubr.msk.f32.mxu1 %vm186_vm0, %v11538_v28  ;;  %v5813_v36 = vsel %vm5639_vm1, %v8121_v56, -inf }
 0x1ad   :  { %v5811_v16 = vsel %vm5639_vm1, %v2315_v8, -inf  ;;  %v2400_v3 = vpop.f32.mrb[51].mxu1  ;;  %9823 = vmatpush3.bf16.msra.mxu0 %v11613_v20  ;;  %v5820_v21 = vsel %vm5639_vm1, %v8143_v50, -inf }
 0x1ae   :  { %v5812_v9 = vmax.f32 %v5810_v54, %v5811_v16  ;;  %v5818_v63 = vsel %vm5639_vm1, %v2400_v3, -inf  ;;  %9839 = vmatpush3.bf16.msra.mxu1 %v11650_v17  ;;  %9825 = vmatprep.subr.bf16.mxu0 %v11650_v17  ;;  %v6238_v16 = vld [vmem:[%s12236_s4] sm:$0xff] }
 0x1af   :  { %v5819_v10 = vmax.f32 %v5817_v55, %v5818_v63  ;;  %9841 = vmatprep.subr.bf16.mxu1 %v11673_v57  ;;  %6244 = vperm.xlu0 %10069, %v6238_v16   ;;  %v164_v63 = vld [vmem:[%s12233_s0 + $0x480] sm:$0xff] }
 0x1b0   :  { %v5814_v26 = vmax.f32 %v5812_v9, %v5813_v36 }
 0x1b1   :  { %v5821_v11 = vmax.f32 %v5819_v10, %v5820_v21  ;;  %9827 = vmatpush3.bf16.msra.mxu0 %v11650_v17  ;;  %v165_v10 = vld [vmem:[%s12233_s0 + $0x488] sm:$0xff] }
 0x1b2   :  { %v6118_v12 = vadd.f32 %v10901_v14, %v5814_v26  ;;  %9843 = vmatpush3.bf16.msra.mxu1 %v11673_v57  ;;  %9845 = vmatprep.subr.bf16.mxu0 %v11405_v52  ;;  %v166_v26 = vld [vmem:[%s12233_s0 + $0x490] sm:$0xff]  ;;  %v9884_v19 = vpack.c.bf16 %v165_v10, %v164_v63 }
 0x1b3   :  { %v6119_v13 = vadd.f32 %v10901_v14, %v5821_v11  ;;  %9861 = vmatprep.subr.bf16.mxu1 %v11442_v15  ;;  %v167_v11 = vld [vmem:[%s12233_s0 + $0x498] sm:$0xff] }
 0x1b4   :  { %8733 = vmatmul.mubr.msk.f32.vlgmr.msra.gmra.mrb[104].mxu0 %vm186_vm0, %v11561_v42  ;;  %v6182_v30 = vmax.f32 %v6118_v12, 0.0 }
 0x1b5   :  { %8755 = vmatmul.mubr.msk.f32.vlgmr.msra.gmra.mrb[104].mxu1 %vm186_vm0, %v11561_v42  ;;  %9847 = vmatpush3.bf16.msra.mxu0 %v11405_v52  ;;  %v6183_v62 = vmax.f32 %v6119_v13, 0.0 }
 0x1b6   :  { %9863 = vmatpush3.bf16.msra.mxu1 %v11442_v15  ;;  %8735 = vmatprep.mubr.msk.f32.mxu0 %vm186_vm0, %v11578_v48 }
 0x1b7   :  { %v8162_v32 = vpop.f32.mrb[52].mxu0  ;;  %8757 = vmatprep.mubr.msk.f32.mxu1 %vm186_vm0, %v11578_v48  ;;  %9849 = vmatprep.subr.bf16.mxu0 %v11442_v15  ;;  %v11712_v25 = vpack.c.bf16 %v6183_v62, %v6182_v30  ;;  %v9888_v30 = vpack.c.bf16 %v167_v11, %v166_v26 }
 0x1b8   :  { %v5823_v33 = vsel %vm5639_vm1, %v8162_v32, -inf  ;;  %v8184_v34 = vpop.f32.mrb[52].mxu1  ;;  %v2475_v52 = vpop.f32.mrb[53].mxu0  ;;  %8736 = vmatmul.mubr.msk.f32.gmra.mrb[106].mxu0 %vm186_vm0, %v11593_v59  ;;  %9865 = vmatprep.subr.bf16.mxu1 %v11465_v40 }
 0x1b9   :  { %v5830_v39 = vsel %vm5639_vm1, %v8184_v34, -inf  ;;  %v5822_v24 = vsel %vm5639_vm1, %v2475_v52, -inf  ;;  %v2560_v46 = vpop.f32.mrb[53].mxu1  ;;  %8758 = vmatmul.mubr.msk.f32.gmra.mrb[106].mxu1 %vm186_vm0, %v11593_v59  ;;  %9851 = vmatpush3.bf16.msra.mxu0 %v11442_v15  ;;  %v168_v34 = vld [vmem:[%s12233_s0 + $0x4a0] sm:$0xff]  ;;  %v169_v52 = vld [vmem:[%s12233_s0 + $0x4a8] sm:$0xff] }
 0x1ba   :  { %v5824_v7 = vmax.f32 %v5822_v24, %v5823_v33  ;;  %v5829_v44 = vsel %vm5639_vm1, %v2560_v46, -inf  ;;  %9867 = vmatpush3.bf16.msra.mxu1 %v11465_v40  ;;  %9853 = vmatprep.subr.bf16.mxu0 %v11673_v57  ;;  %v6241_v24 = vld [vmem:[%s12236_s4 + $0x18] sm:$0xff] }
 0x1bb   :  { %v5831_v60 = vmax.f32 %v5829_v44, %v5830_v39  ;;  %v8165_v47 = vpop.f32.mrb[54].mxu0  ;;  %9869 = vmatprep.subr.bf16.mxu1 %v11710_v22  ;;  %8776 = vmatprep.mubr.msk.f32.mxu0 %vm186_vm0, %v11538_v28 }
 0x1bc   :  { %v8187_v51 = vpop.f32.mrb[54].mxu1  ;;  %v2485_v54 = vpop.f32.mrb[55].mxu0  ;;  %8798 = vmatprep.mubr.msk.f32.mxu1 %vm186_vm0, %v11538_v28  ;;  %v5827_v15 = vsel %vm5639_vm1, %v8165_v47, -inf  ;;  %v11801_v47 = vpack.c.bf16 %v169_v52, %v168_v34  ;;  %6259 = vperm.xlu0 %10069, %v6241_v24  }
 0x1bd   :  { %v5825_v40 = vsel %vm5639_vm1, %v2485_v54, -inf  ;;  %v2570_v41 = vpop.f32.mrb[55].mxu1  ;;  %9855 = vmatpush3.bf16.msra.mxu0 %v11673_v57  ;;  %v5834_v55 = vsel %vm5639_vm1, %v8187_v51, -inf }
 0x1be   :  { %v5826_v56 = vmax.f32 %v5824_v7, %v5825_v40  ;;  %v5832_v50 = vsel %vm5639_vm1, %v2570_v41, -inf  ;;  %9871 = vmatpush3.bf16.msra.mxu1 %v11710_v22  ;;  %9857 = vmatprep.subr.bf16.mxu0 %v11710_v22 }
 0x1bf   :  { %v5833_v8 = vmax.f32 %v5831_v60, %v5832_v50  ;;  %9873 = vmatprep.subr.bf16.mxu1 %v11733_v61 }
 0x1c0   :  { %v5828_v36 = vmax.f32 %v5826_v56, %v5827_v15 }
 0x1c1   :  { %v5835_v3 = vmax.f32 %v5833_v8, %v5834_v55  ;;  %9859 = vmatpush3.bf16.msra.mxu0 %v11710_v22 }
 0x1c2   :  { %v6120_v21 = vadd.f32 %v10901_v14, %v5828_v36  ;;  %9875 = vmatpush3.bf16.msra.mxu1 %v11733_v61  ;;  %9877 = vmatprep.subr.bf16.mxu0 %v11505_v53 }
 0x1c3   :  { %v6121_v9 = vadd.f32 %v10901_v14, %v5835_v3  ;;  %9893 = vmatprep.subr.bf16.mxu1 %v11510_v2 }
 0x1c4   :  { %8777 = vmatmul.mubr.msk.f32.vlgmr.msra.gmra.mrb[108].mxu0 %vm186_vm0, %v11561_v42  ;;  %v6184_v12 = vmax.f32 %v6120_v21, 0.0  ;;  %v170_v21 = vld [vmem:[%s12233_s0 + $0x4b0] sm:$0xff] }
 0x1c5   :  { %8799 = vmatmul.mubr.msk.f32.vlgmr.msra.gmra.mrb[108].mxu1 %vm186_vm0, %v11561_v42  ;;  %9879 = vmatpush3.bf16.msra.mxu0 %v11505_v53  ;;  %v6185_v13 = vmax.f32 %v6121_v9, 0.0  ;;  %v171_v9 = vld [vmem:[%s12233_s0 + $0x4b8] sm:$0xff] }
 0x1c6   :  { %9895 = vmatpush3.bf16.msra.mxu1 %v11510_v2  ;;  %8779 = vmatprep.mubr.msk.f32.mxu0 %vm186_vm0, %v11578_v48  ;;  %v9920_v11 = vpack.c.bf16 %v171_v9, %v170_v21 }
 0x1c7   :  { %v8206_v1 = vpop.f32.mrb[56].mxu0  ;;  %8801 = vmatprep.mubr.msk.f32.mxu1 %vm186_vm0, %v11578_v48  ;;  %9881 = vmatprep.subr.bf16.mxu0 %v11510_v2  ;;  %v11779_v62 = vpack.c.bf16 %v6185_v13, %v6184_v12 }
 0x1c8   :  { %v5837_v32 = vsel %vm5639_vm1, %v8206_v1, -inf  ;;  %v8228_v33 = vpop.f32.mrb[56].mxu1  ;;  %v2645_v53 = vpop.f32.mrb[57].mxu0  ;;  %8780 = vmatmul.mubr.msk.f32.gmra.mrb[110].mxu0 %vm186_vm0, %v11593_v59  ;;  %9897 = vmatprep.subr.bf16.mxu1 %v11533_v31 }
 0x1c9   :  { %v5844_v35 = vsel %vm5639_vm1, %v8228_v33, -inf  ;;  %v5836_v38 = vsel %vm5639_vm1, %v2645_v53, -inf  ;;  %v2730_v39 = vpop.f32.mrb[57].mxu1  ;;  %8802 = vmatmul.mubr.msk.f32.gmra.mrb[110].mxu1 %vm186_vm0, %v11593_v59  ;;  %9883 = vmatpush3.bf16.msra.mxu0 %v11510_v2 }
 0x1ca   :  { %v5838_v46 = vmax.f32 %v5836_v38, %v5837_v32  ;;  %v5843_v7 = vsel %vm5639_vm1, %v2730_v39, -inf  ;;  %9899 = vmatpush3.bf16.msra.mxu1 %v11533_v31  ;;  %9885 = vmatprep.subr.bf16.mxu0 %v9884_v19 }
 0x1cb   :  { %v5845_v44 = vmax.f32 %v5843_v7, %v5844_v35  ;;  %v8209_v60 = vpop.f32.mrb[58].mxu0  ;;  %9901 = vmatprep.subr.bf16.mxu1 %v9888_v30  ;;  %8820 = vmatprep.mubr.msk.f32.mxu0 %vm186_vm0, %v11538_v28 }
 0x1cc   :  { %v8231_v51 = vpop.f32.mrb[58].mxu1  ;;  %v2655_v2 = vpop.f32.mrb[59].mxu0  ;;  %8842 = vmatprep.mubr.msk.f32.mxu1 %vm186_vm0, %v11538_v28  ;;  %v5841_v54 = vsel %vm5639_vm1, %v8209_v60, -inf }
 0x1cd   :  { %v5839_v15 = vsel %vm5639_vm1, %v2655_v2, -inf  ;;  %v2740_v40 = vpop.f32.mrb[59].mxu1  ;;  %9887 = vmatpush3.bf16.msra.mxu0 %v9884_v19  ;;  %v5848_v41 = vsel %vm5639_vm1, %v8231_v51, -inf }
 0x1ce   :  { %v5840_v55 = vmax.f32 %v5838_v46, %v5839_v15  ;;  %v5846_v56 = vsel %vm5639_vm1, %v2740_v40, -inf  ;;  %9903 = vmatpush3.bf16.msra.mxu1 %v9888_v30  ;;  %9889 = vmatprep.subr.bf16.mxu0 %v9888_v30 }
 0x1cf   :  { %v5847_v50 = vmax.f32 %v5845_v44, %v5846_v56  ;;  %9905 = vmatprep.subr.bf16.mxu1 %v11801_v47  ;;  %v175_v56 = vld [vmem:[%s12233_s0 + $0x4d8] sm:$0xff] }
 0x1d0   :  { %v5842_v8 = vmax.f32 %v5840_v55, %v5841_v54  ;;  %v174_v55 = vld [vmem:[%s12233_s0 + $0x4d0] sm:$0xff] }
 0x1d1   :  { %v5849_v36 = vmax.f32 %v5847_v50, %v5848_v41  ;;  %9891 = vmatpush3.bf16.msra.mxu0 %v9888_v30  ;;  %v173_v30 = vld [vmem:[%s12233_s0 + $0x4c8] sm:$0xff] }
 0x1d2   :  { %v6122_v16 = vadd.f32 %v10901_v14, %v5842_v8  ;;  %9907 = vmatpush3.bf16.msra.mxu1 %v11801_v47  ;;  %9909 = vmatprep.subr.bf16.mxu0 %v11533_v31 }
 0x1d3   :  { %v6123_v3 = vadd.f32 %v10901_v14, %v5849_v36  ;;  %9925 = vmatprep.subr.bf16.mxu1 %v11585_v4 }
 0x1d4   :  { %8821 = vmatmul.mubr.msk.f32.vlgmr.msra.gmra.mrb[112].mxu0 %vm186_vm0, %v11561_v42  ;;  %v6186_v63 = vmax.f32 %v6122_v16, 0.0  ;;  %v9952_v16 = vpack.c.bf16 %v175_v56, %v174_v55 }
 0x1d5   :  { %8843 = vmatmul.mubr.msk.f32.vlgmr.msra.gmra.mrb[112].mxu1 %vm186_vm0, %v11561_v42  ;;  %9911 = vmatpush3.bf16.msra.mxu0 %v11533_v31  ;;  %v6187_v10 = vmax.f32 %v6123_v3, 0.0  ;;  %v172_v31 = vld [vmem:[%s12233_s0 + $0x4c0] sm:$0xff] }
 0x1d6   :  { %9927 = vmatpush3.bf16.msra.mxu1 %v11585_v4  ;;  %8823 = vmatprep.mubr.msk.f32.mxu0 %vm186_vm0, %v11578_v48  ;;  %v11854_v39 = vpack.c.bf16 %v173_v30, %v172_v31 }
 0x1d7   :  { %v8250_v26 = vpop.f32.mrb[60].mxu0  ;;  %8845 = vmatprep.mubr.msk.f32.mxu1 %vm186_vm0, %v11578_v48  ;;  %9913 = vmatprep.subr.bf16.mxu0 %v11585_v4  ;;  %v11834_v12 = vpack.c.bf16 %v6187_v10, %v6186_v63  ;;  %v177_v10 = vld [vmem:[%s12233_s0 + $0x4e8] sm:$0xff] }
 0x1d8   :  { %v5851_v13 = vsel %vm5639_vm1, %v8250_v26, -inf  ;;  %v8272_v19 = vpop.f32.mrb[60].mxu1  ;;  %v2815_v1 = vpop.f32.mrb[61].mxu0  ;;  %8824 = vmatmul.mubr.msk.f32.gmra.mrb[114].mxu0 %vm186_vm0, %v11593_v59  ;;  %9929 = vmatprep.subr.bf16.mxu1 %v11613_v20 }
 0x1d9   :  { %v5858_v32 = vsel %vm5639_vm1, %v8272_v19, -inf  ;;  %v5850_v33 = vsel %vm5639_vm1, %v2815_v1, -inf  ;;  %v2900_v53 = vpop.f32.mrb[61].mxu1  ;;  %8846 = vmatmul.mubr.msk.f32.gmra.mrb[114].mxu1 %vm186_vm0, %v11593_v59  ;;  %9915 = vmatpush3.bf16.msra.mxu0 %v11585_v4 }
 0x1da   :  { %v5852_v34 = vmax.f32 %v5850_v33, %v5851_v13  ;;  %v5857_v52 = vsel %vm5639_vm1, %v2900_v53, -inf  ;;  %9931 = vmatpush3.bf16.msra.mxu1 %v11613_v20  ;;  %9917 = vmatprep.subr.bf16.mxu0 %v11801_v47 }
 0x1db   :  { %v5859_v35 = vmax.f32 %v5857_v52, %v5858_v32  ;;  %v8253_v38 = vpop.f32.mrb[62].mxu0  ;;  %9933 = vmatprep.subr.bf16.mxu1 %v9920_v11  ;;  %8864 = vmatprep.mubr.msk.f32.mxu0 %vm186_vm0, %v11538_v28 }
 0x1dc   :  { %v8275_v24 = vpop.f32.mrb[62].mxu1  ;;  %v2825_v46 = vpop.f32.mrb[63].mxu0  ;;  %8886 = vmatprep.mubr.msk.f32.mxu1 %vm186_vm0, %v11538_v28  ;;  %v5855_v4 = vsel %vm5639_vm1, %v8253_v38, -inf }
 0x1dd   :  { %v5853_v7 = vsel %vm5639_vm1, %v2825_v46, -inf  ;;  %v2910_v44 = vpop.f32.mrb[63].mxu1  ;;  %9919 = vmatpush3.bf16.msra.mxu0 %v11801_v47  ;;  %v5862_v60 = vsel %vm5639_vm1, %v8275_v24, -inf }
 0x1de   :  { %v5854_v51 = vmax.f32 %v5852_v34, %v5853_v7  ;;  %v5860_v2 = vsel %vm5639_vm1, %v2910_v44, -inf  ;;  %9935 = vmatpush3.bf16.msra.mxu1 %v9920_v11  ;;  %9921 = vmatprep.subr.bf16.mxu0 %v9920_v11 }
 0x1df   :  { %v5861_v54 = vmax.f32 %v5859_v35, %v5860_v2  ;;  %9937 = vmatprep.subr.bf16.mxu1 %v11854_v39  ;;  %v179_v2 = vld [vmem:[%s12233_s0 + $0x4f8] sm:$0xff] }
 0x1e0   :  { %v5856_v15 = vmax.f32 %v5854_v51, %v5855_v4  ;;  %v178_v51 = vld [vmem:[%s12233_s0 + $0x4f0] sm:$0xff] }
 0x1e1   :  { %v5863_v40 = vmax.f32 %v5861_v54, %v5862_v60  ;;  %9923 = vmatpush3.bf16.msra.mxu0 %v9920_v11 }
 0x1e2   :  { %v6124_v41 = vadd.f32 %v10901_v14, %v5856_v15  ;;  %9939 = vmatpush3.bf16.msra.mxu1 %v11854_v39  ;;  %9941 = vmatprep.subr.bf16.mxu0 %v11613_v20 }
 0x1e3   :  { %v6125_v47 = vadd.f32 %v10901_v14, %v5863_v40  ;;  %9957 = vmatprep.subr.bf16.mxu1 %v11650_v17  ;;  %v9984_v40 = vpack.c.bf16 %v179_v2, %v178_v51 }
 0x1e4   :  { %8865 = vmatmul.mubr.msk.f32.vlgmr.msra.gmra.mrb[116].mxu0 %vm186_vm0, %v11561_v42  ;;  %v6188_v50 = vmax.f32 %v6124_v41, 0.0 }
 0x1e5   :  { %8887 = vmatmul.mubr.msk.f32.vlgmr.msra.gmra.mrb[116].mxu1 %vm186_vm0, %v11561_v42  ;;  %9943 = vmatpush3.bf16.msra.mxu0 %v11613_v20  ;;  %v6189_v8 = vmax.f32 %v6125_v47, 0.0  ;;  %v176_v20 = vld [vmem:[%s12233_s0 + $0x4e0] sm:$0xff] }
 0x1e6   :  { %9959 = vmatpush3.bf16.msra.mxu1 %v11650_v17  ;;  %8867 = vmatprep.mubr.msk.f32.mxu0 %vm186_vm0, %v11578_v48  ;;  %v11908_v32 = vpack.c.bf16 %v177_v10, %v176_v20 }
 0x1e7   :  { %v8294_v36 = vpop.f32.mrb[64].mxu0  ;;  %8889 = vmatprep.mubr.msk.f32.mxu1 %vm186_vm0, %v11578_v48  ;;  %9945 = vmatprep.subr.bf16.mxu0 %v11650_v17  ;;  %v11888_v3 = vpack.c.bf16 %v6189_v8, %v6188_v50  ;;  %v181_v50 = vld [vmem:[%s12233_s0 + $0x508] sm:$0xff] }
 0x1e8   :  { %v5865_v21 = vsel %vm5639_vm1, %v8294_v36, -inf  ;;  %v8316_v9 = vpop.f32.mrb[64].mxu1  ;;  %v2985_v63 = vpop.f32.mrb[65].mxu0  ;;  %8868 = vmatmul.mubr.msk.f32.gmra.mrb[118].mxu0 %vm186_vm0, %v11593_v59  ;;  %9961 = vmatprep.subr.bf16.mxu1 %v11673_v57 }
 0x1e9   :  { %v5872_v26 = vsel %vm5639_vm1, %v8316_v9, -inf  ;;  %v5864_v11 = vsel %vm5639_vm1, %v2985_v63, -inf  ;;  %v3070_v13 = vpop.f32.mrb[65].mxu1  ;;  %8890 = vmatmul.mubr.msk.f32.gmra.mrb[118].mxu1 %vm186_vm0, %v11593_v59  ;;  %9947 = vmatpush3.bf16.msra.mxu0 %v11650_v17 }
 0x1ea   :  { %v5866_v19 = vmax.f32 %v5864_v11, %v5865_v21  ;;  %v5871_v1 = vsel %vm5639_vm1, %v3070_v13, -inf  ;;  %9963 = vmatpush3.bf16.msra.mxu1 %v11673_v57  ;;  %9949 = vmatprep.subr.bf16.mxu0 %v11854_v39 }
 0x1eb   :  { %v5873_v31 = vmax.f32 %v5871_v1, %v5872_v26  ;;  %v8297_v30 = vpop.f32.mrb[66].mxu0  ;;  %9965 = vmatprep.subr.bf16.mxu1 %v9952_v16  ;;  %8908 = vmatprep.mubr.msk.f32.mxu0 %vm186_vm0, %v11538_v28 }
 0x1ec   :  { %v8319_v33 = vpop.f32.mrb[66].mxu1  ;;  %v2995_v53 = vpop.f32.mrb[67].mxu0  ;;  %8930 = vmatprep.mubr.msk.f32.mxu1 %vm186_vm0, %v11538_v28  ;;  %v5869_v17 = vsel %vm5639_vm1, %v8297_v30, -inf }
 0x1ed   :  { %v5867_v34 = vsel %vm5639_vm1, %v2995_v53, -inf  ;;  %v3080_v52 = vpop.f32.mrb[67].mxu1  ;;  %9951 = vmatpush3.bf16.msra.mxu0 %v11854_v39  ;;  %v5876_v35 = vsel %vm5639_vm1, %v8319_v33, -inf }
 0x1ee   :  { %v5868_v38 = vmax.f32 %v5866_v19, %v5867_v34  ;;  %v5874_v24 = vsel %vm5639_vm1, %v3080_v52, -inf  ;;  %9967 = vmatpush3.bf16.msra.mxu1 %v9952_v16  ;;  %9953 = vmatprep.subr.bf16.mxu0 %v9952_v16 }
 0x1ef   :  { %v5875_v46 = vmax.f32 %v5873_v31, %v5874_v24  ;;  %9969 = vmatprep.subr.bf16.mxu1 %v11908_v32 }
 0x1f0   :  { %v5870_v4 = vmax.f32 %v5868_v38, %v5869_v17 }
 0x1f1   :  { %v5877_v7 = vmax.f32 %v5875_v46, %v5876_v35  ;;  %9955 = vmatpush3.bf16.msra.mxu0 %v9952_v16 }
 0x1f2   :  { %v6126_v44 = vadd.f32 %v10901_v14, %v5870_v4  ;;  %9971 = vmatpush3.bf16.msra.mxu1 %v11908_v32  ;;  %9973 = vmatprep.subr.bf16.mxu0 %v11673_v57 }
 0x1f3   :  { %v6127_v39 = vadd.f32 %v10901_v14, %v5877_v7  ;;  %9989 = vmatprep.subr.bf16.mxu1 %v11710_v22 }
 0x1f4   :  { %v6190_v60 = vmax.f32 %v6126_v44, 0.0  ;;  %8909 = vmatmul.mubr.msk.f32.vlgmr.msra.gmra.mrb[120].mxu0 %vm186_vm0, %v11561_v42 }
 0x1f5   :  { %v6191_v54 = vmax.f32 %v6127_v39, 0.0  ;;  %8931 = vmatmul.mubr.msk.f32.vlgmr.msra.gmra.mrb[120].mxu1 %vm186_vm0, %v11561_v42  ;;  %9975 = vmatpush3.bf16.msra.mxu0 %v11673_v57  ;;  %v180_v57 = vld [vmem:[%s12233_s0 + $0x500] sm:$0xff] }
 0x1f6   :  { %9991 = vmatpush3.bf16.msra.mxu1 %v11710_v22  ;;  %8911 = vmatprep.mubr.msk.f32.mxu0 %vm186_vm0, %v11578_v48  ;;  %v10000_v10 = vpack.c.bf16 %v181_v50, %v180_v57 }
 0x1f7   :  { %v8338_v15 = vpop.f32.mrb[68].mxu0  ;;  %8933 = vmatprep.mubr.msk.f32.mxu1 %vm186_vm0, %v11578_v48  ;;  %9977 = vmatprep.subr.bf16.mxu0 %v11710_v22  ;;  %v11942_v41 = vpack.c.bf16 %v6191_v54, %v6190_v60 }
 0x1f8   :  { %v5879_v47 = vsel %vm5639_vm1, %v8338_v15, -inf  ;;  %v8360_v55 = vpop.f32.mrb[68].mxu1  ;;  %v3155_v56 = vpop.f32.mrb[69].mxu0  ;;  %8912 = vmatmul.mubr.msk.f32.gmra.mrb[122].mxu0 %vm186_vm0, %v11593_v59  ;;  %9993 = vmatprep.subr.bf16.mxu1 %v11733_v61 }
 0x1f9   :  { %v5886_v8 = vsel %vm5639_vm1, %v8360_v55, -inf  ;;  %v5878_v36 = vsel %vm5639_vm1, %v3155_v56, -inf  ;;  %v3240_v16 = vpop.f32.mrb[69].mxu1  ;;  %8934 = vmatmul.mubr.msk.f32.gmra.mrb[122].mxu1 %vm186_vm0, %v11593_v59  ;;  %9979 = vmatpush3.bf16.msra.mxu0 %v11710_v22 }
 0x1fa   :  { %v5880_v21 = vmax.f32 %v5878_v36, %v5879_v47  ;;  %v5885_v9 = vsel %vm5639_vm1, %v3240_v16, -inf  ;;  %9995 = vmatpush3.bf16.msra.mxu1 %v11733_v61  ;;  %9981 = vmatprep.subr.bf16.mxu0 %v11908_v32 }
 0x1fb   :  { %v5887_v63 = vmax.f32 %v5885_v9, %v5886_v8  ;;  %v8341_v20 = vpop.f32.mrb[70].mxu0  ;;  %9997 = vmatprep.subr.bf16.mxu1 %v9984_v40  ;;  %8952 = vmatprep.mubr.msk.f32.mxu0 %vm186_vm0, %v11538_v28 }
 0x1fc   :  { %v8363_v26 = vpop.f32.mrb[70].mxu1  ;;  %v3165_v11 = vpop.f32.mrb[71].mxu0  ;;  %8974 = vmatprep.mubr.msk.f32.mxu1 %vm186_vm0, %v11538_v28  ;;  %v5883_v22 = vsel %vm5639_vm1, %v8341_v20, -inf }
 0x1fd   :  { %v5881_v13 = vsel %vm5639_vm1, %v3165_v11, -inf  ;;  %v3250_v19 = vpop.f32.mrb[71].mxu1  ;;  %9983 = vmatpush3.bf16.msra.mxu0 %v11908_v32  ;;  %v5890_v61 = vsel %vm5639_vm1, %v8363_v26, -inf }
 0x1fe   :  { %v5882_v1 = vmax.f32 %v5880_v21, %v5881_v13  ;;  %v5888_v31 = vsel %vm5639_vm1, %v3250_v19, -inf  ;;  %9999 = vmatpush3.bf16.msra.mxu1 %v9984_v40  ;;  %9985 = vmatprep.subr.bf16.mxu0 %v9984_v40 }
 0x1ff   :  { %v5889_v30 = vmax.f32 %v5887_v63, %v5888_v31  ;;  %10001 = vmatprep.subr.bf16.mxu1 %v10000_v10  ;;  %v6222_v31 = vld [vmem:[%s12237_s3] sm:$0xff] }
 0x200   :  { %v5884_v33 = vmax.f32 %v5882_v1, %v5883_v22 }
 0x201   :  { %v5891_v53 = vmax.f32 %v5889_v30, %v5890_v61  ;;  %9987 = vmatpush3.bf16.msra.mxu0 %v9984_v40 }
 0x202   :  { %v6128_v28 = vadd.f32 %v10901_v14, %v5884_v33  ;;  %10003 = vmatpush3.bf16.msra.mxu1 %v10000_v10  ;;  %10005 = vmatprep.subr.bf16.mxu0 %v11444_v18  ;;  %v6223_v18 = vld [vmem:[%s12237_s3 + $0x8] sm:$0xff] }
 0x203   :  { %v6129_v17 = vadd.f32 %v10901_v14, %v5891_v53 }
 0x204   :  { %v6192_v32 = vmax.f32 %v6128_v28, 0.0  ;;  %8953 = vmatmul.mubr.msk.f32.vlgmr.msra.gmra.mrb[124].mxu0 %vm186_vm0, %v11561_v42  ;;  %v6231_v28 = vld [vmem:[%s12237_s3 + $0x48] sm:$0xff] }
 0x205   :  { %v6193_v34 = vmax.f32 %v6129_v17, 0.0  ;;  %8975 = vmatmul.mubr.msk.f32.vlgmr.msra.gmra.mrb[124].mxu1 %vm186_vm0, %v11561_v42  ;;  %10007 = vmatpush3.bf16.msra.mxu0 %v10928_v45 }
 0x206   :  { %10009 = vmatprep.subr.bf16.mxu0 %v11512_v5  ;;  %8955 = vmatprep.mubr.msk.f32.mxu0 %vm186_vm0, %v11578_v48 }
 0x207   :  { %v8382_v52 = vpop.f32.mrb[72].mxu0  ;;  %8977 = vmatprep.mubr.msk.f32.mxu1 %vm186_vm0, %v11578_v48  ;;  %v11987_v35 = vpack.c.bf16 %v6193_v34, %v6192_v32 }
 0x208   :  { %v5893_v38 = vsel %vm5639_vm1, %v8382_v52, -inf  ;;  %v8404_v42 = vpop.f32.mrb[72].mxu1  ;;  %v3325_v24 = vpop.f32.mrb[73].mxu0  ;;  %8956 = vmatmul.mubr.msk.f32.gmra.mrb[126].mxu0 %vm186_vm0, %v11593_v59 }
 0x209   :  { %v5900_v45 = vsel %vm5639_vm1, %v8404_v42, -inf  ;;  %v5892_v5 = vsel %vm5639_vm1, %v3325_v24, -inf  ;;  %v3410_v46 = vpop.f32.mrb[73].mxu1  ;;  %8978 = vmatmul.mubr.msk.f32.gmra.mrb[126].mxu1 %vm186_vm0, %v11593_v59  ;;  %10011 = vmatpush3.bf16.msra.mxu0 %v11011_v58 }
 0x20a   :  { %v5894_v48 = vmax.f32 %v5892_v5, %v5893_v38  ;;  %v5899_v4 = vsel %vm5639_vm1, %v3410_v46, -inf  ;;  %10013 = vmatprep.subr.bf16.mxu0 %v11587_v29  ;;  %6326 = vmatprep.mubr.f32.mxu0 %v6223_v18 }
 0x20b   :  { %v5901_v7 = vmax.f32 %v5899_v4, %v5900_v45  ;;  %v8385_v44 = vpop.f32.mrb[74].mxu0  ;;  %v6230_v45 = vld [vmem:[%s12237_s3 + $0x40] sm:$0xff] }
 0x20c   :  { %v8407_v39 = vpop.f32.mrb[74].mxu1  ;;  %v3335_v60 = vpop.f32.mrb[75].mxu0  ;;  %v5897_v51 = vsel %vm5639_vm1, %v8385_v44, -inf }
 0x20d   :  { %v5895_v2 = vsel %vm5639_vm1, %v3335_v60, -inf  ;;  %v3420_v54 = vpop.f32.mrb[75].mxu1  ;;  %10015 = vmatpush3.bf16.msra.mxu0 %v11076_v0  ;;  %v5904_v59 = vsel %vm5639_vm1, %v8407_v39, -inf }
 0x20e   :  { %v5896_v58 = vmax.f32 %v5894_v48, %v5895_v2  ;;  %v5902_v15 = vsel %vm5639_vm1, %v3420_v54, -inf  ;;  %10017 = vmatprep.subr.bf16.mxu0 %v11652_v43  ;;  %v6235_v48 = vld [vmem:[%s12237_s3 + $0x68] sm:$0xff]  ;;  %v6234_v54 = vld [vmem:[%s12237_s3 + $0x60] sm:$0xff] }
 0x20f   :  { %v5903_v29 = vmax.f32 %v5901_v7, %v5902_v15 }
 0x210   :  { %v5898_v40 = vmax.f32 %v5896_v58, %v5897_v51 }
 0x211   :  { %v5905_v47 = vmax.f32 %v5903_v29, %v5904_v59  ;;  %10019 = vmatpush3.bf16.msra.mxu0 %v11136_v23 }
 0x212   :  { %v6130_v55 = vadd.f32 %v10901_v14, %v5898_v40  ;;  %10021 = vmatprep.subr.bf16.mxu0 %v11712_v25 }
 0x213   :  { %v6131_v56 = vadd.f32 %v10901_v14, %v5905_v47 }
 0x214   :  { %v6194_v57 = vmax.f32 %v6130_v55, 0.0 }
 0x215   :  { %v6195_v0 = vmax.f32 %v6131_v56, 0.0  ;;  %10023 = vmatpush3.bf16.msra.mxu0 %v11196_v27 }
 0x216   :  { %10025 = vmatprep.subr.bf16.mxu0 %v11779_v62 }
 0x217   :  { %v8426_v50 = vpop.f32.mrb[76].mxu0  ;;  %v12011_v8 = vpack.c.bf16 %v6195_v0, %v6194_v57 }
 0x218   :  { %v5907_v43 = vsel %vm5639_vm1, %v8426_v50, -inf  ;;  %v8448_v36 = vpop.f32.mrb[76].mxu1  ;;  %v3495_v16 = vpop.f32.mrb[77].mxu0 }
 0x219   :  { %v5914_v23 = vsel %vm5639_vm1, %v8448_v36, -inf  ;;  %v5906_v21 = vsel %vm5639_vm1, %v3495_v16, -inf  ;;  %v3580_v25 = vpop.f32.mrb[77].mxu1  ;;  %10027 = vmatpush3.bf16.msra.mxu0 %v11264_v6 }
 0x21a   :  { %v5908_v9 = vmax.f32 %v5906_v21, %v5907_v43  ;;  %v5913_v63 = vsel %vm5639_vm1, %v3580_v25, -inf  ;;  %10029 = vmatprep.subr.bf16.mxu0 %v11834_v12 }
 0x21b   :  { %v5915_v27 = vmax.f32 %v5913_v63, %v5914_v23  ;;  %v8429_v62 = vpop.f32.mrb[78].mxu0 }
 0x21c   :  { %v8451_v20 = vpop.f32.mrb[78].mxu1  ;;  %v3505_v10 = vpop.f32.mrb[79].mxu0  ;;  %v5911_v26 = vsel %vm5639_vm1, %v8429_v62, -inf }
 0x21d   :  { %v5909_v11 = vsel %vm5639_vm1, %v3505_v10, -inf  ;;  %v3590_v22 = vpop.f32.mrb[79].mxu1  ;;  %10031 = vmatpush3.bf16.msra.mxu0 %v11324_v49  ;;  %v5918_v13 = vsel %vm5639_vm1, %v8451_v20, -inf  ;;  %v6227_v49 = vld [vmem:[%s12237_s3 + $0x28] sm:$0xff] }
 0x21e   :  { %v5910_v19 = vmax.f32 %v5908_v9, %v5909_v11  ;;  %v5916_v6 = vsel %vm5639_vm1, %v3590_v22, -inf  ;;  %10033 = vmatprep.subr.bf16.mxu0 %v11888_v3 }
 0x21f   :  { %v5917_v61 = vmax.f32 %v5915_v27, %v5916_v6 }
 0x220   :  { %v5912_v12 = vmax.f32 %v5910_v19, %v5911_v26 }
 0x221   :  { %v5919_v1 = vmax.f32 %v5917_v61, %v5918_v13  ;;  %10035 = vmatpush3.bf16.msra.mxu0 %v11384_v37  ;;  %v6226_v37 = vld [vmem:[%s12237_s3 + $0x20] sm:$0xff] }
 0x222   :  { %v6132_v30 = vadd.f32 %v10901_v14, %v5912_v12 }
 0x223   :  { %v6133_v33 = vadd.f32 %v10901_v14, %v5919_v1 }
 0x224   :  { %v6196_v53 = vmax.f32 %v6132_v30, 0.0  ;;  %6327 = vmatmul.mubr.f32.vlgmr.msra.gmra.mrb[128].mxu0 %v6222_v31 }
 0x225   :  { %v6197_v3 = vmax.f32 %v6133_v33, 0.0  ;;  %6331 = vmatprep.mubr.f32.mxu0 %v6227_v49 }
 0x227   :  { %v8470_v17 = vpop.f32.mrb[80].mxu0  ;;  %v12040_v32 = vpack.c.bf16 %v6197_v3, %v6196_v53 }
 0x228   :  { %v5921_v34 = vsel %vm5639_vm1, %v8470_v17, -inf  ;;  %v8492_v52 = vpop.f32.mrb[80].mxu1  ;;  %v3665_v18 = vpop.f32.mrb[81].mxu0  ;;  %6332 = vmatmul.mubr.f32.gmra.mrb[130].mxu0 %v6226_v37 }
 0x229   :  { %v5928_v38 = vsel %vm5639_vm1, %v8492_v52, -inf  ;;  %v5920_v42 = vsel %vm5639_vm1, %v3665_v18, -inf  ;;  %v3750_v24 = vpop.f32.mrb[81].mxu1  ;;  %6336 = vmatprep.mubr.f32.mxu0 %v6231_v28 }
 0x22a   :  { %v5922_v5 = vmax.f32 %v5920_v42, %v5921_v34  ;;  %v5927_v46 = vsel %vm5639_vm1, %v3750_v24, -inf }
 0x22b   :  { %v5929_v4 = vmax.f32 %v5927_v46, %v5928_v38  ;;  %v8473_v7 = vpop.f32.mrb[82].mxu0 }
 0x22c   :  { %v8495_v44 = vpop.f32.mrb[82].mxu1  ;;  %v3675_v39 = vpop.f32.mrb[83].mxu0  ;;  %6337 = vmatmul.mubr.f32.gmra.mrb[132].mxu0 %v6230_v45  ;;  %v5925_v60 = vsel %vm5639_vm1, %v8473_v7, -inf }
 0x22d   :  { %v5923_v51 = vsel %vm5639_vm1, %v3675_v39, -inf  ;;  %v3760_v2 = vpop.f32.mrb[83].mxu1  ;;  %6341 = vmatprep.mubr.f32.mxu0 %v6235_v48  ;;  %v5932_v59 = vsel %vm5639_vm1, %v8495_v44, -inf }
 0x22e   :  { %v5924_v58 = vmax.f32 %v5922_v5, %v5923_v51  ;;  %v5930_v15 = vsel %vm5639_vm1, %v3760_v2, -inf }
 0x22f   :  { %v5931_v29 = vmax.f32 %v5929_v4, %v5930_v15 }
 0x230   :  { %v5926_v40 = vmax.f32 %v5924_v58, %v5925_v60  ;;  %6342 = vmatmul.mubr.f32.gmra.mrb[134].mxu0 %v6234_v54 }
 0x231   :  { %v5933_v47 = vmax.f32 %v5931_v29, %v5932_v59 }
 0x232   :  { %v6134_v55 = vadd.f32 %v10901_v14, %v5926_v40 }
 0x233   :  { %v6135_v56 = vadd.f32 %v10901_v14, %v5933_v47 }
 0x234   :  { %v6198_v57 = vmax.f32 %v6134_v55, 0.0 }
 0x235   :  { %v6199_v0 = vmax.f32 %v6135_v56, 0.0 }
 0x237   :  { %v8514_v50 = vpop.f32.mrb[84].mxu0  ;;  %v12061_v43 = vpack.c.bf16 %v6199_v0, %v6198_v57 }
 0x238   :  { %v5935_v36 = vsel %vm5639_vm1, %v8514_v50, -inf  ;;  %v8536_v16 = vpop.f32.mrb[84].mxu1  ;;  %v3835_v23 = vpop.f32.mrb[85].mxu0 }
 0x239   :  { %v5942_v21 = vsel %vm5639_vm1, %v8536_v16, -inf  ;;  %v5934_v25 = vsel %vm5639_vm1, %v3835_v23, -inf  ;;  %v3920_v9 = vpop.f32.mrb[85].mxu1 }
 0x23a   :  { %v5936_v63 = vmax.f32 %v5934_v25, %v5935_v36  ;;  %v5941_v27 = vsel %vm5639_vm1, %v3920_v9, -inf }
 0x23b   :  { %v5943_v62 = vmax.f32 %v5941_v27, %v5942_v21  ;;  %v8517_v20 = vpop.f32.mrb[86].mxu0 }
 0x23c   :  { %v8539_v10 = vpop.f32.mrb[86].mxu1  ;;  %v3845_v26 = vpop.f32.mrb[87].mxu0  ;;  %v5939_v11 = vsel %vm5639_vm1, %v8517_v20, -inf }
 0x23d   :  { %v5937_v22 = vsel %vm5639_vm1, %v3845_v26, -inf  ;;  %v3930_v13 = vpop.f32.mrb[87].mxu1  ;;  %v5946_v19 = vsel %vm5639_vm1, %v8539_v10, -inf }
 0x23e   :  { %v5938_v6 = vmax.f32 %v5936_v63, %v5937_v22  ;;  %v5944_v61 = vsel %vm5639_vm1, %v3930_v13, -inf }
 0x23f   :  { %v5945_v12 = vmax.f32 %v5943_v62, %v5944_v61 }
 0x240   :  { %v5940_v1 = vmax.f32 %v5938_v6, %v5939_v11 }
 0x241   :  { %v5947_v31 = vmax.f32 %v5945_v12, %v5946_v19 }
 0x242   :  { %v6136_v30 = vadd.f32 %v10901_v14, %v5940_v1 }
 0x243   :  { %v6137_v49 = vadd.f32 %v10901_v14, %v5947_v31 }
 0x244   :  { %v6200_v33 = vmax.f32 %v6136_v30, 0.0 }
 0x245   :  { %v6201_v53 = vmax.f32 %v6137_v49, 0.0 }
 0x247   :  { %v8558_v3 = vpop.f32.mrb[88].mxu0  ;;  %v12073_v37 = vpack.c.bf16 %v6201_v53, %v6200_v33 }
 0x248   :  { %v5949_v28 = vsel %vm5639_vm1, %v8558_v3, -inf  ;;  %v8580_v17 = vpop.f32.mrb[88].mxu1  ;;  %v4005_v34 = vpop.f32.mrb[89].mxu0 }
 0x249   :  { %v5956_v52 = vsel %vm5639_vm1, %v8580_v17, -inf  ;;  %v5948_v18 = vsel %vm5639_vm1, %v4005_v34, -inf  ;;  %v4090_v38 = vpop.f32.mrb[89].mxu1 }
 0x24a   :  { %v5950_v42 = vmax.f32 %v5948_v18, %v5949_v28  ;;  %v5955_v24 = vsel %vm5639_vm1, %v4090_v38, -inf  ;;  %v6225_v38 = vld [vmem:[%s12237_s3 + $0x18] sm:$0xff] }
 0x24b   :  { %v5957_v45 = vmax.f32 %v5955_v24, %v5956_v52  ;;  %v8561_v5 = vpop.f32.mrb[90].mxu0  ;;  %6411 = vmatprep.mubr.f32.mxu1 %v6225_v38 }
 0x24c   :  { %v8583_v46 = vpop.f32.mrb[90].mxu1  ;;  %v4015_v48 = vpop.f32.mrb[91].mxu0  ;;  %v5953_v4 = vsel %vm5639_vm1, %v8561_v5, -inf }
 0x24d   :  { %v5951_v7 = vsel %vm5639_vm1, %v4015_v48, -inf  ;;  %v4100_v44 = vpop.f32.mrb[91].mxu1  ;;  %v5960_v39 = vsel %vm5639_vm1, %v8583_v46, -inf }
 0x24e   :  { %v5952_v60 = vmax.f32 %v5950_v42, %v5951_v7  ;;  %v5958_v51 = vsel %vm5639_vm1, %v4100_v44, -inf }
 0x24f   :  { %v5959_v2 = vmax.f32 %v5957_v45, %v5958_v51 }
 0x250   :  { %v5954_v54 = vmax.f32 %v5952_v60, %v5953_v4 }
 0x251   :  { %v5961_v59 = vmax.f32 %v5959_v2, %v5960_v39 }
 0x252   :  { %v6138_v58 = vadd.f32 %v10901_v14, %v5954_v54 }
 0x253   :  { %v6139_v15 = vadd.f32 %v10901_v14, %v5961_v59 }
 0x254   :  { %v6202_v29 = vmax.f32 %v6138_v58, 0.0 }
 0x255   :  { %v6203_v40 = vmax.f32 %v6139_v15, 0.0 }
 0x257   :  { %v8602_v47 = vpop.f32.mrb[92].mxu0  ;;  %v12085_v55 = vpack.c.bf16 %v6203_v40, %v6202_v29 }
 0x258   :  { %v5963_v56 = vsel %vm5639_vm1, %v8602_v47, -inf  ;;  %v8624_v57 = vpop.f32.mrb[92].mxu1  ;;  %v4175_v0 = vpop.f32.mrb[93].mxu0 }
 0x259   :  { %v5970_v50 = vsel %vm5639_vm1, %v8624_v57, -inf  ;;  %v5962_v36 = vsel %vm5639_vm1, %v4175_v0, -inf  ;;  %v4260_v16 = vpop.f32.mrb[93].mxu1 }
 0x25a   :  { %v5964_v23 = vmax.f32 %v5962_v36, %v5963_v56  ;;  %v5969_v21 = vsel %vm5639_vm1, %v4260_v16, -inf }
 0x25b   :  { %v5971_v25 = vmax.f32 %v5969_v21, %v5970_v50  ;;  %v8605_v9 = vpop.f32.mrb[94].mxu0 }
 0x25c   :  { %v8627_v63 = vpop.f32.mrb[94].mxu1  ;;  %v4185_v27 = vpop.f32.mrb[95].mxu0  ;;  %v5967_v62 = vsel %vm5639_vm1, %v8605_v9, -inf }
 0x25d   :  { %v5965_v20 = vsel %vm5639_vm1, %v4185_v27, -inf  ;;  %v4270_v10 = vpop.f32.mrb[95].mxu1  ;;  %v5974_v26 = vsel %vm5639_vm1, %v8627_v63, -inf }
 0x25e   :  { %v5966_v11 = vmax.f32 %v5964_v23, %v5965_v20  ;;  %v5972_v22 = vsel %vm5639_vm1, %v4270_v10, -inf }
 0x25f   :  { %v5973_v13 = vmax.f32 %v5971_v25, %v5972_v22 }
 0x260   :  { %v5968_v19 = vmax.f32 %v5966_v11, %v5967_v62 }
 0x261   :  { %v5975_v6 = vmax.f32 %v5973_v13, %v5974_v26 }
 0x262   :  { %v6140_v61 = vadd.f32 %v10901_v14, %v5968_v19 }
 0x263   :  { %v6141_v12 = vadd.f32 %v10901_v14, %v5975_v6 }
 0x264   :  { %v6204_v1 = vmax.f32 %v6140_v61, 0.0 }
 0x265   :  { %v6205_v31 = vmax.f32 %v6141_v12, 0.0 }
 0x267   :  { %v8646_v30 = vpop.f32.mrb[96].mxu0  ;;  %v12097_v49 = vpack.c.bf16 %v6205_v31, %v6204_v1 }
 0x268   :  { %v5977_v33 = vsel %vm5639_vm1, %v8646_v30, -inf  ;;  %v8668_v53 = vpop.f32.mrb[96].mxu1  ;;  %v4345_v3 = vpop.f32.mrb[97].mxu0  ;;  %v6239_v30 = vld [vmem:[%s12236_s4 + $0x8] sm:$0xff] }
 0x269   :  { %v5984_v28 = vsel %vm5639_vm1, %v8668_v53, -inf  ;;  %v5976_v17 = vsel %vm5639_vm1, %v4345_v3, -inf  ;;  %v4430_v34 = vpop.f32.mrb[97].mxu1  ;;  %6249 = vperm.xlu1 %10070, %v6239_v30  }
 0x26a   :  { %v5978_v52 = vmax.f32 %v5976_v17, %v5977_v33  ;;  %v5983_v18 = vsel %vm5639_vm1, %v4430_v34, -inf }
 0x26b   :  { %v5985_v42 = vmax.f32 %v5983_v18, %v5984_v28  ;;  %v8649_v24 = vpop.f32.mrb[98].mxu0 }
 0x26c   :  { %v8671_v45 = vpop.f32.mrb[98].mxu1  ;;  %v4355_v5 = vpop.f32.mrb[99].mxu0  ;;  %v5981_v46 = vsel %vm5639_vm1, %v8649_v24, -inf }
 0x26d   :  { %v5979_v48 = vsel %vm5639_vm1, %v4355_v5, -inf  ;;  %v4440_v4 = vpop.f32.mrb[99].mxu1  ;;  %v5988_v7 = vsel %vm5639_vm1, %v8671_v45, -inf }
 0x26e   :  { %v5980_v44 = vmax.f32 %v5978_v52, %v5979_v48  ;;  %v5986_v39 = vsel %vm5639_vm1, %v4440_v4, -inf  ;;  %v6240_v52 = vld [vmem:[%s12236_s4 + $0x10] sm:$0xff] }
 0x26f   :  { %v5987_v60 = vmax.f32 %v5985_v42, %v5986_v39  ;;  %6254 = vperm.xlu1 %10070, %v6240_v52  }
 0x270   :  { %v5982_v51 = vmax.f32 %v5980_v44, %v5981_v46 }
 0x271   :  { %v5989_v2 = vmax.f32 %v5987_v60, %v5988_v7 }
 0x272   :  { %v6142_v54 = vadd.f32 %v10901_v14, %v5982_v51 }
 0x273   :  { %v6143_v59 = vadd.f32 %v10901_v14, %v5989_v2 }
 0x274   :  { %v6206_v58 = vmax.f32 %v6142_v54, 0.0 }
 0x275   :  { %v6207_v15 = vmax.f32 %v6143_v59, 0.0 }
 0x277   :  { %v8690_v29 = vpop.f32.mrb[100].mxu0  ;;  %v10036_v40 = vpack.c.bf16 %v6207_v15, %v6206_v58 }
 0x278   :  { %v5991_v47 = vsel %vm5639_vm1, %v8690_v29, -inf  ;;  %v8712_v56 = vpop.f32.mrb[100].mxu1  ;;  %v4515_v57 = vpop.f32.mrb[101].mxu0 }
 0x279   :  { %v5998_v0 = vsel %vm5639_vm1, %v8712_v56, -inf  ;;  %v5990_v50 = vsel %vm5639_vm1, %v4515_v57, -inf  ;;  %v4600_v36 = vpop.f32.mrb[101].mxu1  ;;  %10037 = vmatprep.subr.bf16.mxu1 %v10036_v40 }
 0x27a   :  { %v5992_v16 = vmax.f32 %v5990_v50, %v5991_v47  ;;  %v5997_v23 = vsel %vm5639_vm1, %v4600_v36, -inf  ;;  %10039 = vmatpush3.bf16.msra.mxu1 %v11942_v41 }
 0x27b   :  { %v5999_v21 = vmax.f32 %v5997_v23, %v5998_v0  ;;  %v8693_v25 = vpop.f32.mrb[102].mxu0 }
 0x27c   :  { %v8715_v9 = vpop.f32.mrb[102].mxu1  ;;  %v4525_v63 = vpop.f32.mrb[103].mxu0  ;;  %v5995_v27 = vsel %vm5639_vm1, %v8693_v25, -inf }
 0x27d   :  { %v5993_v62 = vsel %vm5639_vm1, %v4525_v63, -inf  ;;  %v4610_v20 = vpop.f32.mrb[103].mxu1  ;;  %v6002_v10 = vsel %vm5639_vm1, %v8715_v9, -inf }
 0x27e   :  { %v5994_v26 = vmax.f32 %v5992_v16, %v5993_v62  ;;  %v6000_v11 = vsel %vm5639_vm1, %v4610_v20, -inf }
 0x27f   :  { %v6001_v22 = vmax.f32 %v5999_v21, %v6000_v11 }
 0x280   :  { %v5996_v13 = vmax.f32 %v5994_v26, %v5995_v27 }
 0x281   :  { %v6003_v19 = vmax.f32 %v6001_v22, %v6002_v10 }
 0x282   :  { %v6144_v6 = vadd.f32 %v10901_v14, %v5996_v13 }
 0x283   :  { %v6145_v41 = vadd.f32 %v10901_v14, %v6003_v19 }
 0x284   :  { %v6208_v61 = vmax.f32 %v6144_v6, 0.0 }
 0x285   :  { %v6209_v12 = vmax.f32 %v6145_v41, 0.0 }
 0x287   :  { %v8734_v1 = vpop.f32.mrb[104].mxu0  ;;  %v10040_v31 = vpack.c.bf16 %v6209_v12, %v6208_v61 }
 0x288   :  { %v6005_v33 = vsel %vm5639_vm1, %v8734_v1, -inf  ;;  %v8756_v53 = vpop.f32.mrb[104].mxu1  ;;  %v4685_v3 = vpop.f32.mrb[105].mxu0 }
 0x289   :  { %v6012_v28 = vsel %vm5639_vm1, %v8756_v53, -inf  ;;  %v6004_v17 = vsel %vm5639_vm1, %v4685_v3, -inf  ;;  %v4770_v34 = vpop.f32.mrb[105].mxu1  ;;  %10041 = vmatprep.subr.bf16.mxu1 %v10040_v31 }
 0x28a   :  { %v6006_v18 = vmax.f32 %v6004_v17, %v6005_v33  ;;  %v6011_v38 = vsel %vm5639_vm1, %v4770_v34, -inf  ;;  %10043 = vmatpush3.bf16.msra.mxu1 %v11987_v35 }
 0x28b   :  { %v6013_v42 = vmax.f32 %v6011_v38, %v6012_v28  ;;  %v8737_v24 = vpop.f32.mrb[106].mxu0 }
 0x28c   :  { %v8759_v45 = vpop.f32.mrb[106].mxu1  ;;  %v4695_v5 = vpop.f32.mrb[107].mxu0  ;;  %v6009_v46 = vsel %vm5639_vm1, %v8737_v24, -inf }
 0x28d   :  { %v6007_v48 = vsel %vm5639_vm1, %v4695_v5, -inf  ;;  %v4780_v4 = vpop.f32.mrb[107].mxu1  ;;  %v6016_v7 = vsel %vm5639_vm1, %v8759_v45, -inf }
 0x28e   :  { %v6008_v44 = vmax.f32 %v6006_v18, %v6007_v48  ;;  %v6014_v39 = vsel %vm5639_vm1, %v4780_v4, -inf }
 0x28f   :  { %v6015_v60 = vmax.f32 %v6013_v42, %v6014_v39 }
 0x290   :  { %v6010_v51 = vmax.f32 %v6008_v44, %v6009_v46 }
 0x291   :  { %v6017_v2 = vmax.f32 %v6015_v60, %v6016_v7 }
 0x292   :  { %v6146_v35 = vadd.f32 %v10901_v14, %v6010_v51 }
 0x293   :  { %v6147_v54 = vadd.f32 %v10901_v14, %v6017_v2 }
 0x294   :  { %v6210_v59 = vmax.f32 %v6146_v35, 0.0 }
 0x295   :  { %v6211_v58 = vmax.f32 %v6147_v54, 0.0 }
 0x297   :  { %v8778_v15 = vpop.f32.mrb[108].mxu0  ;;  %v10044_v29 = vpack.c.bf16 %v6211_v58, %v6210_v59 }
 0x298   :  { %v6019_v40 = vsel %vm5639_vm1, %v8778_v15, -inf  ;;  %v8800_v47 = vpop.f32.mrb[108].mxu1  ;;  %v4855_v56 = vpop.f32.mrb[109].mxu0 }
 0x299   :  { %v6026_v57 = vsel %vm5639_vm1, %v8800_v47, -inf  ;;  %v6018_v0 = vsel %vm5639_vm1, %v4855_v56, -inf  ;;  %v4940_v50 = vpop.f32.mrb[109].mxu1  ;;  %10045 = vmatprep.subr.bf16.mxu1 %v10044_v29 }
 0x29a   :  { %v6020_v36 = vmax.f32 %v6018_v0, %v6019_v40  ;;  %v6025_v16 = vsel %vm5639_vm1, %v4940_v50, -inf  ;;  %10047 = vmatpush3.bf16.msra.mxu1 %v12011_v8 }
 0x29b   :  { %v6027_v23 = vmax.f32 %v6025_v16, %v6026_v57  ;;  %v8781_v21 = vpop.f32.mrb[110].mxu0 }
 0x29c   :  { %v8803_v25 = vpop.f32.mrb[110].mxu1  ;;  %v4865_v9 = vpop.f32.mrb[111].mxu0  ;;  %v6023_v63 = vsel %vm5639_vm1, %v8781_v21, -inf }
 0x29d   :  { %v6021_v27 = vsel %vm5639_vm1, %v4865_v9, -inf  ;;  %v4950_v62 = vpop.f32.mrb[111].mxu1  ;;  %v6030_v20 = vsel %vm5639_vm1, %v8803_v25, -inf }
 0x29e   :  { %v6022_v10 = vmax.f32 %v6020_v36, %v6021_v27  ;;  %v6028_v26 = vsel %vm5639_vm1, %v4950_v62, -inf }
 0x29f   :  { %v6029_v11 = vmax.f32 %v6027_v23, %v6028_v26 }
 0x2a0   :  { %v6024_v22 = vmax.f32 %v6022_v10, %v6023_v63 }
 0x2a1   :  { %v6031_v13 = vmax.f32 %v6029_v11, %v6030_v20 }
 0x2a2   :  { %v6148_v19 = vadd.f32 %v10901_v14, %v6024_v22 }
 0x2a3   :  { %v6149_v8 = vadd.f32 %v10901_v14, %v6031_v13 }
 0x2a4   :  { %v6212_v6 = vmax.f32 %v6148_v19, 0.0 }
 0x2a5   :  { %v6213_v41 = vmax.f32 %v6149_v8, 0.0 }
 0x2a7   :  { %v8822_v61 = vpop.f32.mrb[112].mxu0  ;;  %v10048_v12 = vpack.c.bf16 %v6213_v41, %v6212_v6 }
 0x2a8   :  { %v6033_v1 = vsel %vm5639_vm1, %v8822_v61, -inf  ;;  %v8844_v31 = vpop.f32.mrb[112].mxu1  ;;  %v5025_v30 = vpop.f32.mrb[113].mxu0 }
 0x2a9   :  { %v6040_v33 = vsel %vm5639_vm1, %v8844_v31, -inf  ;;  %v6032_v53 = vsel %vm5639_vm1, %v5025_v30, -inf  ;;  %v5110_v3 = vpop.f32.mrb[113].mxu1  ;;  %10049 = vmatprep.subr.bf16.mxu1 %v10048_v12 }
 0x2aa   :  { %v6034_v28 = vmax.f32 %v6032_v53, %v6033_v1  ;;  %v6039_v17 = vsel %vm5639_vm1, %v5110_v3, -inf  ;;  %10051 = vmatpush3.bf16.msra.mxu1 %v12040_v32 }
 0x2ab   :  { %v6041_v34 = vmax.f32 %v6039_v17, %v6040_v33  ;;  %v8825_v52 = vpop.f32.mrb[114].mxu0 }
 0x2ac   :  { %v8847_v18 = vpop.f32.mrb[114].mxu1  ;;  %v5035_v38 = vpop.f32.mrb[115].mxu0  ;;  %v6037_v42 = vsel %vm5639_vm1, %v8825_v52, -inf }
 0x2ad   :  { %v6035_v24 = vsel %vm5639_vm1, %v5035_v38, -inf  ;;  %v5120_v45 = vpop.f32.mrb[115].mxu1  ;;  %v6044_v5 = vsel %vm5639_vm1, %v8847_v18, -inf }
 0x2ae   :  { %v6036_v46 = vmax.f32 %v6034_v28, %v6035_v24  ;;  %v6042_v48 = vsel %vm5639_vm1, %v5120_v45, -inf }
 0x2af   :  { %v6043_v4 = vmax.f32 %v6041_v34, %v6042_v48 }
 0x2b0   :  { %v6038_v7 = vmax.f32 %v6036_v46, %v6037_v42 }
 0x2b1   :  { %v6045_v44 = vmax.f32 %v6043_v4, %v6044_v5 }
 0x2b2   :  { %v6150_v39 = vadd.f32 %v10901_v14, %v6038_v7 }
 0x2b3   :  { %v6151_v32 = vadd.f32 %v10901_v14, %v6045_v44 }
 0x2b4   :  { %v6214_v60 = vmax.f32 %v6150_v39, 0.0 }
 0x2b5   :  { %v6215_v51 = vmax.f32 %v6151_v32, 0.0 }
 0x2b7   :  { %v8866_v2 = vpop.f32.mrb[116].mxu0  ;;  %v10052_v35 = vpack.c.bf16 %v6215_v51, %v6214_v60 }
 0x2b8   :  { %v6047_v54 = vsel %vm5639_vm1, %v8866_v2, -inf  ;;  %v8888_v59 = vpop.f32.mrb[116].mxu1  ;;  %v5195_v58 = vpop.f32.mrb[117].mxu0 }
 0x2b9   :  { %v6054_v15 = vsel %vm5639_vm1, %v8888_v59, -inf  ;;  %v6046_v29 = vsel %vm5639_vm1, %v5195_v58, -inf  ;;  %v5280_v40 = vpop.f32.mrb[117].mxu1  ;;  %10053 = vmatprep.subr.bf16.mxu1 %v10052_v35 }
 0x2ba   :  { %v6048_v47 = vmax.f32 %v6046_v29, %v6047_v54  ;;  %v6053_v56 = vsel %vm5639_vm1, %v5280_v40, -inf  ;;  %10055 = vmatpush3.bf16.msra.mxu1 %v12061_v43 }
 0x2bb   :  { %v6055_v57 = vmax.f32 %v6053_v56, %v6054_v15  ;;  %v8869_v0 = vpop.f32.mrb[118].mxu0 }
 0x2bc   :  { %v8891_v50 = vpop.f32.mrb[118].mxu1  ;;  %v5205_v36 = vpop.f32.mrb[119].mxu0  ;;  %v6051_v16 = vsel %vm5639_vm1, %v8869_v0, -inf }
 0x2bd   :  { %v6049_v23 = vsel %vm5639_vm1, %v5205_v36, -inf  ;;  %v5290_v21 = vpop.f32.mrb[119].mxu1  ;;  %v6058_v25 = vsel %vm5639_vm1, %v8891_v50, -inf }
 0x2be   :  { %v6050_v9 = vmax.f32 %v6048_v47, %v6049_v23  ;;  %v6056_v63 = vsel %vm5639_vm1, %v5290_v21, -inf }
 0x2bf   :  { %v6057_v27 = vmax.f32 %v6055_v57, %v6056_v63 }
 0x2c0   :  { %v6052_v62 = vmax.f32 %v6050_v9, %v6051_v16 }
 0x2c1   :  { %v6059_v20 = vmax.f32 %v6057_v27, %v6058_v25  ;;  %v6224_v27 = vld [vmem:[%s12237_s3 + $0x10] sm:$0xff] }
 0x2c2   :  { %v6152_v10 = vadd.f32 %v10901_v14, %v6052_v62  ;;  %v6229_v62 = vld [vmem:[%s12237_s3 + $0x38] sm:$0xff] }
 0x2c3   :  { %v6153_v43 = vadd.f32 %v10901_v14, %v6059_v20  ;;  %v6233_v20 = vld [vmem:[%s12237_s3 + $0x58] sm:$0xff] }
 0x2c4   :  { %v6216_v26 = vmax.f32 %v6152_v10, 0.0  ;;  %v6237_v10 = vld [vmem:[%s12237_s3 + $0x78] sm:$0xff] }
 0x2c5   :  { %v6217_v11 = vmax.f32 %v6153_v43, 0.0  ;;  %v6236_v43 = vld [vmem:[%s12237_s3 + $0x70] sm:$0xff] }
 0x2c7   :  { %v8910_v22 = vpop.f32.mrb[120].mxu0  ;;  %v10056_v13 = vpack.c.bf16 %v6217_v11, %v6216_v26 }
 0x2c8   :  { %v6061_v19 = vsel %vm5639_vm1, %v8910_v22, -inf  ;;  %v8932_v8 = vpop.f32.mrb[120].mxu1  ;;  %v5365_v6 = vpop.f32.mrb[121].mxu0 }
 0x2c9   :  { %v6068_v41 = vsel %vm5639_vm1, %v8932_v8, -inf  ;;  %v6060_v61 = vsel %vm5639_vm1, %v5365_v6, -inf  ;;  %v5450_v12 = vpop.f32.mrb[121].mxu1  ;;  %10057 = vmatprep.subr.bf16.mxu1 %v10056_v13 }
 0x2ca   :  { %v6062_v1 = vmax.f32 %v6060_v61, %v6061_v19  ;;  %v6067_v31 = vsel %vm5639_vm1, %v5450_v12, -inf  ;;  %10059 = vmatpush3.bf16.msra.mxu1 %v12073_v37 }
 0x2cb   :  { %v6069_v30 = vmax.f32 %v6067_v31, %v6068_v41  ;;  %v8913_v33 = vpop.f32.mrb[122].mxu0 }
 0x2cc   :  { %v8935_v53 = vpop.f32.mrb[122].mxu1  ;;  %v5375_v3 = vpop.f32.mrb[123].mxu0  ;;  %v6065_v28 = vsel %vm5639_vm1, %v8913_v33, -inf }
 0x2cd   :  { %v6063_v17 = vsel %vm5639_vm1, %v5375_v3, -inf  ;;  %v5460_v34 = vpop.f32.mrb[123].mxu1  ;;  %v6072_v52 = vsel %vm5639_vm1, %v8935_v53, -inf  ;;  %v6245_v53 = vpop.permute.xlu0 %6244 }
 0x2ce   :  { %v6064_v18 = vmax.f32 %v6062_v1, %v6063_v17  ;;  %v6070_v38 = vsel %vm5639_vm1, %v5460_v34, -inf }
 0x2cf   :  { %v6071_v42 = vmax.f32 %v6069_v30, %v6070_v38 }
 0x2d0   :  { %v6066_v24 = vmax.f32 %v6064_v18, %v6065_v28 }
 0x2d1   :  { %v6073_v45 = vmax.f32 %v6071_v42, %v6072_v52 }
 0x2d2   :  { %v6154_v5 = vadd.f32 %v10901_v14, %v6066_v24 }
 0x2d3   :  { %v6155_v37 = vadd.f32 %v10901_v14, %v6073_v45 }
 0x2d4   :  { %v6218_v46 = vmax.f32 %v6154_v5, 0.0 }
 0x2d5   :  { %v6219_v48 = vmax.f32 %v6155_v37, 0.0 }
 0x2d7   :  { %v8954_v4 = vpop.f32.mrb[124].mxu0  ;;  %v10060_v7 = vpack.c.bf16 %v6219_v48, %v6218_v46 }
 0x2d8   :  { %v6075_v44 = vsel %vm5639_vm1, %v8954_v4, -inf  ;;  %v8976_v39 = vpop.f32.mrb[124].mxu1  ;;  %v5535_v32 = vpop.f32.mrb[125].mxu0 }
 0x2d9   :  { %v6082_v60 = vsel %vm5639_vm1, %v8976_v39, -inf  ;;  %v6074_v51 = vsel %vm5639_vm1, %v5535_v32, -inf  ;;  %v5620_v2 = vpop.f32.mrb[125].mxu1  ;;  %10061 = vmatprep.subr.bf16.mxu1 %v10060_v7  ;;  %v6260_v32 = vpop.permute.xlu0 %6259 }
 0x2da   :  { %v6076_v35 = vmax.f32 %v6074_v51, %v6075_v44  ;;  %v6081_v54 = vsel %vm5639_vm1, %v5620_v2, -inf  ;;  %10063 = vmatpush3.bf16.msra.mxu1 %v12085_v55 }
 0x2db   :  { %v6083_v59 = vmax.f32 %v6081_v54, %v6082_v60  ;;  %v8957_v58 = vpop.f32.mrb[126].mxu0 }
 0x2dc   :  { %v8979_v15 = vpop.f32.mrb[126].mxu1  ;;  %v5545_v29 = vpop.f32.mrb[127].mxu0  ;;  %v6079_v0 = vsel %vm5639_vm1, %v8957_v58, -inf }
 0x2dd   :  { %v6077_v40 = vsel %vm5639_vm1, %v5545_v29, -inf  ;;  %v5630_v47 = vpop.f32.mrb[127].mxu1  ;;  %v6086_v36 = vsel %vm5639_vm1, %v8979_v15, -inf }
 0x2de   :  { %v6078_v56 = vmax.f32 %v6076_v35, %v6077_v40  ;;  %v6084_v57 = vsel %vm5639_vm1, %v5630_v47, -inf }
 0x2df   :  { %v6085_v50 = vmax.f32 %v6083_v59, %v6084_v57 }
 0x2e0   :  { %v6080_v16 = vmax.f32 %v6078_v56, %v6079_v0 }
 0x2e1   :  { %v6087_v23 = vmax.f32 %v6085_v50, %v6086_v36 }
 0x2e2   :  { %v6156_v21 = vadd.f32 %v10901_v14, %v6080_v16 }
 0x2e3   :  { %v6157_v55 = vadd.f32 %v10901_v14, %v6087_v23  ;;  %v6228_v14 = vld [vmem:[%s12237_s3 + $0x30] sm:$0xff] }
 0x2e4   :  { %v6220_v25 = vmax.f32 %v6156_v21, 0.0 }
 0x2e5   :  { %v6221_v9 = vmax.f32 %v6157_v55, 0.0 }
 0x2e7   :  { %v10064_v63 = vpack.c.bf16 %v6221_v9, %v6220_v25 }
 0x2e8   :  { %v6250_v30 = vpop.permute.xlu1 %6249 }
 0x2e9   :  { %10065 = vmatprep.subr.bf16.mxu1 %v10064_v63 }
 0x2ea   :  { %10067 = vmatpush3.bf16.msra.mxu1 %v12097_v49  ;;  %v6232_v49 = vld [vmem:[%s12237_s3 + $0x50] sm:$0xff] }
 0x2ed   :  { %6412 = vmatmul.mubr.f32.vlgmr.msra.gmra.mrb[128].mxu1 %v6224_v27 }
 0x2ee   :  { %6416 = vmatprep.mubr.f32.mxu1 %v6229_v62  ;;  %v6255_v42 = vpop.permute.xlu1 %6254 }
 0x2f1   :  { %6417 = vmatmul.mubr.f32.gmra.mrb[130].mxu1 %v6228_v14 }
 0x2f2   :  { %6421 = vmatprep.mubr.f32.mxu1 %v6233_v20 }
 0x2f5   :  { %6422 = vmatmul.mubr.f32.gmra.mrb[132].mxu1 %v6232_v49 }
 0x2f6   :  { %6426 = vmatprep.mubr.f32.mxu1 %v6237_v10 }
 0x2f7   :  { %v7516_v26 = vpop.f32.mrb[128].mxu0 }
 0x2f8   :  { %v7517_v11 = vpop.f32.mrb[129].mxu0 }
 0x2f9   :  { %v7518_v22 = vadd.f32 %v7517_v11, %v7516_v26  ;;  %6427 = vmatmul.mubr.f32.gmra.mrb[134].mxu1 %v6236_v43 }
 0x2fb   :  { %v7519_v13 = vpop.f32.mrb[130].mxu0  ;;  %v6329_v28 = vadd.f32 %v7518_v22, %v6245_v53 }
 0x2fc   :  { %v7520_v19 = vpop.f32.mrb[131].mxu0 }
 0x2fd   :  { %v7521_v8 = vadd.f32 %v7520_v19, %v7519_v13 }
 0x2ff   :  { %v7522_v6 = vpop.f32.mrb[132].mxu0  ;;  %v6334_v52 = vadd.f32 %v7521_v8, %v6250_v30 }
 0x300   :  { %v7523_v41 = vpop.f32.mrb[133].mxu0 }
 0x301   :  { %v7524_v61 = vadd.f32 %v7523_v41, %v7522_v6 }
 0x303   :  { %v7525_v12 = vpop.f32.mrb[134].mxu0  ;;  %v6339_v46 = vadd.f32 %v7524_v61, %v6255_v42 }
 0x304   :  { %v7526_v1 = vpop.f32.mrb[135].mxu0 }
 0x305   :  { %v7527_v31 = vadd.f32 %v7526_v1, %v7525_v12 }
 0x307   :  { %v6344_v54 = vadd.f32 %v7527_v31, %v6260_v32 }
 0x3c0   :  { %v7560_v33 = vpop.f32.mrb[128].mxu1 }
 0x3c1   :  { %v7561_v3 = vpop.f32.mrb[129].mxu1 }
 0x3c2   :  { %v7562_v17 = vadd.f32 %v7561_v3, %v7560_v33 }
 0x3c4   :  { %v6414_v34 = vadd.f32 %v7562_v17, %v6329_v28  ;;  %v7563_v18 = vpop.f32.mrb[130].mxu1 }
 0x3c5   :  { %v7564_v38 = vpop.f32.mrb[131].mxu1 }
 0x3c6   :  { %v6432_v24 = vadd.f32 3.0, %v6414_v34  ;;  %v7565_v45 = vadd.f32 %v7564_v38, %v7563_v18 }
 0x3c8   :  { %v6436_v5 = vmax.f32 %v6432_v24, 0.0  ;;  %v6419_v37 = vadd.f32 %v7565_v45, %v6334_v52  ;;  %v7566_v48 = vpop.f32.mrb[132].mxu1 }
 0x3c9   :  { %v7567_v4 = vpop.f32.mrb[133].mxu1 }
 0x3ca   :  { %v6440_v7 = vmin.f32 %v6436_v5, 6.0  ;;  %v6433_v44 = vadd.f32 3.0, %v6419_v37  ;;  %v7568_v39 = vadd.f32 %v7567_v4, %v7566_v48 }
 0x3cc   :  { %v6444_v60 = vmul.f32 %v6440_v7, %v6414_v34  ;;  %v6437_v51 = vmax.f32 %v6433_v44, 0.0  ;;  %v6424_v2 = vadd.f32 %v7568_v39, %v6339_v46  ;;  %v7569_v35 = vpop.f32.mrb[134].mxu1 }
 0x3cd   :  { %v7570_v59 = vpop.f32.mrb[135].mxu1 }
 0x3ce   :  { %v6448_v58 = vmul.f32 0.16666667, %v6444_v60  ;;  %v6441_v15 = vmin.f32 %v6437_v51, 6.0  ;;  %v6434_v29 = vadd.f32 3.0, %v6424_v2  ;;  %v7571_v40 = vadd.f32 %v7570_v59, %v7569_v35 }
 0x3d0   :  { %6452 = vst.msk [vmem:[%s12238_s5] sm:$0xff] %vm5639_vm1, %v6448_v58  ;;  %v6445_v47 = vmul.f32 %v6441_v15, %v6419_v37  ;;  %v6438_v56 = vmax.f32 %v6434_v29, 0.0  ;;  %v6429_v57 = vadd.f32 %v7571_v40, %v6344_v54 }
 0x3d2   :  { %v6449_v0 = vmul.f32 0.16666667, %v6445_v47  ;;  %v6442_v50 = vmin.f32 %v6438_v56, 6.0  ;;  %v6435_v36 = vadd.f32 3.0, %v6429_v57 }
 0x3d4   :  { %6453 = vst.msk [vmem:[%s12238_s5 + $0x8] sm:$0xff] %vm5639_vm1, %v6449_v0  ;;  %v6446_v16 = vmul.f32 %v6442_v50, %v6424_v2  ;;  %v6439_v23 = vmax.f32 %v6435_v36, 0.0 }
 0x3d6   :  { %v6450_v21 = vmul.f32 0.16666667, %v6446_v16  ;;  %v6443_v55 = vmin.f32 %v6439_v23, 6.0 }
 0x3d8   :  { %6454 = vst.msk [vmem:[%s12238_s5 + $0x10] sm:$0xff] %vm5639_vm1, %v6450_v21  ;;  %v6447_v25 = vmul.f32 %v6443_v55, %v6429_v57 }
 0x3da   :  { %v6451_v9 = vmul.f32 0.16666667, %v6447_v25 }
 0x3dc   :  { %6455 = vst.msk [vmem:[%s12238_s5 + $0x18] sm:$0xff] %vm5639_vm1, %v6451_v9 }

</bundles_post_ra>
